<compile_context>
chip_gen: v7x
topology: tpu7x:2x2x1
jax: 0.10.0
libtpu: 0.0.40
codegen_flags: <defaults>
</compile_context>

<pallas_src>
import math

import jax
import jax.numpy as jnp
from jax.experimental import pallas as pl
from jax.experimental.pallas import tpu as pltpu


# ----------------------------------------------------------------------------
# Helpers (plain-JAX glue)
# ----------------------------------------------------------------------------
def _round_up(n, m):
    return -(-n // m) * m


def get_timestep_embedding(timesteps, embedding_dim):
    # TODO(synk): get_timestep_embedding is not defined in the provided snippet; the standard
    # DDPM sinusoidal embedding (sin | cos, log-spaced frequencies) is assumed.
    half_dim = embedding_dim // 2
    emb = math.log(10000.0) / (half_dim - 1)
    emb = jnp.exp(jnp.arange(half_dim, dtype=jnp.float32) * -emb)
    emb = timesteps.astype(jnp.float32)[:, None] * emb[None, :]
    emb = jnp.concatenate([jnp.sin(emb), jnp.cos(emb)], axis=1)
    if embedding_dim % 2 == 1:
        emb = jnp.pad(emb, ((0, 0), (0, 1)))
    return emb


def _gelu(x):
    # exact (erf-based) GELU, matching torch.nn.GELU() default
    return 0.5 * x * (1.0 + jax.lax.erf(x * (1.0 / math.sqrt(2.0))))


def _act_fn(name):
    if name == "gelu":
        return _gelu
    if name == "relu":
        return lambda x: jnp.maximum(x, 0.0)
    if name == "silu":
        return lambda x: x * jax.nn.sigmoid(x)
    raise ValueError("act must be gelu or relu or silu")


def _pad2d(m, rows, cols):
    r, c = m.shape
    return jnp.pad(m, ((0, rows - r), (0, cols - c)))


def _default_tile_b(B):
    kind = ""
    try:
        kind = jax.devices()[0].device_kind.lower()
    except Exception:
        pass
    dual_tc = ("v7" in kind) or ("7x" in kind)
    if dual_tc:
        # v7x: 2 TensorCores/chip -> keep >=2 grid steps whenever B > 128 so both cores get work.
        return 128 if B <= 512 else 256
    # Single-TC chips (v5e/v6e): fewer, fatter tiles amortize the ~0.35us per-grid-step overhead.
    return min(512, _round_up(max(B, 1), 128))


# ----------------------------------------------------------------------------
# Parameter packing (hoisted out of the per-call path; call once per parameter set)
# ----------------------------------------------------------------------------
def prepare_cmlp_params(params, cfg, t_in_kernel, param_dtype=jnp.float32):
    """Pack CMLP parameters into a few shape-grouped, (8,128)-aligned slabs.

    t_in_kernel=False  -> scalar-t mode: t-embedders are folded outside the kernel, so they are
                          excluded from the packs (kernel conditionings = v conditionings only).
    t_in_kernel=True   -> per-batch-t mode: t conditioning is embedded inside the kernel.
    """
    dims = cfg["dims"]
    n_layers = len(dims) - 1
    t_conditioning = cfg["t_conditioning"]
    cond_offset = 1 if (t_conditioning and not t_in_kernel) else 0
    kcond_dims = list(cfg["conditioning_dims"][cond_offset:])
    n_k = len(kcond_dims)

    P = [_round_up(d, 128) for d in dims]          # padded feature widths (128-aligned)
    CP = [_round_up(d, 128) for d in kcond_dims]   # padded conditioning widths

    def cast(a):
        return jnp.asarray(a, param_dtype)

    # group 0/1: main layer weights / biases
    rw = max(P[1:])
    cw = max(P[:-1])
    w_pack = jnp.stack([_pad2d(cast(params["layers"][i][0]), rw, cw) for i in range(n_layers)])
    b_pack = jnp.stack(
        [jnp.pad(jnp.asarray(params["layers"][i][1], jnp.float32), (0, rw - dims[i + 1]))
         for i in range(n_layers)], axis=1)        # (rw, n_layers): column i = bias of layer i

    prepared = dict(P=tuple(P), CP=tuple(CP), cond_offset=cond_offset, n_k=n_k,
                    n_layers=n_layers, t_in_kernel=t_in_kernel, param_dtype=param_dtype,
                    w_pack=w_pack, b_pack=b_pack, e_packs=None)

    # groups 2-5: per-layer conditioning embedders that run inside the kernel
    n_emb = (n_layers - 1) * n_k
    if n_emb > 0:
        rh = max(P[1:n_layers])                    # hidden (non-final) output widths
        ce1 = max(CP)
        e1w, e1b, e2w, e2b = [], [], [], []
        for i in range(n_layers - 1):
            dout = dims[i + 1]
            for j in range(n_k):
                we1, be1, we2, be2 = params["embedders"][i][cond_offset + j]
                e1w.append(_pad2d(cast(we1), rh, ce1))
                e1b.append(jnp.pad(jnp.asarray(be1, jnp.float32), (0, rh - dout)))
                e2w.append(_pad2d(cast(we2), rh, rh))
                e2b.append(jnp.pad(jnp.asarray(be2, jnp.float32), (0, rh - dout)))
        prepared["e_packs"] = (jnp.stack(e1w), jnp.stack(e1b, axis=1),
                               jnp.stack(e2w), jnp.stack(e2b, axis=1))
    return prepared


# ----------------------------------------------------------------------------
# Pallas kernel
# ----------------------------------------------------------------------------
def _make_cmlp_kernel(prepared, dims, act_name, has_tbias):
    act = _act_fn(act_name)
    P = prepared["P"]
    CP = prepared["CP"]
    n_layers = prepared["n_layers"]
    n_k = prepared["n_k"]
    has_emb = prepared["e_packs"] is not None
    out_rows = _round_up(dims[-1], 8)

    def kernel(*refs):
        idx = 0
        x_ref = refs[idx]; idx += 1
        cond_refs = refs[idx:idx + n_k]; idx += n_k
        tb_ref = None
        if has_tbias:
            tb_ref = refs[idx]; idx += 1
        wl_ref = refs[idx]; bl_ref = refs[idx + 1]; idx += 2
        if has_emb:
            e1w_ref, e1b_ref, e2w_ref, e2b_ref = refs[idx:idx + 4]; idx += 4
        out_ref = refs[idx]

        def mm(w, v):
            # MXU matmul with f32 accumulation; cast the activation to the weight dtype only
            # if the packed weights are stored in a narrower dtype (e.g. bf16).
            if v.dtype != w.dtype:
                v = v.astype(w.dtype)
            return jnp.dot(w, v, preferred_element_type=jnp.float32)

        h = x_ref[...].astype(jnp.float32)                       # (P[0], tile_b), lanes = batch
        for i in range(n_layers):
            # (8,128)-aligned static slices of the packed slabs (free ref views, unmasked loads)
            w = wl_ref[i, 0:P[i + 1], 0:P[i]]
            b = bl_ref[0:P[i + 1], i:i + 1]
            h = mm(w, h) + b
            if i < n_layers - 1:
                if has_tbias:                                    # scalar-t path folded outside
                    h = h + tb_ref[0:P[i + 1], i:i + 1]
                for j in range(n_k):
                    k = i * n_k + j
                    c = cond_refs[j][...]                        # load at use site (short live range)
                    we1 = e1w_ref[k, 0:P[i + 1], 0:CP[j]]
                    be1 = e1b_ref[0:P[i + 1], k:k + 1]
                    we2 = e2w_ref[k, 0:P[i + 1], 0:P[i + 1]]
                    be2 = e2b_ref[0:P[i + 1], k:k + 1]
                    e = _gelu(mm(we1, c) + be1)
                    e = _gelu(mm(we2, e) + be2)
                    h = h + e
                h = act(h)
        out_ref[...] = h[0:out_rows, :].astype(out_ref.dtype)

    return kernel


# ----------------------------------------------------------------------------
# Wrapper
# ----------------------------------------------------------------------------
def cmlp_forward_pallas(x, t, v_conditionings, params, cfg, prepared=None, tile_b=None,
                        param_dtype=jnp.float32):
    """CMLP.forward. x: (B, in_dim); t: scalar / (B,) / None; v_conditionings: list of (B, cdim)."""
    B, in_dim = x.shape
    dims = cfg["dims"]
    n_layers = len(dims) - 1
    out_dim = dims[-1]
    act_name = cfg.get("act", "gelu")
    t_conditioning = cfg["t_conditioning"]
    v_conditionings = list(v_conditionings) if v_conditionings is not None else []

    # ---- timestep conditioning ----
    kernel_conds = []
    folded_t = None
    if t is not None:
        if not t_conditioning:
            raise ValueError("t is not None, but t_conditioning is False")
        t = jnp.asarray(t)
        scalar_t = (t.ndim == 0) or (t.size == 1)
        (wt1, bt1), (wt2, bt2) = params["t_embed"]
        if scalar_t:
            # Scalar timestep: the whole t path is batch-invariant -> compute once in plain JAX
            # and pass each layer's t-embedder output as a tiny per-layer bias column.
            temb = get_timestep_embedding(jnp.reshape(t, (1,)), cfg["t_embedding_dim"])  # (1, Dt)
            tcol = temb.T                                                                # (Dt, 1)
            tcond = wt2 @ _gelu(wt1 @ tcol + bt1[:, None]) + bt2[:, None]                # (Dtc, 1)
            folded_t = []
            for i in range(n_layers - 1):
                we1, be1, we2, be2 = params["embedders"][i][0]   # t is conditioning index 0
                e = _gelu(we1 @ tcond + be1[:, None])
                e = _gelu(we2 @ e + be2[:, None])
                folded_t.append(e)                               # (dims[i+1], 1)
        else:
            # Per-batch timestep: embed_t_conditioning is batched glue; per-layer t-embedders run
            # inside the kernel like any other conditioning.
            t_b = jnp.broadcast_to(jnp.reshape(t, (-1,)), (B,))
            temb = get_timestep_embedding(t_b, cfg["t_embedding_dim"])                   # (B, Dt)
            tcond = _gelu(temb @ wt1.T + bt1) @ wt2.T + bt2                              # (B, Dtc)
            kernel_conds.append(tcond)
        t_in_kernel = not scalar_t
    else:
        if t_conditioning:
            raise ValueError("t is None, but t_conditioning is True")
        t_in_kernel = False

    kernel_conds.extend(v_conditionings)

    if prepared is None:
        prepared = prepare_cmlp_params(params, cfg, t_in_kernel=t_in_kernel,
                                       param_dtype=param_dtype)
    assert prepared["t_in_kernel"] == t_in_kernel, "prepared params built for a different t mode"

    P = list(prepared["P"])
    CP = list(prepared["CP"])
    n_k = prepared["n_k"]
    assert n_k == len(kernel_conds), "conditioning count mismatch with prepared params"

    # ---- batch tiling: batch on the 128-wide lane axis, always 128-aligned ----
    if tile_b is None:
        tile_b = _default_tile_b(B)
    tile_b = _round_up(tile_b, 128)
    b_pad = _round_up(max(B, 1), tile_b)

    def to_tile(a, feat_pad):
        at = a.T.astype(jnp.float32)                             # (features, B): batch on lanes
        return jnp.pad(at, ((0, feat_pad - at.shape[0]), (0, b_pad - B)))

    xt = to_tile(x, P[0])
    cond_ts = [to_tile(c, CP[j]) for j, c in enumerate(kernel_conds)]

    inputs = [xt]
    in_specs = [pl.BlockSpec((P[0], tile_b), lambda i: (0, i))]
    for j, c in enumerate(cond_ts):
        inputs.append(c)
        in_specs.append(pl.BlockSpec((CP[j], tile_b), lambda i: (0, i)))

    # grid-invariant weight packs
    has_tbias = (folded_t is not None) and (n_layers > 1)
    weight_inputs = []
    if has_tbias:
        rh = max(P[1:n_layers])
        tb = jnp.concatenate([_pad2d(e, rh, 1) for e in folded_t], axis=1)   # (rh, n_layers-1)
        weight_inputs.append(tb)
    weight_inputs += [prepared["w_pack"], prepared["b_pack"]]
    if prepared["e_packs"] is not None:
        weight_inputs += list(prepared["e_packs"])
    inputs += weight_inputs

    def invariant_spec(a, pm):
        im = (lambda i: (0, 0, 0)) if a.ndim == 3 else (lambda i: (0, 0))
        if pm is None:
            return pl.BlockSpec(a.shape, im)
        return pl.BlockSpec(a.shape, im, pipeline_mode=pm)

    out_rows = _round_up(out_dim, 8)
    out_shape = jax.ShapeDtypeStruct((out_rows, b_pad), x.dtype)
    out_spec = pl.BlockSpec((out_rows, tile_b), lambda i: (0, i))
    grid = (b_pad // tile_b,)

    kernel = _make_cmlp_kernel(prepared, dims, act_name, has_tbias)

    # rough cost estimate (scheduler hint) -- optional, ignore failures
    flops = 0
    for i in range(n_layers):
        flops += 2 * dims[i] * dims[i + 1] * b_pad
        if i < n_layers - 1:
            for j in range(n_k):
                cd = cfg["conditioning_dims"][prepared["cond_offset"] + j]
                flops += 2 * (cd + dims[i + 1]) * dims[i + 1] * b_pad
    bytes_accessed = sum(int(a.size) * a.dtype.itemsize for a in inputs) + out_rows * b_pad * 4
    transcendentals = b_pad * sum(dims[1:-1]) * (1 + 2 * n_k)
    try:
        cost = pl.CostEstimate(flops=int(flops), transcendentals=int(transcendentals),
                               bytes_accessed=int(bytes_accessed))
    except Exception:
        cost = None

    # explicit scoped-VMEM budget: double-buffered activation tiles + weight packs + headroom
    act_bytes = 4 * tile_b * (P[0] + sum(CP) + out_rows) * 2
    weight_bytes = sum(int(a.size) * a.dtype.itemsize for a in weight_inputs)
    vmem_limit = int(min(64 << 20, max(16 << 20, 2 * (act_bytes + 2 * weight_bytes) + (8 << 20))))
    cparams = pltpu.CompilerParams(dimension_semantics=("parallel",),
                                   vmem_limit_bytes=vmem_limit)

    def run(single_buffer_weights):
        pm = pl.Buffered(1) if single_buffer_weights else None
        w_specs = [invariant_spec(a, pm) for a in weight_inputs]
        return pl.pallas_call(
            kernel,
            out_shape=out_shape,
            grid=grid,
            in_specs=in_specs + w_specs,
            out_specs=out_spec,
            compiler_params=cparams,
            cost_estimate=cost,
        )(*inputs)

    try:
        out_t = run(True)    # grid-invariant weight packs single-buffered (halves their VMEM)
    except Exception:
        out_t = run(False)   # fallback if this JAX build rejects pl.Buffered(1)

    return out_t.T[:B, :out_dim]


# ----------------------------------------------------------------------------
# Deterministic parameter init (shapes dictated by CMLP.__init__; PyTorch layout)
# ----------------------------------------------------------------------------
def init_params(key, cfg):
    def linear(k, fan_in, fan_out):
        k1, k2 = jax.random.split(k)
        bound = 1.0 / math.sqrt(fan_in)
        w = jax.random.uniform(k1, (fan_out, fan_in), jnp.float32, -bound, bound)
        b = jax.random.uniform(k2, (fan_out,), jnp.float32, -bound, bound)
        return w, b

    keys = iter(jax.random.split(key, 128))
    params = {}
    if cfg["t_conditioning"]:
        dt, dtc = cfg["t_embedding_dim"], cfg["t_conditioning_dim"]
        params["t_embed"] = [linear(next(keys), dt, dtc), linear(next(keys), dtc, dtc)]
    dims = cfg["dims"]
    params["layers"] = [linear(next(keys), din, dout) for din, dout in zip(dims[:-1], dims[1:])]
    params["embedders"] = []
    for i in range(len(dims) - 2):                 # embedders for every non-final layer
        dout = dims[i + 1]
        per_cond = []
        for cdim in cfg["conditioning_dims"]:      # one embedder per conditioning (t first)
            we1, be1 = linear(next(keys), cdim, dout)
            we2, be2 = linear(next(keys), dout, dout)
            per_cond.append((we1, be1, we2, be2))
        params["embedders"].append(per_cond)
    return params


# ----------------------------------------------------------------------------
# Pure-JAX reference (mirrors the PyTorch module exactly)
# ----------------------------------------------------------------------------
def cmlp_forward_ref(x, t, v_conditionings, params, cfg):
    B = x.shape[0]
    act = _act_fn(cfg.get("act", "gelu"))
    conds = []
    if t is not None:
        t_b = jnp.broadcast_to(jnp.asarray(t), (B,))
        temb = get_timestep_embedding(t_b, cfg["t_embedding_dim"])
        (wt1, bt1), (wt2, bt2) = params["t_embed"]
        tc = _gelu(temb @ wt1.T + bt1) @ wt2.T + bt2
        conds.append(tc)
    conds.extend(v_conditionings or [])
    dims = cfg["dims"]
    n_layers = len(dims) - 1
    h = x
    for i in range(n_layers):
        w, b = params["layers"][i]
        h = h @ w.T + b
        if i < n_layers - 1:
            for (we1, be1, we2, be2), c in zip(params["embedders"][i], conds):
                e = _gelu(c @ we1.T + be1)
                e = _gelu(e @ we2.T + be2)
                h = h + e
            h = act(h)
    return h


# ----------------------------------------------------------------------------
if __name__ == "__main__":
    cfg = dict(
        in_dim=16,
        out_dim=8,
        h_dims=[32, 32],
        v_conditioning_dims=[12],
        t_conditioning=True,
        t_embedding_dim=64,
        act="gelu",
    )
    cfg["t_conditioning_dim"] = int(4 * cfg["t_embedding_dim"])
    cfg["dims"] = [cfg["in_dim"]] + cfg["h_dims"] + [cfg["out_dim"]]
    cfg["conditioning_dims"] = (
        ([cfg["t_conditioning_dim"]] if cfg["t_conditioning"] else [])
        + cfg["v_conditioning_dims"]
    )

    key = jax.random.PRNGKey(0)
    kx, kv, kp, kt = jax.random.split(key, 4)

    B = 16
    x = jax.random.normal(kx, (B, cfg["in_dim"]), jnp.float32)
    v = jax.random.normal(kv, (B, cfg["v_conditioning_dims"][0]), jnp.float32)
    params = init_params(kp, cfg)

    # scalar timestep (common diffusion case): t path folded into tiny per-layer bias columns;
    # weight packs prepared once and reused across calls.
    prep_scalar = prepare_cmlp_params(params, cfg, t_in_kernel=False)
    t_scalar = jnp.float32(7.0)
    out = cmlp_forward_pallas(x, t_scalar, [v], params, cfg, prepared=prep_scalar)
    out = jax.block_until_ready(out)
    ref = cmlp_forward_ref(x, t_scalar, [v], params, cfg)
    assert out.shape == (B, cfg["out_dim"])
    err = float(jnp.max(jnp.abs(out - ref)))
    assert jnp.allclose(out, ref, atol=1e-3, rtol=1e-3), err

    # per-batch timestep: t-conditioning is embedded inside the kernel like any other conditioning
    prep_batched = prepare_cmlp_params(params, cfg, t_in_kernel=True)
    t_vec = jax.random.uniform(kt, (B,), jnp.float32, 0.0, 1000.0)
    out2 = cmlp_forward_pallas(x, t_vec, [v], params, cfg, prepared=prep_batched)
    out2 = jax.block_until_ready(out2)
    ref2 = cmlp_forward_ref(x, t_vec, [v], params, cfg)
    err2 = float(jnp.max(jnp.abs(out2 - ref2)))
    assert jnp.allclose(out2, ref2, atol=1e-3, rtol=1e-3), err2

    print("KERNEL_OK")
</pallas_src>

<mosaic_0001>
module attributes {stable_mosaic.version = 11 : i64} {
  func.func @kernel(%arg0: i32, %arg1: memref<128x128xf32, #tpu.memory_space<vmem>>, %arg2: memref<128x128xf32, #tpu.memory_space<vmem>>, %arg3: memref<128x2xf32, #tpu.memory_space<vmem>>, %arg4: memref<3x128x128xf32, #tpu.memory_space<vmem>>, %arg5: memref<128x3xf32, #tpu.memory_space<vmem>>, %arg6: memref<2x128x128xf32, #tpu.memory_space<vmem>>, %arg7: memref<128x2xf32, #tpu.memory_space<vmem>>, %arg8: memref<2x128x128xf32, #tpu.memory_space<vmem>>, %arg9: memref<128x2xf32, #tpu.memory_space<vmem>>, %arg10: memref<8x128xf32, #tpu.memory_space<vmem>>) attributes {dimension_semantics = [#tpu.dimension_semantics<parallel>], iteration_bounds = array<i64: 1>, scalar_prefetch = 0 : i64, scratch_operands = 0 : i64, tpu.core_type = #tpu.core_type<tc>, window_params = [{transform_indices = @transform_0, window_bounds = array<i64: 128, 128>}, {transform_indices = @transform_1, window_bounds = array<i64: 128, 128>}, {pipeline_mode = #tpu.pipeline_mode<synchronous>, transform_indices = @transform_2, window_bounds = array<i64: 128, 2>}, {pipeline_mode = #tpu.pipeline_mode<synchronous>, transform_indices = @transform_3, window_bounds = array<i64: 3, 128, 128>}, {pipeline_mode = #tpu.pipeline_mode<synchronous>, transform_indices = @transform_4, window_bounds = array<i64: 128, 3>}, {pipeline_mode = #tpu.pipeline_mode<synchronous>, transform_indices = @transform_5, window_bounds = array<i64: 2, 128, 128>}, {pipeline_mode = #tpu.pipeline_mode<synchronous>, transform_indices = @transform_6, window_bounds = array<i64: 128, 2>}, {pipeline_mode = #tpu.pipeline_mode<synchronous>, transform_indices = @transform_7, window_bounds = array<i64: 2, 128, 128>}, {pipeline_mode = #tpu.pipeline_mode<synchronous>, transform_indices = @transform_8, window_bounds = array<i64: 128, 2>}, {transform_indices = @transform_9, window_bounds = array<i64: 8, 128>}]} {
    %c0 = arith.constant 0 : index
    %c0_0 = arith.constant 0 : index
    %0 = vector.load %arg1[%c0, %c0_0] : memref<128x128xf32, #tpu.memory_space<vmem>>, vector<128x128xf32>
    %c0_1 = arith.constant 0 : index
    %c0_2 = arith.constant 0 : index
    %c0_3 = arith.constant 0 : index
    %1 = vector.load %arg4[%c0_1, %c0_2, %c0_3] : memref<3x128x128xf32, #tpu.memory_space<vmem>>, vector<1x128x128xf32>
    %2 = vector.shape_cast %1 : vector<1x128x128xf32> to vector<128x128xf32>
    %c0_4 = arith.constant 0 : index
    %c0_5 = arith.constant 0 : index
    %3 = vector.load %arg5[%c0_4, %c0_5] : memref<128x3xf32, #tpu.memory_space<vmem>>, vector<128x1xf32>
    %cst = arith.constant dense<0.000000e+00> : vector<128x128xf32>
    %4 = tpu.matmul %2, %0, %cst {dimension_numbers = #tpu.dot_dimension_numbers<[1], [0], [0], [1], [0, 0, 1, 1], [], []>} : vector<128x128xf32>, vector<128x128xf32>, vector<128x128xf32> -> vector<128x128xf32>
    %5 = vector.broadcast %3 : vector<128x1xf32> to vector<128x128xf32>
    %6 = arith.addf %4, %5 : vector<128x128xf32>
    %c0_6 = arith.constant 0 : index
    %c0_7 = arith.constant 0 : index
    %7 = vector.load %arg3[%c0_6, %c0_7] : memref<128x2xf32, #tpu.memory_space<vmem>>, vector<128x1xf32>
    %8 = vector.broadcast %7 : vector<128x1xf32> to vector<128x128xf32>
    %9 = arith.addf %6, %8 : vector<128x128xf32>
    %c0_8 = arith.constant 0 : index
    %c0_9 = arith.constant 0 : index
    %10 = vector.load %arg2[%c0_8, %c0_9] : memref<128x128xf32, #tpu.memory_space<vmem>>, vector<128x128xf32>
    %c0_10 = arith.constant 0 : index
    %c0_11 = arith.constant 0 : index
    %c0_12 = arith.constant 0 : index
    %11 = vector.load %arg6[%c0_10, %c0_11, %c0_12] : memref<2x128x128xf32, #tpu.memory_space<vmem>>, vector<1x128x128xf32>
    %12 = vector.shape_cast %11 : vector<1x128x128xf32> to vector<128x128xf32>
    %c0_13 = arith.constant 0 : index
    %c0_14 = arith.constant 0 : index
    %13 = vector.load %arg7[%c0_13, %c0_14] : memref<128x2xf32, #tpu.memory_space<vmem>>, vector<128x1xf32>
    %c0_15 = arith.constant 0 : index
    %c0_16 = arith.constant 0 : index
    %c0_17 = arith.constant 0 : index
    %14 = vector.load %arg8[%c0_15, %c0_16, %c0_17] : memref<2x128x128xf32, #tpu.memory_space<vmem>>, vector<1x128x128xf32>
    %15 = vector.shape_cast %14 : vector<1x128x128xf32> to vector<128x128xf32>
    %c0_18 = arith.constant 0 : index
    %c0_19 = arith.constant 0 : index
    %16 = vector.load %arg9[%c0_18, %c0_19] : memref<128x2xf32, #tpu.memory_space<vmem>>, vector<128x1xf32>
    %cst_20 = arith.constant dense<0.000000e+00> : vector<128x128xf32>
    %17 = tpu.matmul %12, %10, %cst_20 {dimension_numbers = #tpu.dot_dimension_numbers<[1], [0], [0], [1], [0, 0, 1, 1], [], []>} : vector<128x128xf32>, vector<128x128xf32>, vector<128x128xf32> -> vector<128x128xf32>
    %18 = vector.broadcast %13 : vector<128x1xf32> to vector<128x128xf32>
    %19 = arith.addf %17, %18 : vector<128x128xf32>
    %cst_21 = arith.constant 5.000000e-01 : f32
    %20 = vector.broadcast %cst_21 : f32 to vector<128x128xf32>
    %21 = arith.mulf %20, %19 : vector<128x128xf32>
    %cst_22 = arith.constant 0.707106769 : f32
    %22 = vector.broadcast %cst_22 : f32 to vector<128x128xf32>
    %23 = arith.mulf %19, %22 : vector<128x128xf32>
    %24 = math.erf %23 : vector<128x128xf32>
    %cst_23 = arith.constant 1.000000e+00 : f32
    %25 = vector.broadcast %cst_23 : f32 to vector<128x128xf32>
    %26 = arith.addf %25, %24 : vector<128x128xf32>
    %27 = arith.mulf %21, %26 : vector<128x128xf32>
    %cst_24 = arith.constant dense<0.000000e+00> : vector<128x128xf32>
    %28 = tpu.matmul %15, %27, %cst_24 {dimension_numbers = #tpu.dot_dimension_numbers<[1], [0], [0], [1], [0, 0, 1, 1], [], []>} : vector<128x128xf32>, vector<128x128xf32>, vector<128x128xf32> -> vector<128x128xf32>
    %29 = vector.broadcast %16 : vector<128x1xf32> to vector<128x128xf32>
    %30 = arith.addf %28, %29 : vector<128x128xf32>
    %cst_25 = arith.constant 5.000000e-01 : f32
    %31 = vector.broadcast %cst_25 : f32 to vector<128x128xf32>
    %32 = arith.mulf %31, %30 : vector<128x128xf32>
    %cst_26 = arith.constant 0.707106769 : f32
    %33 = vector.broadcast %cst_26 : f32 to vector<128x128xf32>
    %34 = arith.mulf %30, %33 : vector<128x128xf32>
    %35 = math.erf %34 : vector<128x128xf32>
    %cst_27 = arith.constant 1.000000e+00 : f32
    %36 = vector.broadcast %cst_27 : f32 to vector<128x128xf32>
    %37 = arith.addf %36, %35 : vector<128x128xf32>
    %38 = arith.mulf %32, %37 : vector<128x128xf32>
    %39 = arith.addf %9, %38 : vector<128x128xf32>
    %cst_28 = arith.constant 5.000000e-01 : f32
    %40 = vector.broadcast %cst_28 : f32 to vector<128x128xf32>
    %41 = arith.mulf %40, %39 : vector<128x128xf32>
    %cst_29 = arith.constant 0.707106769 : f32
    %42 = vector.broadcast %cst_29 : f32 to vector<128x128xf32>
    %43 = arith.mulf %39, %42 : vector<128x128xf32>
    %44 = math.erf %43 : vector<128x128xf32>
    %cst_30 = arith.constant 1.000000e+00 : f32
    %45 = vector.broadcast %cst_30 : f32 to vector<128x128xf32>
    %46 = arith.addf %45, %44 : vector<128x128xf32>
    %47 = arith.mulf %41, %46 : vector<128x128xf32>
    %c1 = arith.constant 1 : index
    %c0_31 = arith.constant 0 : index
    %c0_32 = arith.constant 0 : index
    %48 = vector.load %arg4[%c1, %c0_31, %c0_32] : memref<3x128x128xf32, #tpu.memory_space<vmem>>, vector<1x128x128xf32>
    %49 = vector.shape_cast %48 : vector<1x128x128xf32> to vector<128x128xf32>
    %c0_33 = arith.constant 0 : index
    %c1_34 = arith.constant 1 : index
    %50 = vector.load %arg5[%c0_33, %c1_34] : memref<128x3xf32, #tpu.memory_space<vmem>>, vector<128x1xf32>
    %cst_35 = arith.constant dense<0.000000e+00> : vector<128x128xf32>
    %51 = tpu.matmul %49, %47, %cst_35 {dimension_numbers = #tpu.dot_dimension_numbers<[1], [0], [0], [1], [0, 0, 1, 1], [], []>} : vector<128x128xf32>, vector<128x128xf32>, vector<128x128xf32> -> vector<128x128xf32>
    %52 = vector.broadcast %50 : vector<128x1xf32> to vector<128x128xf32>
    %53 = arith.addf %51, %52 : vector<128x128xf32>
    %c0_36 = arith.constant 0 : index
    %c1_37 = arith.constant 1 : index
    %54 = vector.load %arg3[%c0_36, %c1_37] : memref<128x2xf32, #tpu.memory_space<vmem>>, vector<128x1xf32>
    %55 = vector.broadcast %54 : vector<128x1xf32> to vector<128x128xf32>
    %56 = arith.addf %53, %55 : vector<128x128xf32>
    %c0_38 = arith.constant 0 : index
    %c0_39 = arith.constant 0 : index
    %57 = vector.load %arg2[%c0_38, %c0_39] : memref<128x128xf32, #tpu.memory_space<vmem>>, vector<128x128xf32>
    %c1_40 = arith.constant 1 : index
    %c0_41 = arith.constant 0 : index
    %c0_42 = arith.constant 0 : index
    %58 = vector.load %arg6[%c1_40, %c0_41, %c0_42] : memref<2x128x128xf32, #tpu.memory_space<vmem>>, vector<1x128x128xf32>
    %59 = vector.shape_cast %58 : vector<1x128x128xf32> to vector<128x128xf32>
    %c0_43 = arith.constant 0 : index
    %c1_44 = arith.constant 1 : index
    %60 = vector.load %arg7[%c0_43, %c1_44] : memref<128x2xf32, #tpu.memory_space<vmem>>, vector<128x1xf32>
    %c1_45 = arith.constant 1 : index
    %c0_46 = arith.constant 0 : index
    %c0_47 = arith.constant 0 : index
    %61 = vector.load %arg8[%c1_45, %c0_46, %c0_47] : memref<2x128x128xf32, #tpu.memory_space<vmem>>, vector<1x128x128xf32>
    %62 = vector.shape_cast %61 : vector<1x128x128xf32> to vector<128x128xf32>
    %c0_48 = arith.constant 0 : index
    %c1_49 = arith.constant 1 : index
    %63 = vector.load %arg9[%c0_48, %c1_49] : memref<128x2xf32, #tpu.memory_space<vmem>>, vector<128x1xf32>
    %cst_50 = arith.constant dense<0.000000e+00> : vector<128x128xf32>
    %64 = tpu.matmul %59, %57, %cst_50 {dimension_numbers = #tpu.dot_dimension_numbers<[1], [0], [0], [1], [0, 0, 1, 1], [], []>} : vector<128x128xf32>, vector<128x128xf32>, vector<128x128xf32> -> vector<128x128xf32>
    %65 = vector.broadcast %60 : vector<128x1xf32> to vector<128x128xf32>
    %66 = arith.addf %64, %65 : vector<128x128xf32>
    %cst_51 = arith.constant 5.000000e-01 : f32
    %67 = vector.broadcast %cst_51 : f32 to vector<128x128xf32>
    %68 = arith.mulf %67, %66 : vector<128x128xf32>
    %cst_52 = arith.constant 0.707106769 : f32
    %69 = vector.broadcast %cst_52 : f32 to vector<128x128xf32>
    %70 = arith.mulf %66, %69 : vector<128x128xf32>
    %71 = math.erf %70 : vector<128x128xf32>
    %cst_53 = arith.constant 1.000000e+00 : f32
    %72 = vector.broadcast %cst_53 : f32 to vector<128x128xf32>
    %73 = arith.addf %72, %71 : vector<128x128xf32>
    %74 = arith.mulf %68, %73 : vector<128x128xf32>
    %cst_54 = arith.constant dense<0.000000e+00> : vector<128x128xf32>
    %75 = tpu.matmul %62, %74, %cst_54 {dimension_numbers = #tpu.dot_dimension_numbers<[1], [0], [0], [1], [0, 0, 1, 1], [], []>} : vector<128x128xf32>, vector<128x128xf32>, vector<128x128xf32> -> vector<128x128xf32>
    %76 = vector.broadcast %63 : vector<128x1xf32> to vector<128x128xf32>
    %77 = arith.addf %75, %76 : vector<128x128xf32>
    %cst_55 = arith.constant 5.000000e-01 : f32
    %78 = vector.broadcast %cst_55 : f32 to vector<128x128xf32>
    %79 = arith.mulf %78, %77 : vector<128x128xf32>
    %cst_56 = arith.constant 0.707106769 : f32
    %80 = vector.broadcast %cst_56 : f32 to vector<128x128xf32>
    %81 = arith.mulf %77, %80 : vector<128x128xf32>
    %82 = math.erf %81 : vector<128x128xf32>
    %cst_57 = arith.constant 1.000000e+00 : f32
    %83 = vector.broadcast %cst_57 : f32 to vector<128x128xf32>
    %84 = arith.addf %83, %82 : vector<128x128xf32>
    %85 = arith.mulf %79, %84 : vector<128x128xf32>
    %86 = arith.addf %56, %85 : vector<128x128xf32>
    %cst_58 = arith.constant 5.000000e-01 : f32
    %87 = vector.broadcast %cst_58 : f32 to vector<128x128xf32>
    %88 = arith.mulf %87, %86 : vector<128x128xf32>
    %cst_59 = arith.constant 0.707106769 : f32
    %89 = vector.broadcast %cst_59 : f32 to vector<128x128xf32>
    %90 = arith.mulf %86, %89 : vector<128x128xf32>
    %91 = math.erf %90 : vector<128x128xf32>
    %cst_60 = arith.constant 1.000000e+00 : f32
    %92 = vector.broadcast %cst_60 : f32 to vector<128x128xf32>
    %93 = arith.addf %92, %91 : vector<128x128xf32>
    %94 = arith.mulf %88, %93 : vector<128x128xf32>
    %c2 = arith.constant 2 : index
    %c0_61 = arith.constant 0 : index
    %c0_62 = arith.constant 0 : index
    %95 = vector.load %arg4[%c2, %c0_61, %c0_62] : memref<3x128x128xf32, #tpu.memory_space<vmem>>, vector<1x128x128xf32>
    %96 = vector.shape_cast %95 : vector<1x128x128xf32> to vector<128x128xf32>
    %c0_63 = arith.constant 0 : index
    %c2_64 = arith.constant 2 : index
    %97 = vector.load %arg5[%c0_63, %c2_64] : memref<128x3xf32, #tpu.memory_space<vmem>>, vector<128x1xf32>
    %cst_65 = arith.constant dense<0.000000e+00> : vector<128x128xf32>
    %98 = tpu.matmul %96, %94, %cst_65 {dimension_numbers = #tpu.dot_dimension_numbers<[1], [0], [0], [1], [0, 0, 1, 1], [], []>} : vector<128x128xf32>, vector<128x128xf32>, vector<128x128xf32> -> vector<128x128xf32>
    %99 = vector.broadcast %97 : vector<128x1xf32> to vector<128x128xf32>
    %100 = arith.addf %98, %99 : vector<128x128xf32>
    %101 = vector.extract_strided_slice %100 {offsets = [0, 0], sizes = [8, 128], strides = [1, 1]} : vector<128x128xf32> to vector<8x128xf32>
    %c0_66 = arith.constant 0 : index
    %c0_67 = arith.constant 0 : index
    %102 = vector.load %arg10[%c0_66, %c0_67] : memref<8x128xf32, #tpu.memory_space<vmem>>, vector<8x128xf32>
    tpu.vector_store %arg10[%c0_66, %c0_67], %101 {strides = array<i32>} : memref<8x128xf32, #tpu.memory_space<vmem>>, vector<8x128xf32>,
    return
  }
  func.func @transform_0(%arg0: i32) -> (i32, i32) {
    %c0_i32 = arith.constant 0 : i32
    %c0_i32_0 = arith.constant 0 : i32
    return %c0_i32, %arg0 : i32, i32
  }
  func.func @transform_1(%arg0: i32) -> (i32, i32) {
    %c0_i32 = arith.constant 0 : i32
    %c0_i32_0 = arith.constant 0 : i32
    return %c0_i32, %arg0 : i32, i32
  }
  func.func @transform_2(%arg0: i32) -> (i32, i32) {
    %c0_i32 = arith.constant 0 : i32
    %c0_i32_0 = arith.constant 0 : i32
    %c0_i32_1 = arith.constant 0 : i32
    return %c0_i32, %c0_i32_0 : i32, i32
  }
  func.func @transform_3(%arg0: i32) -> (i32, i32, i32) {
    %c0_i32 = arith.constant 0 : i32
    %c0_i32_0 = arith.constant 0 : i32
    %c0_i32_1 = arith.constant 0 : i32
    %c0_i32_2 = arith.constant 0 : i32
    return %c0_i32, %c0_i32_0, %c0_i32_1 : i32, i32, i32
  }
  func.func @transform_4(%arg0: i32) -> (i32, i32) {
    %c0_i32 = arith.constant 0 : i32
    %c0_i32_0 = arith.constant 0 : i32
    %c0_i32_1 = arith.constant 0 : i32
    return %c0_i32, %c0_i32_0 : i32, i32
  }
  func.func @transform_5(%arg0: i32) -> (i32, i32, i32) {
    %c0_i32 = arith.constant 0 : i32
    %c0_i32_0 = arith.constant 0 : i32
    %c0_i32_1 = arith.constant 0 : i32
    %c0_i32_2 = arith.constant 0 : i32
    return %c0_i32, %c0_i32_0, %c0_i32_1 : i32, i32, i32
  }
  func.func @transform_6(%arg0: i32) -> (i32, i32) {
    %c0_i32 = arith.constant 0 : i32
    %c0_i32_0 = arith.constant 0 : i32
    %c0_i32_1 = arith.constant 0 : i32
    return %c0_i32, %c0_i32_0 : i32, i32
  }
  func.func @transform_7(%arg0: i32) -> (i32, i32, i32) {
    %c0_i32 = arith.constant 0 : i32
    %c0_i32_0 = arith.constant 0 : i32
    %c0_i32_1 = arith.constant 0 : i32
    %c0_i32_2 = arith.constant 0 : i32
    return %c0_i32, %c0_i32_0, %c0_i32_1 : i32, i32, i32
  }
  func.func @transform_8(%arg0: i32) -> (i32, i32) {
    %c0_i32 = arith.constant 0 : i32
    %c0_i32_0 = arith.constant 0 : i32
    %c0_i32_1 = arith.constant 0 : i32
    return %c0_i32, %c0_i32_0 : i32, i32
  }
  func.func @transform_9(%arg0: i32) -> (i32, i32) {
    %c0_i32 = arith.constant 0 : i32
    %c0_i32_0 = arith.constant 0 : i32
    return %c0_i32, %arg0 : i32, i32
  }
}

module attributes {stable_mosaic.version = 11 : i64} {
  func.func @kernel(%arg0: i32, %arg1: memref<128x128xf32, #tpu.memory_space<vmem>>, %arg2: memref<128x128xf32, #tpu.memory_space<vmem>>, %arg3: memref<128x2xf32, #tpu.memory_space<vmem>>, %arg4: memref<3x128x128xf32, #tpu.memory_space<vmem>>, %arg5: memref<128x3xf32, #tpu.memory_space<vmem>>, %arg6: memref<2x128x128xf32, #tpu.memory_space<vmem>>, %arg7: memref<128x2xf32, #tpu.memory_space<vmem>>, %arg8: memref<2x128x128xf32, #tpu.memory_space<vmem>>, %arg9: memref<128x2xf32, #tpu.memory_space<vmem>>, %arg10: memref<8x128xf32, #tpu.memory_space<vmem>>) attributes {dimension_semantics = [#tpu.dimension_semantics<parallel>], iteration_bounds = array<i64: 1>, scalar_prefetch = 0 : i64, scratch_operands = 0 : i64, tpu.core_type = #tpu.core_type<tc>, window_params = [{transform_indices = @transform_0, window_bounds = array<i64: 128, 128>}, {transform_indices = @transform_1, window_bounds = array<i64: 128, 128>}, {pipeline_mode = #tpu.pipeline_mode<synchronous>, transform_indices = @transform_2, window_bounds = array<i64: 128, 2>}, {pipeline_mode = #tpu.pipeline_mode<synchronous>, transform_indices = @transform_3, window_bounds = array<i64: 3, 128, 128>}, {pipeline_mode = #tpu.pipeline_mode<synchronous>, transform_indices = @transform_4, window_bounds = array<i64: 128, 3>}, {pipeline_mode = #tpu.pipeline_mode<synchronous>, transform_indices = @transform_5, window_bounds = array<i64: 2, 128, 128>}, {pipeline_mode = #tpu.pipeline_mode<synchronous>, transform_indices = @transform_6, window_bounds = array<i64: 128, 2>}, {pipeline_mode = #tpu.pipeline_mode<synchronous>, transform_indices = @transform_7, window_bounds = array<i64: 2, 128, 128>}, {pipeline_mode = #tpu.pipeline_mode<synchronous>, transform_indices = @transform_8, window_bounds = array<i64: 128, 2>}, {transform_indices = @transform_9, window_bounds = array<i64: 8, 128>}]} {
    %c0 = arith.constant 0 : index
    %c0_0 = arith.constant 0 : index
    %0 = vector.load %arg1[%c0, %c0_0] : memref<128x128xf32, #tpu.memory_space<vmem>>, vector<128x128xf32>
    %c0_1 = arith.constant 0 : index
    %c0_2 = arith.constant 0 : index
    %c0_3 = arith.constant 0 : index
    %1 = vector.load %arg4[%c0_1, %c0_2, %c0_3] : memref<3x128x128xf32, #tpu.memory_space<vmem>>, vector<1x128x128xf32>
    %2 = vector.shape_cast %1 : vector<1x128x128xf32> to vector<128x128xf32>
    %c0_4 = arith.constant 0 : index
    %c0_5 = arith.constant 0 : index
    %3 = vector.load %arg5[%c0_4, %c0_5] : memref<128x3xf32, #tpu.memory_space<vmem>>, vector<128x1xf32>
    %cst = arith.constant dense<0.000000e+00> : vector<128x128xf32>
    %4 = tpu.matmul %2, %0, %cst {dimension_numbers = #tpu.dot_dimension_numbers<[1], [0], [0], [1], [0, 0, 1, 1], [], []>} : vector<128x128xf32>, vector<128x128xf32>, vector<128x128xf32> -> vector<128x128xf32>
    %5 = vector.broadcast %3 : vector<128x1xf32> to vector<128x128xf32>
    %6 = arith.addf %4, %5 : vector<128x128xf32>
    %c0_6 = arith.constant 0 : index
    %c0_7 = arith.constant 0 : index
    %7 = vector.load %arg3[%c0_6, %c0_7] : memref<128x2xf32, #tpu.memory_space<vmem>>, vector<128x1xf32>
    %8 = vector.broadcast %7 : vector<128x1xf32> to vector<128x128xf32>
    %9 = arith.addf %6, %8 : vector<128x128xf32>
    %c0_8 = arith.constant 0 : index
    %c0_9 = arith.constant 0 : index
    %10 = vector.load %arg2[%c0_8, %c0_9] : memref<128x128xf32, #tpu.memory_space<vmem>>, vector<128x128xf32>
    %c0_10 = arith.constant 0 : index
    %c0_11 = arith.constant 0 : index
    %c0_12 = arith.constant 0 : index
    %11 = vector.load %arg6[%c0_10, %c0_11, %c0_12] : memref<2x128x128xf32, #tpu.memory_space<vmem>>, vector<1x128x128xf32>
    %12 = vector.shape_cast %11 : vector<1x128x128xf32> to vector<128x128xf32>
    %c0_13 = arith.constant 0 : index
    %c0_14 = arith.constant 0 : index
    %13 = vector.load %arg7[%c0_13, %c0_14] : memref<128x2xf32, #tpu.memory_space<vmem>>, vector<128x1xf32>
    %c0_15 = arith.constant 0 : index
    %c0_16 = arith.constant 0 : index
    %c0_17 = arith.constant 0 : index
    %14 = vector.load %arg8[%c0_15, %c0_16, %c0_17] : memref<2x128x128xf32, #tpu.memory_space<vmem>>, vector<1x128x128xf32>
    %15 = vector.shape_cast %14 : vector<1x128x128xf32> to vector<128x128xf32>
    %c0_18 = arith.constant 0 : index
    %c0_19 = arith.constant 0 : index
    %16 = vector.load %arg9[%c0_18, %c0_19] : memref<128x2xf32, #tpu.memory_space<vmem>>, vector<128x1xf32>
    %cst_20 = arith.constant dense<0.000000e+00> : vector<128x128xf32>
    %17 = tpu.matmul %12, %10, %cst_20 {dimension_numbers = #tpu.dot_dimension_numbers<[1], [0], [0], [1], [0, 0, 1, 1], [], []>} : vector<128x128xf32>, vector<128x128xf32>, vector<128x128xf32> -> vector<128x128xf32>
    %18 = vector.broadcast %13 : vector<128x1xf32> to vector<128x128xf32>
    %19 = arith.addf %17, %18 : vector<128x128xf32>
    %cst_21 = arith.constant 5.000000e-01 : f32
    %20 = vector.broadcast %cst_21 : f32 to vector<128x128xf32>
    %21 = arith.mulf %20, %19 : vector<128x128xf32>
    %cst_22 = arith.constant 0.707106769 : f32
    %22 = vector.broadcast %cst_22 : f32 to vector<128x128xf32>
    %23 = arith.mulf %19, %22 : vector<128x128xf32>
    %24 = math.erf %23 : vector<128x128xf32>
    %cst_23 = arith.constant 1.000000e+00 : f32
    %25 = vector.broadcast %cst_23 : f32 to vector<128x128xf32>
    %26 = arith.addf %25, %24 : vector<128x128xf32>
    %27 = arith.mulf %21, %26 : vector<128x128xf32>
    %cst_24 = arith.constant dense<0.000000e+00> : vector<128x128xf32>
    %28 = tpu.matmul %15, %27, %cst_24 {dimension_numbers = #tpu.dot_dimension_numbers<[1], [0], [0], [1], [0, 0, 1, 1], [], []>} : vector<128x128xf32>, vector<128x128xf32>, vector<128x128xf32> -> vector<128x128xf32>
    %29 = vector.broadcast %16 : vector<128x1xf32> to vector<128x128xf32>
    %30 = arith.addf %28, %29 : vector<128x128xf32>
    %cst_25 = arith.constant 5.000000e-01 : f32
    %31 = vector.broadcast %cst_25 : f32 to vector<128x128xf32>
    %32 = arith.mulf %31, %30 : vector<128x128xf32>
    %cst_26 = arith.constant 0.707106769 : f32
    %33 = vector.broadcast %cst_26 : f32 to vector<128x128xf32>
    %34 = arith.mulf %30, %33 : vector<128x128xf32>
    %35 = math.erf %34 : vector<128x128xf32>
    %cst_27 = arith.constant 1.000000e+00 : f32
    %36 = vector.broadcast %cst_27 : f32 to vector<128x128xf32>
    %37 = arith.addf %36, %35 : vector<128x128xf32>
    %38 = arith.mulf %32, %37 : vector<128x128xf32>
    %39 = arith.addf %9, %38 : vector<128x128xf32>
    %cst_28 = arith.constant 5.000000e-01 : f32
    %40 = vector.broadcast %cst_28 : f32 to vector<128x128xf32>
    %41 = arith.mulf %40, %39 : vector<128x128xf32>
    %cst_29 = arith.constant 0.707106769 : f32
    %42 = vector.broadcast %cst_29 : f32 to vector<128x128xf32>
    %43 = arith.mulf %39, %42 : vector<128x128xf32>
    %44 = math.erf %43 : vector<128x128xf32>
    %cst_30 = arith.constant 1.000000e+00 : f32
    %45 = vector.broadcast %cst_30 : f32 to vector<128x128xf32>
    %46 = arith.addf %45, %44 : vector<128x128xf32>
    %47 = arith.mulf %41, %46 : vector<128x128xf32>
    %c1 = arith.constant 1 : index
    %c0_31 = arith.constant 0 : index
    %c0_32 = arith.constant 0 : index
    %48 = vector.load %arg4[%c1, %c0_31, %c0_32] : memref<3x128x128xf32, #tpu.memory_space<vmem>>, vector<1x128x128xf32>
    %49 = vector.shape_cast %48 : vector<1x128x128xf32> to vector<128x128xf32>
    %c0_33 = arith.constant 0 : index
    %c1_34 = arith.constant 1 : index
    %50 = vector.load %arg5[%c0_33, %c1_34] : memref<128x3xf32, #tpu.memory_space<vmem>>, vector<128x1xf32>
    %cst_35 = arith.constant dense<0.000000e+00> : vector<128x128xf32>
    %51 = tpu.matmul %49, %47, %cst_35 {dimension_numbers = #tpu.dot_dimension_numbers<[1], [0], [0], [1], [0, 0, 1, 1], [], []>} : vector<128x128xf32>, vector<128x128xf32>, vector<128x128xf32> -> vector<128x128xf32>
    %52 = vector.broadcast %50 : vector<128x1xf32> to vector<128x128xf32>
    %53 = arith.addf %51, %52 : vector<128x128xf32>
    %c0_36 = arith.constant 0 : index
    %c1_37 = arith.constant 1 : index
    %54 = vector.load %arg3[%c0_36, %c1_37] : memref<128x2xf32, #tpu.memory_space<vmem>>, vector<128x1xf32>
    %55 = vector.broadcast %54 : vector<128x1xf32> to vector<128x128xf32>
    %56 = arith.addf %53, %55 : vector<128x128xf32>
    %c0_38 = arith.constant 0 : index
    %c0_39 = arith.constant 0 : index
    %57 = vector.load %arg2[%c0_38, %c0_39] : memref<128x128xf32, #tpu.memory_space<vmem>>, vector<128x128xf32>
    %c1_40 = arith.constant 1 : index
    %c0_41 = arith.constant 0 : index
    %c0_42 = arith.constant 0 : index
    %58 = vector.load %arg6[%c1_40, %c0_41, %c0_42] : memref<2x128x128xf32, #tpu.memory_space<vmem>>, vector<1x128x128xf32>
    %59 = vector.shape_cast %58 : vector<1x128x128xf32> to vector<128x128xf32>
    %c0_43 = arith.constant 0 : index
    %c1_44 = arith.constant 1 : index
    %60 = vector.load %arg7[%c0_43, %c1_44] : memref<128x2xf32, #tpu.memory_space<vmem>>, vector<128x1xf32>
    %c1_45 = arith.constant 1 : index
    %c0_46 = arith.constant 0 : index
    %c0_47 = arith.constant 0 : index
    %61 = vector.load %arg8[%c1_45, %c0_46, %c0_47] : memref<2x128x128xf32, #tpu.memory_space<vmem>>, vector<1x128x128xf32>
    %62 = vector.shape_cast %61 : vector<1x128x128xf32> to vector<128x128xf32>
    %c0_48 = arith.constant 0 : index
    %c1_49 = arith.constant 1 : index
    %63 = vector.load %arg9[%c0_48, %c1_49] : memref<128x2xf32, #tpu.memory_space<vmem>>, vector<128x1xf32>
    %cst_50 = arith.constant dense<0.000000e+00> : vector<128x128xf32>
    %64 = tpu.matmul %59, %57, %cst_50 {dimension_numbers = #tpu.dot_dimension_numbers<[1], [0], [0], [1], [0, 0, 1, 1], [], []>} : vector<128x128xf32>, vector<128x128xf32>, vector<128x128xf32> -> vector<128x128xf32>
    %65 = vector.broadcast %60 : vector<128x1xf32> to vector<128x128xf32>
    %66 = arith.addf %64, %65 : vector<128x128xf32>
    %cst_51 = arith.constant 5.000000e-01 : f32
    %67 = vector.broadcast %cst_51 : f32 to vector<128x128xf32>
    %68 = arith.mulf %67, %66 : vector<128x128xf32>
    %cst_52 = arith.constant 0.707106769 : f32
    %69 = vector.broadcast %cst_52 : f32 to vector<128x128xf32>
    %70 = arith.mulf %66, %69 : vector<128x128xf32>
    %71 = math.erf %70 : vector<128x128xf32>
    %cst_53 = arith.constant 1.000000e+00 : f32
    %72 = vector.broadcast %cst_53 : f32 to vector<128x128xf32>
    %73 = arith.addf %72, %71 : vector<128x128xf32>
    %74 = arith.mulf %68, %73 : vector<128x128xf32>
    %cst_54 = arith.constant dense<0.000000e+00> : vector<128x128xf32>
    %75 = tpu.matmul %62, %74, %cst_54 {dimension_numbers = #tpu.dot_dimension_numbers<[1], [0], [0], [1], [0, 0, 1, 1], [], []>} : vector<128x128xf32>, vector<128x128xf32>, vector<128x128xf32> -> vector<128x128xf32>
    %76 = vector.broadcast %63 : vector<128x1xf32> to vector<128x128xf32>
    %77 = arith.addf %75, %76 : vector<128x128xf32>
    %cst_55 = arith.constant 5.000000e-01 : f32
    %78 = vector.broadcast %cst_55 : f32 to vector<128x128xf32>
    %79 = arith.mulf %78, %77 : vector<128x128xf32>
    %cst_56 = arith.constant 0.707106769 : f32
    %80 = vector.broadcast %cst_56 : f32 to vector<128x128xf32>
    %81 = arith.mulf %77, %80 : vector<128x128xf32>
    %82 = math.erf %81 : vector<128x128xf32>
    %cst_57 = arith.constant 1.000000e+00 : f32
    %83 = vector.broadcast %cst_57 : f32 to vector<128x128xf32>
    %84 = arith.addf %83, %82 : vector<128x128xf32>
    %85 = arith.mulf %79, %84 : vector<128x128xf32>
    %86 = arith.addf %56, %85 : vector<128x128xf32>
    %cst_58 = arith.constant 5.000000e-01 : f32
    %87 = vector.broadcast %cst_58 : f32 to vector<128x128xf32>
    %88 = arith.mulf %87, %86 : vector<128x128xf32>
    %cst_59 = arith.constant 0.707106769 : f32
    %89 = vector.broadcast %cst_59 : f32 to vector<128x128xf32>
    %90 = arith.mulf %86, %89 : vector<128x128xf32>
    %91 = math.erf %90 : vector<128x128xf32>
    %cst_60 = arith.constant 1.000000e+00 : f32
    %92 = vector.broadcast %cst_60 : f32 to vector<128x128xf32>
    %93 = arith.addf %92, %91 : vector<128x128xf32>
    %94 = arith.mulf %88, %93 : vector<128x128xf32>
    %c2 = arith.constant 2 : index
    %c0_61 = arith.constant 0 : index
    %c0_62 = arith.constant 0 : index
    %95 = vector.load %arg4[%c2, %c0_61, %c0_62] : memref<3x128x128xf32, #tpu.memory_space<vmem>>, vector<1x128x128xf32>
    %96 = vector.shape_cast %95 : vector<1x128x128xf32> to vector<128x128xf32>
    %c0_63 = arith.constant 0 : index
    %c2_64 = arith.constant 2 : index
    %97 = vector.load %arg5[%c0_63, %c2_64] : memref<128x3xf32, #tpu.memory_space<vmem>>, vector<128x1xf32>
    %cst_65 = arith.constant dense<0.000000e+00> : vector<128x128xf32>
    %98 = tpu.matmul %96, %94, %cst_65 {dimension_numbers = #tpu.dot_dimension_numbers<[1], [0], [0], [1], [0, 0, 1, 1], [], []>} : vector<128x128xf32>, vector<128x128xf32>, vector<128x128xf32> -> vector<128x128xf32>
    %99 = vector.broadcast %97 : vector<128x1xf32> to vector<128x128xf32>
    %100 = arith.addf %98, %99 : vector<128x128xf32>
    %101 = vector.extract_strided_slice %100 {offsets = [0, 0], sizes = [8, 128], strides = [1, 1]} : vector<128x128xf32> to vector<8x128xf32>
    %c0_66 = arith.constant 0 : index
    %c0_67 = arith.constant 0 : index
    %102 = vector.load %arg10[%c0_66, %c0_67] : memref<8x128xf32, #tpu.memory_space<vmem>>, vector<8x128xf32>
    tpu.vector_store %arg10[%c0_66, %c0_67], %101 {strides = array<i32>} : memref<8x128xf32, #tpu.memory_space<vmem>>, vector<8x128xf32>,
    return
  }
  func.func @transform_0(%arg0: i32) -> (i32, i32) {
    %c0_i32 = arith.constant 0 : i32
    %c0_i32_0 = arith.constant 0 : i32
    return %c0_i32, %arg0 : i32, i32
  }
  func.func @transform_1(%arg0: i32) -> (i32, i32) {
    %c0_i32 = arith.constant 0 : i32
    %c0_i32_0 = arith.constant 0 : i32
    return %c0_i32, %arg0 : i32, i32
  }
  func.func @transform_2(%arg0: i32) -> (i32, i32) {
    %c0_i32 = arith.constant 0 : i32
    %c0_i32_0 = arith.constant 0 : i32
    %c0_i32_1 = arith.constant 0 : i32
    return %c0_i32, %c0_i32_0 : i32, i32
  }
  func.func @transform_3(%arg0: i32) -> (i32, i32, i32) {
    %c0_i32 = arith.constant 0 : i32
    %c0_i32_0 = arith.constant 0 : i32
    %c0_i32_1 = arith.constant 0 : i32
    %c0_i32_2 = arith.constant 0 : i32
    return %c0_i32, %c0_i32_0, %c0_i32_1 : i32, i32, i32
  }
  func.func @transform_4(%arg0: i32) -> (i32, i32) {
    %c0_i32 = arith.constant 0 : i32
    %c0_i32_0 = arith.constant 0 : i32
    %c0_i32_1 = arith.constant 0 : i32
    return %c0_i32, %c0_i32_0 : i32, i32
  }
  func.func @transform_5(%arg0: i32) -> (i32, i32, i32) {
    %c0_i32 = arith.constant 0 : i32
    %c0_i32_0 = arith.constant 0 : i32
    %c0_i32_1 = arith.constant 0 : i32
    %c0_i32_2 = arith.constant 0 : i32
    return %c0_i32, %c0_i32_0, %c0_i32_1 : i32, i32, i32
  }
  func.func @transform_6(%arg0: i32) -> (i32, i32) {
    %c0_i32 = arith.constant 0 : i32
    %c0_i32_0 = arith.constant 0 : i32
    %c0_i32_1 = arith.constant 0 : i32
    return %c0_i32, %c0_i32_0 : i32, i32
  }
  func.func @transform_7(%arg0: i32) -> (i32, i32, i32) {
    %c0_i32 = arith.constant 0 : i32
    %c0_i32_0 = arith.constant 0 : i32
    %c0_i32_1 = arith.constant 0 : i32
    %c0_i32_2 = arith.constant 0 : i32
    return %c0_i32, %c0_i32_0, %c0_i32_1 : i32, i32, i32
  }
  func.func @transform_8(%arg0: i32) -> (i32, i32) {
    %c0_i32 = arith.constant 0 : i32
    %c0_i32_0 = arith.constant 0 : i32
    %c0_i32_1 = arith.constant 0 : i32
    return %c0_i32, %c0_i32_0 : i32, i32
  }
  func.func @transform_9(%arg0: i32) -> (i32, i32) {
    %c0_i32 = arith.constant 0 : i32
    %c0_i32_0 = arith.constant 0 : i32
    return %c0_i32, %arg0 : i32, i32
  }
}

</mosaic_0001>

<bundles_post_ra>
// kernel: tpu_custom_call.1
= control target key start
LH: loop header
LB: loop body
LE: loop exit
PB: predicated region body
PF: predicated region fallthrough
CT: control target
= control target key end

     0   :  { %14 = vsyncpa [#allocation3], 0  ;;  %s5063_s0 = inlined_call_operand.vmem [shape: f32[128,128], index: 0, kind: input, shape index: {}]   ;;  %s5064_s1 = inlined_call_operand.hbm [shape: f32[128,128], index: 1, kind: input, shape index: {}]   ;;  %s5065_s2 = inlined_call_operand.vmem [shape: f32[128,2], index: 2, kind: input, shape index: {}]   ;;  %s5066_s3 = inlined_call_operand.vmem [shape: f32[3,128,128], index: 3, kind: input, shape index: {}]   ;;  %s5067_s4 = inlined_call_operand.vmem [shape: f32[128,3], index: 4, kind: input, shape index: {}]   ;;  %s5068_s5 = inlined_call_operand.hbm [shape: f32[2,128,128], index: 5, kind: input, shape index: {}]   ;;  %s5069_s6 = inlined_call_operand.vmem [shape: f32[128,2], index: 6, kind: input, shape index: {}]   ;;  %s5070_s7 = inlined_call_operand.hbm [shape: f32[2,128,128], index: 7, kind: input, shape index: {}]   ;;  %s5071_s8 = inlined_call_operand.vmem [shape: f32[128,2], index: 8, kind: input, shape index: {}]   ;;  %s5072_s9 = inlined_call_operand.hbm [shape: f32[8,128], index: 9, kind: output, shape index: {}]  }
   0x1   :  { %15 = vsyncpa [#allocation6], 0 }
   0x2   :  { %16 = vsyncpa [#allocation4], 0  ;;  %s3662_s30 = smov [#allocation5]   ;;  %s3663_s11 = smov [#allocation2]  }
   0x3   :  { %s42_s10 = sshll.u32 %s3662_s30, 4  ;;  %s24_s12 = sshll.u32 %s3663_s11, 4  ;;  %s43_s10 = int_to_ptr.vmem [resolvable:$true] %s42_s10  ;;  %s3721_s12 = int_to_ptr.vmem [resolvable:$true] %s24_s12 }
   0x4   :  { %s3568_s15 = scalar_lea.hbm %s5068_s5, 4096 }
   0x5   :  { %p3569_p0 = scmp.ne.s32.totalorder %s5068_s5, %s3568_s15  ;;  %p3572_p1 = scmp.lt.u32.totalorder %s3568_s15, %s5068_s5 }
   0x7   :  { %p3574_p2 = pnand %p3572_p1, %p3569_p0 }
   0x9   :  { %3577 = shalt.err (!%p3574_p2)
}
   0xa   :  { %s3578_s20 = scalar_lea.vmem %s43_s10, 4096  ;;  %p3583_p4 = scmp.lt.s32.totalorder %s43_s10, %s43_s10 }
   0xb   :  { %p3579_p3 = scmp.ne.s32.totalorder %s43_s10, %s3578_s20  ;;  %p3584_p5 = scmp.lt.s32.totalorder %s3578_s20, %s3578_s20 }
   0xd   :  { %p3585_p6 = por %p3584_p5, %p3583_p4 }
   0xf   :  { %p3586_p7 = pnand %p3585_p6, %p3579_p3 }
  0x11   :  { %3589 = shalt.err (!%p3586_p7)
}
  0x12   :  { %s3664_s21 = smov 128   ;;  %s3665_s22 = smov 8  }
  0x13   :  { %48 = dma.hbm_to_vmem [thread:$0]  %s5068_s5, 4096, %s43_s10, [#allocation6], %s3664_s21, %s3664_s21, %s3665_s22  }
  0x14   :  { %s3590_s27 = scalar_lea.hbm %s5064_s1, 2048 }
  0x15   :  { %p3591_p8 = scmp.ne.s32.totalorder %s5064_s1, %s3590_s27  ;;  %p3594_p9 = scmp.lt.u32.totalorder %s3590_s27, %s5064_s1 }
  0x17   :  { %p3596_p10 = pnand %p3594_p9, %p3591_p8 }
  0x19   :  { %3599 = shalt.err (!%p3596_p10)
}
  0x1a   :  { %s3600_s13 = scalar_lea.vmem %s3721_s12, 2048  ;;  %p3605_p12 = scmp.lt.s32.totalorder %s3721_s12, %s3721_s12 }
  0x1b   :  { %p3601_p11 = scmp.ne.s32.totalorder %s3721_s12, %s3600_s13  ;;  %p3606_p13 = scmp.lt.s32.totalorder %s3600_s13, %s3600_s13 }
  0x1d   :  { %p3607_p0 = por %p3606_p13, %p3605_p12 }
  0x1f   :  { %p3608_p1 = pnand %p3607_p0, %p3601_p11 }
  0x21   :  { %3611 = shalt.err (!%p3608_p1)
}
  0x22   :  { %30 = dma.hbm_to_vmem [thread:$0]  %s5064_s1, 2048, %s3721_s12, [#allocation3], %s3664_s21, %s3664_s21, %s3665_s22  }
  0x23   :  { %s3666_s14 = smov [#allocation7]   ;;  %s3612_s18 = scalar_lea.hbm %s5070_s7, 4096 }
  0x24   :  { %s56_s15 = sshll.u32 %s3666_s14, 4  ;;  %p3613_p2 = scmp.ne.s32.totalorder %s5070_s7, %s3612_s18  ;;  %s57_s15 = int_to_ptr.vmem [resolvable:$true] %s56_s15 }
  0x25   :  { %p3616_p3 = scmp.lt.u32.totalorder %s3612_s18, %s5070_s7 }
  0x27   :  { %p3618_p4 = pnand %p3616_p3, %p3613_p2 }
  0x29   :  { %3621 = shalt.err (!%p3618_p4)
}
  0x2a   :  { %s3622_s25 = scalar_lea.vmem %s57_s15, 4096  ;;  %p3627_p6 = scmp.lt.s32.totalorder %s57_s15, %s57_s15 }
  0x2b   :  { %p3623_p5 = scmp.ne.s32.totalorder %s57_s15, %s3622_s25  ;;  %p3628_p7 = scmp.lt.s32.totalorder %s3622_s25, %s3622_s25 }
  0x2d   :  { %p3629_p8 = por %p3628_p7, %p3627_p6 }
  0x2f   :  { %p3630_p9 = pnand %p3629_p8, %p3623_p5 }
  0x31   :  { %3633 = shalt.err (!%p3630_p9)
}
  0x32   :  { %62 = dma.hbm_to_vmem [thread:$0]  %s5070_s7, 4096, %s57_s15, [#allocation6], %s3664_s21, %s3664_s21, %s3665_s22  }
  0x33   :  { %3656 = dma.done.wait [#allocation3], 2048  }
  0x34   :  { %3657 = vsyncadd [#allocation3], 4294965248 }
  0x35   :  { %3658 = dma.done.wait [#allocation6], 8192  }
  0x36   :  { %3659 = vsyncadd [#allocation6], 4294959104  ;;  %v3667_v0 = vmov 0   ;;  %v3776_v1 = vld [vmem:[%s5069_s6 + $0x10] sm:$0xff]  ;;  %v3781_v2 = vld [vmem:[%s5069_s6] sm:$0xff] }
  0x37   :  { %3370 = vset.pattern.permute.xlu1 %v3667_v0  ;;  %3369 = vset.pattern.permute.xlu0 %v3667_v0  ;;  %v74_v3 = vld [vmem:[%s5063_s0] sm:$0xff]  ;;  %v75_v4 = vld [vmem:[%s5063_s0 + $0x8] sm:$0xff]  ;;  %v3796_v9 = vld [vmem:[%s5069_s6 + $0x18] sm:$0xff] }
  0x38   :  { %551 = vperm.xlu1 %3370, %v3776_v1   ;;  %541 = vperm.xlu0 %3369, %v3781_v2   ;;  %v459_v5 = vld [vmem:[#allocation2] sm:$0xff]  ;;  %v460_v6 = vld [vmem:[#allocation2 + $0x8] sm:$0xff]  ;;  %v3120_v7 = vpack.c.bf16 %v75_v4, %v74_v3  ;;  %v76_v11 = vld [vmem:[%s5063_s0 + $0x10] sm:$0xff] }
  0x39   :  { %v3791_v8 = vpack.c.bf16 %v460_v6, %v459_v5  ;;  %v3801_v10 = vld [vmem:[%s5069_s6 + $0x8] sm:$0xff]  ;;  %v77_v12 = vld [vmem:[%s5063_s0 + $0x18] sm:$0xff]  ;;  %v461_v13 = vld [vmem:[#allocation2 + $0x10] sm:$0xff] }
  0x3a   :  { %v462_v14 = vld [vmem:[#allocation2 + $0x18] sm:$0xff]  ;;  %3121 = vmatprep.subr.bf16.mxu0 %v3120_v7  ;;  %v3124_v15 = vpack.c.bf16 %v77_v12, %v76_v11  ;;  %v78_v17 = vld [vmem:[%s5063_s0 + $0x20] sm:$0xff]  ;;  %v79_v18 = vld [vmem:[%s5063_s0 + $0x28] sm:$0xff] }
  0x3b   :  { %5091 = vst [vmem:[#allocation12_spill] sm:$0xff] %v3791_v8  ;;  %3153 = vmatprep.subr.bf16.mxu1 %v3791_v8  ;;  %v3810_v16 = vpack.c.bf16 %v462_v14, %v461_v13  ;;  %3123 = vmatpush3.bf16.msra.mxu0 %v3120_v7  ;;  %v463_v19 = vld [vmem:[#allocation2 + $0x20] sm:$0xff]  ;;  %v464_v20 = vld [vmem:[#allocation2 + $0x28] sm:$0xff]  ;;  %v3128_v23 = vpack.c.bf16 %v79_v18, %v78_v17  ;;  %v80_v25 = vld [vmem:[%s5063_s0 + $0x30] sm:$0xff] }
  0x3c   :  { %3155 = vmatpush3.bf16.msra.mxu1 %v3791_v8  ;;  %556 = vperm.xlu1 %3370, %v3796_v9   ;;  %v3825_v21 = vld [vmem:[%s5069_s6 + $0x28] sm:$0xff]  ;;  %v3830_v22 = vld [vmem:[%s5069_s6 + $0x20] sm:$0xff]  ;;  %v3832_v24 = vpack.c.bf16 %v464_v20, %v463_v19  ;;  %v81_v26 = vld [vmem:[%s5063_s0 + $0x38] sm:$0xff]  ;;  %v3668_v8 = vmov 1  }
  0x3d   :  { %5092 = vst [vmem:[#allocation13_spill] sm:$0xff] %v3810_v16  ;;  %546 = vperm.xlu0 %3369, %v3801_v10   ;;  %3125 = vmatprep.subr.bf16.mxu0 %v3124_v15  ;;  %v465_v27 = vld [vmem:[#allocation2 + $0x30] sm:$0xff]  ;;  %v466_v28 = vld [vmem:[#allocation2 + $0x38] sm:$0xff]  ;;  %v3132_v31 = vpack.c.bf16 %v81_v26, %v80_v25  ;;  %v82_v33 = vld [vmem:[%s5063_s0 + $0x40] sm:$0xff] }
  0x3e   :  { %3157 = vmatprep.subr.bf16.mxu1 %v3810_v16  ;;  %5093 = vst [vmem:[#allocation14_spill] sm:$0xff] %v3832_v24  ;;  %v3847_v29 = vld [vmem:[%s5069_s6 + $0x38] sm:$0xff]  ;;  %v3852_v30 = vld [vmem:[%s5069_s6 + $0x30] sm:$0xff]  ;;  %v3854_v32 = vpack.c.bf16 %v466_v28, %v465_v27  ;;  %v83_v34 = vld [vmem:[%s5063_s0 + $0x48] sm:$0xff] }
  0x3f   :  { %3127 = vmatpush3.bf16.msra.mxu0 %v3124_v15  ;;  %v467_v35 = vld [vmem:[#allocation2 + $0x40] sm:$0xff]  ;;  %v468_v36 = vld [vmem:[#allocation2 + $0x48] sm:$0xff]  ;;  %v3136_v39 = vpack.c.bf16 %v83_v34, %v82_v33  ;;  %v84_v41 = vld [vmem:[%s5063_s0 + $0x50] sm:$0xff] }
  0x40   :  { %3159 = vmatpush3.bf16.msra.mxu1 %v3810_v16  ;;  %566 = vperm.xlu1 %3370, %v3825_v21   ;;  %5094 = vst [vmem:[#allocation15_spill] sm:$0xff] %v3854_v32  ;;  %v3869_v37 = vld [vmem:[%s5069_s6 + $0x48] sm:$0xff]  ;;  %v3874_v38 = vld [vmem:[%s5069_s6 + $0x40] sm:$0xff]  ;;  %v3876_v40 = vpack.c.bf16 %v468_v36, %v467_v35  ;;  %v85_v42 = vld [vmem:[%s5063_s0 + $0x58] sm:$0xff] }
  0x41   :  { %561 = vperm.xlu0 %3369, %v3830_v22   ;;  %3129 = vmatprep.subr.bf16.mxu0 %v3128_v23  ;;  %v469_v43 = vld [vmem:[#allocation2 + $0x50] sm:$0xff]  ;;  %v470_v44 = vld [vmem:[#allocation2 + $0x58] sm:$0xff]  ;;  %v90_v45 = vld [vmem:[%s5066_s3] sm:$0xff]  ;;  %v3140_v49 = vpack.c.bf16 %v85_v42, %v84_v41 }
  0x42   :  { %3161 = vmatprep.subr.bf16.mxu1 %v3832_v24  ;;  %5095 = vst [vmem:[#allocation16_spill] sm:$0xff] %v3876_v40  ;;  %v475_v46 = vld [vmem:[#allocation5] sm:$0xff]  ;;  %v3894_v47 = vld [vmem:[%s5069_s6 + $0x58] sm:$0xff]  ;;  %v3899_v48 = vld [vmem:[%s5069_s6 + $0x50] sm:$0xff]  ;;  %v3901_v50 = vpack.c.bf16 %v470_v44, %v469_v43  ;;  %2760 = vmatprep.mubr.f32.mxu0 %v90_v45 }
  0x43   :  { %3131 = vmatpush3.bf16.msra.mxu0 %v3128_v23  ;;  %v86_v51 = vld [vmem:[%s5063_s0 + $0x60] sm:$0xff]  ;;  %v87_v52 = vld [vmem:[%s5063_s0 + $0x68] sm:$0xff]  ;;  %2816 = vmatprep.mubr.f32.mxu1 %v475_v46  ;;  %v88_v59 = vld [vmem:[%s5063_s0 + $0x70] sm:$0xff] }
  0x44   :  { %3163 = vmatpush3.bf16.msra.mxu1 %v3832_v24  ;;  %576 = vperm.xlu1 %3370, %v3847_v29   ;;  %5096 = vst [vmem:[#allocation17_spill] sm:$0xff] %v3901_v50  ;;  %v471_v53 = vld [vmem:[#allocation2 + $0x60] sm:$0xff]  ;;  %v472_v54 = vld [vmem:[#allocation2 + $0x68] sm:$0xff]  ;;  %v3144_v57 = vpack.c.bf16 %v87_v52, %v86_v51  ;;  %v89_v60 = vld [vmem:[%s5063_s0 + $0x78] sm:$0xff] }
  0x45   :  { %571 = vperm.xlu0 %3369, %v3852_v30   ;;  %3133 = vmatprep.subr.bf16.mxu0 %v3132_v31  ;;  %v3916_v55 = vld [vmem:[%s5069_s6 + $0x68] sm:$0xff]  ;;  %v3921_v56 = vld [vmem:[%s5069_s6 + $0x60] sm:$0xff]  ;;  %v3923_v58 = vpack.c.bf16 %v472_v54, %v471_v53  ;;  %v473_v61 = vld [vmem:[#allocation2 + $0x70] sm:$0xff]  ;;  %v3148_v3 = vpack.c.bf16 %v89_v60, %v88_v59 }
  0x46   :  { %3165 = vmatprep.subr.bf16.mxu1 %v3854_v32  ;;  %v474_v62 = vld [vmem:[#allocation2 + $0x78] sm:$0xff]  ;;  %v3943_v0 = vld [vmem:[%s5069_s6 + $0x70] sm:$0xff]  ;;  %v3954_v5 = vld [vmem:[%s5071_s8 + $0x8] sm:$0xff] }
  0x47   :  { %3135 = vmatpush3.bf16.msra.mxu0 %v3132_v31  ;;  %5097 = vst [vmem:[#allocation18_spill] sm:$0xff] %v3923_v58  ;;  %v3938_v63 = vld [vmem:[%s5069_s6 + $0x78] sm:$0xff]  ;;  %v3945_v4 = vpack.c.bf16 %v474_v62, %v473_v61  ;;  %v3959_v6 = vld [vmem:[%s5071_s8] sm:$0xff]  ;;  %v91_v7 = vld [vmem:[%s5066_s3 + $0x8] sm:$0xff]  ;;  %s3670_s6 = smov [#allocation8]  }
  0x48   :  { %3167 = vmatpush3.bf16.msra.mxu1 %v3854_v32  ;;  %586 = vperm.xlu1 %3370, %v3869_v37   ;;  %v476_v11 = vld [vmem:[#allocation5 + $0x8] sm:$0xff]  ;;  %v92_v12 = vld [vmem:[%s5066_s3 + $0x10] sm:$0xff]  ;;  %v3973_v14 = vld [vmem:[%s5071_s8 + $0x18] sm:$0xff] }
  0x49   :  { %581 = vperm.xlu0 %3369, %v3874_v38   ;;  %3137 = vmatprep.subr.bf16.mxu0 %v3136_v39  ;;  %5098 = vst [vmem:[#allocation19_spill] sm:$0xff] %v3945_v4  ;;  %v477_v13 = vld [vmem:[#allocation5 + $0x10] sm:$0xff]  ;;  %v93_v17 = vld [vmem:[%s5066_s3 + $0x18] sm:$0xff]  ;;  %v94_v19 = vld [vmem:[%s5066_s3 + $0x20] sm:$0xff] }
  0x4a   :  { %3169 = vmatprep.subr.bf16.mxu1 %v3876_v40  ;;  %v3978_v15 = vld [vmem:[%s5071_s8 + $0x10] sm:$0xff]  ;;  %v478_v18 = vld [vmem:[#allocation5 + $0x18] sm:$0xff]  ;;  %v479_v20 = vld [vmem:[#allocation5 + $0x20] sm:$0xff] }
  0x4b   :  { %3139 = vmatpush3.bf16.msra.mxu0 %v3136_v39  ;;  %v3991_v23 = vld [vmem:[%s5071_s8 + $0x28] sm:$0xff]  ;;  %v3996_v25 = vld [vmem:[%s5071_s8 + $0x20] sm:$0xff]  ;;  %v96_v28 = vld [vmem:[%s5066_s3 + $0x30] sm:$0xff] }
  0x4c   :  { %3171 = vmatpush3.bf16.msra.mxu1 %v3876_v40  ;;  %596 = vperm.xlu1 %3370, %v3894_v47   ;;  %v95_v26 = vld [vmem:[%s5066_s3 + $0x28] sm:$0xff]  ;;  %v481_v31 = vld [vmem:[#allocation5 + $0x30] sm:$0xff]  ;;  %v4009_v33 = vld [vmem:[%s5071_s8 + $0x38] sm:$0xff] }
  0x4d   :  { %591 = vperm.xlu0 %3369, %v3899_v48   ;;  %3141 = vmatprep.subr.bf16.mxu0 %v3140_v49  ;;  %v480_v27 = vld [vmem:[#allocation5 + $0x28] sm:$0xff]  ;;  %v4014_v34 = vld [vmem:[%s5071_s8 + $0x30] sm:$0xff]  ;;  %v97_v35 = vld [vmem:[%s5066_s3 + $0x38] sm:$0xff] }
  0x4e   :  { %3173 = vmatprep.subr.bf16.mxu1 %v3901_v50  ;;  %v482_v36 = vld [vmem:[#allocation5 + $0x38] sm:$0xff]  ;;  %v98_v39 = vld [vmem:[%s5066_s3 + $0x40] sm:$0xff]  ;;  %v4027_v42 = vld [vmem:[%s5067_s4 + $0x8] sm:$0xff] }
  0x4f   :  { %3143 = vmatpush3.bf16.msra.mxu0 %v3140_v49  ;;  %v483_v41 = vld [vmem:[#allocation5 + $0x40] sm:$0xff]  ;;  %v99_v44 = vld [vmem:[%s5066_s3 + $0x48] sm:$0xff]  ;;  %v100_v46 = vld [vmem:[%s5066_s3 + $0x50] sm:$0xff] }
  0x50   :  { %3175 = vmatpush3.bf16.msra.mxu1 %v3901_v50  ;;  %606 = vperm.xlu1 %3370, %v3916_v55   ;;  %v4032_v43 = vld [vmem:[%s5067_s4] sm:$0xff]  ;;  %v484_v45 = vld [vmem:[#allocation5 + $0x48] sm:$0xff]  ;;  %v485_v49 = vld [vmem:[#allocation5 + $0x50] sm:$0xff] }
  0x51   :  { %601 = vperm.xlu0 %3369, %v3921_v56   ;;  %3145 = vmatprep.subr.bf16.mxu0 %v3144_v57  ;;  %v4045_v51 = vld [vmem:[%s5071_s8 + $0x48] sm:$0xff]  ;;  %v4050_v52 = vld [vmem:[%s5071_s8 + $0x40] sm:$0xff]  ;;  %v101_v53 = vld [vmem:[%s5066_s3 + $0x58] sm:$0xff] }
  0x52   :  { %3177 = vmatprep.subr.bf16.mxu1 %v3923_v58  ;;  %v486_v54 = vld [vmem:[#allocation5 + $0x58] sm:$0xff]  ;;  %v487_v59 = vld [vmem:[#allocation5 + $0x60] sm:$0xff]  ;;  %v4063_v60 = vld [vmem:[%s5065_s2 + $0x8] sm:$0xff] }
  0x53   :  { %3147 = vmatpush3.bf16.msra.mxu0 %v3144_v57  ;;  %v102_v57 = vld [vmem:[%s5066_s3 + $0x60] sm:$0xff]  ;;  %v103_v62 = vld [vmem:[%s5066_s3 + $0x68] sm:$0xff]  ;;  %v4264_v32 = vld [vmem:[%s5067_s4 + $0x78] sm:$0xff] }
  0x54   :  { %3179 = vmatpush3.bf16.msra.mxu1 %v3923_v58  ;;  %616 = vperm.xlu1 %3370, %v3938_v63   ;;  %v4068_v61 = vld [vmem:[%s5065_s2] sm:$0xff]  ;;  %v4252_v50 = vld [vmem:[%s5065_s2 + $0x68] sm:$0xff]  ;;  %v4269_v24 = vld [vmem:[%s5067_s4 + $0x70] sm:$0xff] }
  0x55   :  { %611 = vperm.xlu0 %3369, %v3943_v0   ;;  %3149 = vmatprep.subr.bf16.mxu0 %v3148_v3  ;;  %v4245_v58 = vld [vmem:[%s5067_s4 + $0x60] sm:$0xff]  ;;  %5099 = vst [vmem:[#allocation20_spill] sm:$0xff] %v4252_v50  ;;  %v4276_v16 = vld [vmem:[%s5065_s2 + $0x78] sm:$0xff] }
  0x56   :  { %3181 = vmatprep.subr.bf16.mxu1 %v3945_v4  ;;  %v4257_v40 = vld [vmem:[%s5065_s2 + $0x60] sm:$0xff] }
  0x57   :  { %3151 = vmatpush3.bf16.msra.mxu0 %v3148_v3  ;;  %v488_v3 = vld [vmem:[#allocation5 + $0x68] sm:$0xff]  ;;  %5100 = vst [vmem:[#allocation21_spill] sm:$0xff] %v4257_v40 }
  0x58   :  { %3183 = vmatpush3.bf16.msra.mxu1 %v3945_v4  ;;  %851 = vperm.xlu1 %3370, %v3954_v5   ;;  %v4240_v4 = vld [vmem:[%s5067_s4 + $0x68] sm:$0xff] }
  0x59   :  { %846 = vperm.xlu0 %3369, %v3959_v6  }
  0x5a   :  { %2761 = vmatmul.mubr.f32.vlgmr.msra.gmra.mrb[0].mxu0 %v91_v7  ;;  %v104_v7 = vld [vmem:[%s5066_s3 + $0x70] sm:$0xff] }
  0x5b   :  { %2817 = vmatmul.mubr.f32.vlgmr.msra.gmra.mrb[0].mxu1 %v476_v11  ;;  %2763 = vmatprep.mubr.f32.mxu0 %v92_v12  ;;  %v489_v11 = vld [vmem:[#allocation5 + $0x70] sm:$0xff]  ;;  %v4081_v12 = vld [vmem:[%s5067_s4 + $0x18] sm:$0xff] }
  0x5c   :  { %2819 = vmatprep.mubr.f32.mxu1 %v477_v13  ;;  %861 = vperm.xlu1 %3370, %v3973_v14   ;;  %v4086_v13 = vld [vmem:[%s5067_s4 + $0x10] sm:$0xff] }
  0x5d   :  { %856 = vperm.xlu0 %3369, %v3978_v15  }
  0x5e   :  { %2764 = vmatmul.mubr.f32.gmra.mrb[2].mxu0 %v93_v17  ;;  %v105_v17 = vld [vmem:[%s5066_s3 + $0x78] sm:$0xff] }
  0x5f   :  { %2820 = vmatmul.mubr.f32.gmra.mrb[2].mxu1 %v478_v18  ;;  %2766 = vmatprep.mubr.f32.mxu0 %v94_v19  ;;  %v490_v18 = vld [vmem:[#allocation5 + $0x78] sm:$0xff] }
  0x60   :  { %2822 = vmatprep.mubr.f32.mxu1 %v479_v20  ;;  %871 = vperm.xlu1 %3370, %v3991_v23   ;;  %v4096_v19 = vld [vmem:[%s5071_s8 + $0x58] sm:$0xff]  ;;  %v4101_v20 = vld [vmem:[%s5071_s8 + $0x50] sm:$0xff] }
  0x61   :  { %866 = vperm.xlu0 %3369, %v3996_v25  }
  0x62   :  { %2767 = vmatmul.mubr.f32.gmra.mrb[4].mxu0 %v95_v26  ;;  %v4108_v26 = vld [vmem:[%s5065_s2 + $0x18] sm:$0xff] }
  0x63   :  { %2823 = vmatmul.mubr.f32.gmra.mrb[4].mxu1 %v480_v27  ;;  %2769 = vmatprep.mubr.f32.mxu0 %v96_v28  ;;  %v4113_v27 = vld [vmem:[%s5065_s2 + $0x10] sm:$0xff]  ;;  %v4120_v28 = vld [vmem:[%s5067_s4 + $0x28] sm:$0xff] }
  0x64   :  { %2825 = vmatprep.mubr.f32.mxu1 %v481_v31  ;;  %881 = vperm.xlu1 %3370, %v4009_v33   ;;  %v4125_v31 = vld [vmem:[%s5067_s4 + $0x20] sm:$0xff] }
  0x65   :  { %876 = vperm.xlu0 %3369, %v4014_v34  }
  0x66   :  { %2770 = vmatmul.mubr.f32.gmra.mrb[6].mxu0 %v97_v35  ;;  %v4132_v35 = vld [vmem:[%s5071_s8 + $0x68] sm:$0xff] }
  0x67   :  { %2826 = vmatmul.mubr.f32.gmra.mrb[6].mxu1 %v482_v36  ;;  %2772 = vmatprep.mubr.f32.mxu0 %v98_v39  ;;  %v4137_v36 = vld [vmem:[%s5071_s8 + $0x60] sm:$0xff]  ;;  %v4144_v39 = vld [vmem:[%s5065_s2 + $0x28] sm:$0xff] }
  0x68   :  { %2828 = vmatprep.mubr.f32.mxu1 %v483_v41  ;;  %129 = vperm.xlu1 %3370, %v4027_v42   ;;  %v4149_v41 = vld [vmem:[%s5065_s2 + $0x20] sm:$0xff] }
  0x69   :  { %124 = vperm.xlu0 %3369, %v4032_v43  }
  0x6a   :  { %2773 = vmatmul.mubr.f32.gmra.mrb[8].mxu0 %v99_v44  ;;  %v4156_v44 = vld [vmem:[%s5067_s4 + $0x38] sm:$0xff] }
  0x6b   :  { %2829 = vmatmul.mubr.f32.gmra.mrb[8].mxu1 %v484_v45  ;;  %2775 = vmatprep.mubr.f32.mxu0 %v100_v46  ;;  %v4161_v45 = vld [vmem:[%s5067_s4 + $0x30] sm:$0xff]  ;;  %v4168_v46 = vld [vmem:[%s5071_s8 + $0x78] sm:$0xff] }
  0x6c   :  { %2831 = vmatprep.mubr.f32.mxu1 %v485_v49  ;;  %891 = vperm.xlu1 %3370, %v4045_v51   ;;  %v4173_v49 = vld [vmem:[%s5071_s8 + $0x70] sm:$0xff] }
  0x6d   :  { %886 = vperm.xlu0 %3369, %v4050_v52  }
  0x6e   :  { %2776 = vmatmul.mubr.f32.gmra.mrb[10].mxu0 %v101_v53  ;;  %v4180_v53 = vld [vmem:[%s5065_s2 + $0x38] sm:$0xff] }
  0x6f   :  { %2832 = vmatmul.mubr.f32.gmra.mrb[10].mxu1 %v486_v54  ;;  %2778 = vmatprep.mubr.f32.mxu0 %v102_v57  ;;  %v4185_v54 = vld [vmem:[%s5065_s2 + $0x30] sm:$0xff]  ;;  %v4192_v57 = vld [vmem:[%s5067_s4 + $0x48] sm:$0xff] }
  0x70   :  { %2834 = vmatprep.mubr.f32.mxu1 %v487_v59  ;;  %370 = vperm.xlu1 %3370, %v4063_v60   ;;  %v4197_v59 = vld [vmem:[%s5067_s4 + $0x40] sm:$0xff] }
  0x71   :  { %365 = vperm.xlu0 %3369, %v4068_v61  }
  0x72   :  { %2779 = vmatmul.mubr.f32.gmra.mrb[12].mxu0 %v103_v62  ;;  %v4204_v62 = vld [vmem:[%s5065_s2 + $0x48] sm:$0xff] }
  0x73   :  { %2835 = vmatmul.mubr.f32.gmra.mrb[12].mxu1 %v488_v3  ;;  %2781 = vmatprep.mubr.f32.mxu0 %v104_v7  ;;  %v4209_v3 = vld [vmem:[%s5065_s2 + $0x40] sm:$0xff]  ;;  %v4216_v7 = vld [vmem:[%s5067_s4 + $0x58] sm:$0xff] }
  0x74   :  { %2837 = vmatprep.mubr.f32.mxu1 %v489_v11  ;;  %139 = vperm.xlu1 %3370, %v4081_v12   ;;  %v4221_v11 = vld [vmem:[%s5067_s4 + $0x50] sm:$0xff] }
  0x75   :  { %134 = vperm.xlu0 %3369, %v4086_v13  }
  0x76   :  { %2782 = vmatmul.mubr.f32.gmra.mrb[14].mxu0 %v105_v17  ;;  %v4228_v17 = vld [vmem:[%s5065_s2 + $0x58] sm:$0xff] }
  0x77   :  { %2838 = vmatmul.mubr.f32.gmra.mrb[14].mxu1 %v490_v18  ;;  %v4233_v18 = vld [vmem:[%s5065_s2 + $0x50] sm:$0xff] }
  0x78   :  { %901 = vperm.xlu1 %3370, %v4096_v19  }
  0x79   :  { %896 = vperm.xlu0 %3369, %v4101_v20  }
  0x7c   :  { %380 = vperm.xlu1 %3370, %v4108_v26  }
  0x7d   :  { %375 = vperm.xlu0 %3369, %v4113_v27  }
  0x80   :  { %149 = vperm.xlu1 %3370, %v4120_v28  }
  0x81   :  { %144 = vperm.xlu0 %3369, %v4125_v31  }
  0x84   :  { %911 = vperm.xlu1 %3370, %v4132_v35  }
  0x85   :  { %906 = vperm.xlu0 %3369, %v4137_v36  }
  0x88   :  { %390 = vperm.xlu1 %3370, %v4144_v39  }
  0x89   :  { %385 = vperm.xlu0 %3369, %v4149_v41  }
  0x8c   :  { %159 = vperm.xlu1 %3370, %v4156_v44  }
  0x8d   :  { %154 = vperm.xlu0 %3369, %v4161_v45  }
  0x90   :  { %921 = vperm.xlu1 %3370, %v4168_v46  }
  0x91   :  { %916 = vperm.xlu0 %3369, %v4173_v49  }
  0x94   :  { %400 = vperm.xlu1 %3370, %v4180_v53  }
  0x95   :  { %395 = vperm.xlu0 %3369, %v4185_v54  }
  0x98   :  { %169 = vperm.xlu1 %3370, %v4192_v57  }
  0x99   :  { %164 = vperm.xlu0 %3369, %v4197_v59  }
  0x9c   :  { %410 = vperm.xlu1 %3370, %v4204_v62  }
  0x9d   :  { %405 = vperm.xlu0 %3369, %v4209_v3  }
  0xa0   :  { %179 = vperm.xlu1 %3370, %v4216_v7  }
  0xa1   :  { %174 = vperm.xlu0 %3369, %v4221_v11  }
  0xa4   :  { %420 = vperm.xlu1 %3370, %v4228_v17  }
  0xa5   :  { %415 = vperm.xlu0 %3369, %v4233_v18  }
  0xa8   :  { %189 = vperm.xlu1 %3370, %v4240_v4  }
  0xa9   :  { %184 = vperm.xlu0 %3369, %v4245_v58  }
  0xac   :  { %430 = vperm.xlu1 %3370, %v4252_v50   ;;  %v4281_v50 = vld [vmem:[%s5065_s2 + $0x70] sm:$0xff] }
  0xad   :  { %425 = vperm.xlu0 %3369, %v4257_v40   ;;  %v507_v40 = vld [vmem:[#allocation7] sm:$0xff] }
  0xae   :  { %2872 = vmatprep.mubr.f32.mxu0 %v507_v40 }
  0xb0   :  { %199 = vperm.xlu1 %3370, %v4264_v32  }
  0xb1   :  { %194 = vperm.xlu0 %3369, %v4269_v24  }
  0xb4   :  { %440 = vperm.xlu1 %3370, %v4276_v16  }
  0xb5   :  { %435 = vperm.xlu0 %3369, %v4281_v50  }
  0xb8   :  { %3372 = vset.pattern.permute.xlu1 %v3668_v8 }
  0xb9   :  { %3371 = vset.pattern.permute.xlu0 %v3668_v8  ;;  %1590 = vperm.xlu1 %3372, %v3801_v10  }
  0xba   :  { %1586 = vperm.xlu0 %3371, %v3781_v2   ;;  %v542_v2 = vpop.permute.xlu0 %541 }
  0xbd   :  { %1594 = vperm.xlu1 %3372, %v3776_v1   ;;  %v552_v1 = vpop.permute.xlu1 %551 }
  0xbe   :  { %1598 = vperm.xlu0 %3371, %v3796_v9   ;;  %v547_v9 = vpop.permute.xlu0 %546 }
  0xc1   :  { %1602 = vperm.xlu1 %3372, %v3830_v22   ;;  %v557_v8 = vpop.permute.xlu1 %556 }
  0xc2   :  { %1606 = vperm.xlu0 %3371, %v3825_v21   ;;  %v562_v21 = vpop.permute.xlu0 %561 }
  0xc5   :  { %1610 = vperm.xlu1 %3372, %v3852_v30   ;;  %v567_v10 = vpop.permute.xlu1 %566 }
  0xc6   :  { %1614 = vperm.xlu0 %3371, %v3847_v29   ;;  %v572_v29 = vpop.permute.xlu0 %571 }
  0xc9   :  { %1618 = vperm.xlu1 %3372, %v3874_v38   ;;  %v577_v22 = vpop.permute.xlu1 %576 }
  0xca   :  { %1622 = vperm.xlu0 %3371, %v3869_v37   ;;  %v4315_v37 = vpop.permute.xlu0 %581 }
  0xcd   :  { %1626 = vperm.xlu1 %3372, %v3899_v48   ;;  %v587_v30 = vpop.permute.xlu1 %586 }
  0xce   :  { %1630 = vperm.xlu0 %3371, %v3894_v47  }
  0xd1   :  { %1634 = vperm.xlu1 %3372, %v3921_v56  }
  0xd2   :  { %1638 = vperm.xlu0 %3371, %v3916_v55  }
  0xd5   :  { %1642 = vperm.xlu1 %3372, %v3943_v0  }
  0xd6   :  { %1646 = vperm.xlu0 %3371, %v3938_v63  }
  0xd9   :  { %1875 = vperm.xlu1 %3372, %v3959_v6  }
  0xda   :  { %1879 = vperm.xlu0 %3371, %v3954_v5  }
  0xdd   :  { %1883 = vperm.xlu1 %3372, %v3978_v15  }
  0xde   :  { %1887 = vperm.xlu0 %3371, %v3973_v14  }
  0xe1   :  { %1891 = vperm.xlu1 %3372, %v3996_v25  }
  0xe2   :  { %1895 = vperm.xlu0 %3371, %v3991_v23  }
  0xe5   :  { %1899 = vperm.xlu1 %3372, %v4014_v34   ;;  %v592_v34 = vpop.permute.xlu0 %591 }
  0xe6   :  { %1903 = vperm.xlu0 %3371, %v4009_v33   ;;  %v597_v33 = vpop.permute.xlu1 %596 }
  0xe9   :  { %1263 = vperm.xlu1 %3372, %v4032_v43  }
  0xea   :  { %1267 = vperm.xlu0 %3371, %v4027_v42  }
  0xed   :  { %1907 = vperm.xlu1 %3372, %v4050_v52  }
  0xee   :  { %1911 = vperm.xlu0 %3371, %v4045_v51  }
  0xf1   :  { %1472 = vperm.xlu1 %3372, %v4068_v61  }
  0xf2   :  { %1476 = vperm.xlu0 %3371, %v4063_v60  }
  0xf5   :  { %1271 = vperm.xlu1 %3372, %v4086_v13  }
  0xf6   :  { %1275 = vperm.xlu0 %3371, %v4081_v12  }
  0xf9   :  { %1915 = vperm.xlu1 %3372, %v4101_v20  }
  0xfa   :  { %1919 = vperm.xlu0 %3371, %v4096_v19  }
  0xfd   :  { %1480 = vperm.xlu1 %3372, %v4113_v27   ;;  %v607_v27 = vpop.permute.xlu1 %606 }
  0xfe   :  { %1484 = vperm.xlu0 %3371, %v4108_v26  }
 0x101   :  { %1279 = vperm.xlu1 %3372, %v4125_v31  }
 0x102   :  { %1283 = vperm.xlu0 %3371, %v4120_v28  }
 0x105   :  { %1923 = vperm.xlu1 %3372, %v4137_v36  }
 0x106   :  { %1927 = vperm.xlu0 %3371, %v4132_v35  }
 0x109   :  { %1488 = vperm.xlu1 %3372, %v4149_v41  }
 0x10a   :  { %1492 = vperm.xlu0 %3371, %v4144_v39  }
 0x10d   :  { %1287 = vperm.xlu1 %3372, %v4161_v45  }
 0x10e   :  { %1291 = vperm.xlu0 %3371, %v4156_v44  }
 0x111   :  { %1931 = vperm.xlu1 %3372, %v4173_v49  }
 0x112   :  { %1935 = vperm.xlu0 %3371, %v4168_v46  }
 0x115   :  { %1496 = vperm.xlu1 %3372, %v4185_v54  }
 0x12d   :  { %v4317_v38 = vpop.f32.mrb[0].mxu0 }
 0x12e   :  { %v2818_v40 = vpop.f32.mrb[0].mxu1  ;;  %v4319_v48 = vpop.f32.mrb[1].mxu0 }
 0x12f   :  { %v691_v47 = vadd.f32 %v2818_v40, %v547_v9  ;;  %v685_v55 = vpop.f32.mrb[1].mxu1  ;;  %v4351_v40 = vpop.permute.xlu0 %601  ;;  %1500 = vperm.xlu0 %3371, %v4180_v53  }
 0x130   :  { %v686_v56 = vadd.f32 %v685_v55, %v542_v2 }
 0x131   :  { %v781_v63 = vmul.f32 0.70710677, %v691_v47  ;;  %v4323_v5 = vpop.f32.mrb[2].mxu0 }
 0x132   :  { %v780_v0 = vmul.f32 0.70710677, %v686_v56  ;;  %v2821_v6 = vpop.f32.mrb[2].mxu1  ;;  %v4325_v15 = vpop.f32.mrb[3].mxu0 }
 0x133   :  { %3375 = verf.f32 %v781_v63  ;;  %v701_v14 = vadd.f32 %v2821_v6, %v557_v8  ;;  %v695_v23 = vpop.f32.mrb[3].mxu1 }
 0x134   :  { %3377 = verf.f32 %v780_v0  ;;  %v696_v25 = vadd.f32 %v695_v23, %v552_v1 }
 0x135   :  { %v783_v42 = vmul.f32 0.70710677, %v701_v14  ;;  %v4329_v51 = vpop.f32.mrb[4].mxu0 }
 0x136   :  { %v782_v43 = vmul.f32 0.70710677, %v696_v25  ;;  %v2824_v52 = vpop.f32.mrb[4].mxu1  ;;  %v4333_v61 = vpop.f32.mrb[5].mxu0 }
 0x137   :  { %3379 = verf.f32 %v783_v42  ;;  %v4331_v60 = vadd.f32 %v2824_v52, %v567_v10  ;;  %v705_v12 = vpop.f32.mrb[5].mxu1 }
 0x138   :  { %3381 = verf.f32 %v782_v43  ;;  %v4335_v13 = vadd.f32 %v705_v12, %v562_v21  ;;  %v765_v43 = vmul.f32 0.5, %v691_v47 }
 0x139   :  { %v785_v19 = vmul.f32 0.70710677, %v4331_v60  ;;  %v4341_v1 = vpop.f32.mrb[6].mxu0 }
 0x13a   :  { %v784_v20 = vmul.f32 0.70710677, %v4335_v13  ;;  %v2827_v2 = vpop.f32.mrb[6].mxu1  ;;  %v4345_v9 = vpop.f32.mrb[7].mxu0 }
 0x13b   :  { %3383 = verf.f32 %v785_v19  ;;  %v4343_v8 = vadd.f32 %v2827_v2, %v577_v22  ;;  %v715_v10 = vpop.f32.mrb[7].mxu1  ;;  %v764_v19 = vmul.f32 0.5, %v686_v56 }
 0x13c   :  { %3385 = verf.f32 %v784_v20  ;;  %v4347_v21 = vadd.f32 %v715_v10, %v572_v29  ;;  %v767_v20 = vmul.f32 0.5, %v701_v14 }
 0x13d   :  { %v3376_v26 = vpop.eup %3375  ;;  %v787_v55 = vmul.f32 0.70710677, %v4343_v8  ;;  %v4355_v6 = vpop.f32.mrb[8].mxu0 }
 0x13e   :  { %v3378_v63 = vpop.eup %3377  ;;  %v813_v0 = vadd.f32 1.0, %v3376_v26  ;;  %v786_v22 = vmul.f32 0.70710677, %v4347_v21  ;;  %v2830_v23 = vpop.f32.mrb[8].mxu1 }
 0x13f   :  { %v812_v42 = vadd.f32 1.0, %v3378_v63  ;;  %3387 = verf.f32 %v787_v55  ;;  %v4357_v29 = vadd.f32 %v2830_v23, %v587_v30  ;;  %v4359_v31 = vpop.f32.mrb[9].mxu0  ;;  %v725_v28 = vpop.f32.mrb[9].mxu1  ;;  %v766_v55 = vmul.f32 0.5, %v696_v25 }
 0x140   :  { %3389 = verf.f32 %v786_v22  ;;  %v4362_v52 = vadd.f32 %v725_v28, %v4315_v37  ;;  %v829_v30 = vmul.f32 %v813_v0, %v765_v43  ;;  %v617_v0 = vpop.permute.xlu1 %616  ;;  %v612_v28 = vpop.permute.xlu0 %611  ;;  %1295 = vperm.xlu1 %3372, %v4197_v59   ;;  %1299 = vperm.xlu0 %3371, %v4192_v57  }
 0x141   :  { %v3380_v12 = vpop.eup %3379  ;;  %v789_v2 = vmul.f32 0.70710677, %v4357_v29  ;;  %v4368_v47 = vpop.f32.mrb[10].mxu0  ;;  %v828_v37 = vmul.f32 %v812_v42, %v764_v19 }
 0x142   :  { %v3382_v10 = vpop.eup %3381  ;;  %v815_v26 = vadd.f32 1.0, %v3380_v12  ;;  %v788_v63 = vmul.f32 0.70710677, %v4362_v52  ;;  %v2833_v22 = vpop.f32.mrb[10].mxu1 }
 0x143   :  { %v814_v23 = vadd.f32 1.0, %v3382_v10  ;;  %3391 = verf.f32 %v789_v2  ;;  %v4370_v36 = vadd.f32 %v2833_v22, %v597_v33  ;;  %v4372_v35 = vpop.f32.mrb[11].mxu0  ;;  %v735_v56 = vpop.f32.mrb[11].mxu1  ;;  %v3184_v22 = vpack.c.bf16 %v829_v30, %v828_v37 }
 0x144   :  { %3393 = verf.f32 %v788_v63  ;;  %v4374_v14 = vadd.f32 %v735_v56, %v592_v34  ;;  %v831_v43 = vmul.f32 %v815_v26, %v767_v20  ;;  %v769_v56 = vmul.f32 0.5, %v4331_v60 }
 0x145   :  { %v3384_v25 = vpop.eup %3383  ;;  %v830_v12 = vmul.f32 %v814_v23, %v766_v55  ;;  %v791_v42 = vmul.f32 0.70710677, %v4370_v36  ;;  %v4380_v2 = vpop.f32.mrb[12].mxu0  ;;  %v768_v55 = vmul.f32 0.5, %v4335_v13  ;;  %v771_v23 = vmul.f32 0.5, %v4343_v8  ;;  %3185 = vmatprep.subr.bf16.mxu0 %v3184_v22 }
 0x146   :  { %v3386_v19 = vpop.eup %3385  ;;  %v790_v33 = vmul.f32 0.70710677, %v4374_v14  ;;  %v2836_v10 = vpop.f32.mrb[12].mxu1  ;;  %v817_v63 = vadd.f32 1.0, %v3384_v25  ;;  %v770_v60 = vmul.f32 0.5, %v4347_v21  ;;  %3187 = vmatpush3.bf16.msra.mxu0 %v3184_v22 }
 0x147   :  { %v816_v34 = vadd.f32 1.0, %v3386_v19  ;;  %3395 = verf.f32 %v791_v42  ;;  %v4382_v41 = vpop.f32.mrb[13].mxu0  ;;  %v745_v39 = vpop.f32.mrb[13].mxu1  ;;  %v4385_v20 = vadd.f32 %v2836_v10, %v607_v27  ;;  %v3188_v37 = vpack.c.bf16 %v831_v43, %v830_v12 }
 0x148   :  { %3397 = verf.f32 %v790_v33  ;;  %v4392_v30 = vadd.f32 %v745_v39, %v4351_v40  ;;  %v833_v19 = vmul.f32 %v817_v63, %v769_v56  ;;  %v4401_v43 = vpop.permute.xlu1 %851  ;;  %v4403_v12 = vpop.permute.xlu0 %846  ;;  %1504 = vperm.xlu1 %3372, %v4209_v3   ;;  %1508 = vperm.xlu0 %3371, %v4204_v62  }
 0x149   :  { %v3388_v26 = vpop.eup %3387  ;;  %v793_v27 = vmul.f32 0.70710677, %v4385_v20  ;;  %v4396_v45 = vpop.f32.mrb[14].mxu0  ;;  %v832_v33 = vmul.f32 %v816_v34, %v768_v55  ;;  %3189 = vmatprep.subr.bf16.mxu0 %v3188_v37 }
 0x14a   :  { %v3390_v25 = vpop.eup %3389  ;;  %v819_v42 = vadd.f32 1.0, %v3388_v26  ;;  %5101 = vst [vmem:[#allocation22_spill] sm:$0xff] %v4396_v45  ;;  %v2839_v44 = vpop.f32.mrb[14].mxu1  ;;  %v792_v8 = vmul.f32 0.70710677, %v4392_v30  ;;  %v773_v26 = vmul.f32 0.5, %v4357_v29  ;;  %3191 = vmatpush3.bf16.msra.mxu0 %v3188_v37 }
 0x14b   :  { %v818_v13 = vadd.f32 1.0, %v3390_v25  ;;  %v4399_v10 = vpop.f32.mrb[15].mxu0  ;;  %v755_v40 = vpop.f32.mrb[15].mxu1  ;;  %3399 = verf.f32 %v793_v27  ;;  %v761_v39 = vadd.f32 %v2839_v44, %v617_v0  ;;  %v774_v44 = vmul.f32 0.5, %v4374_v14 }
 0x14c   :  { %5102 = vst [vmem:[#allocation23_spill] sm:$0xff] %v4399_v10  ;;  %v835_v21 = vmul.f32 %v819_v42, %v771_v23  ;;  %3401 = verf.f32 %v792_v8  ;;  %v756_v22 = vadd.f32 %v755_v40, %v612_v28  ;;  %v772_v10 = vmul.f32 0.5, %v4362_v52  ;;  %v4413_v37 = vpop.permute.xlu0 %856  ;;  %1307 = vperm.xlu0 %3371, %v4216_v7   ;;  %v508_v7 = vld [vmem:[#allocation7 + $0x8] sm:$0xff] }
 0x14d   :  { %v3392_v63 = vpop.eup %3391  ;;  %v834_v34 = vmul.f32 %v818_v13, %v770_v60  ;;  %v795_v25 = vmul.f32 0.70710677, %v761_v39  ;;  %v3192_v42 = vpack.c.bf16 %v833_v19, %v832_v33  ;;  %v4411_v60 = vpop.permute.xlu1 %861  ;;  %v775_v52 = vmul.f32 0.5, %v4370_v36  ;;  %1303 = vperm.xlu1 %3372, %v4221_v11  }
 0x14e   :  { %v3394_v56 = vpop.eup %3393  ;;  %v821_v55 = vadd.f32 1.0, %v3392_v63  ;;  %v794_v23 = vmul.f32 0.70710677, %v756_v22  ;;  %v777_v8 = vmul.f32 0.5, %v4385_v20  ;;  %v779_v20 = vmul.f32 0.5, %v761_v39 }
 0x14f   :  { %v820_v45 = vadd.f32 1.0, %v3394_v56  ;;  %3403 = verf.f32 %v795_v25  ;;  %v3196_v49 = vpack.c.bf16 %v835_v21, %v834_v34  ;;  %3193 = vmatprep.subr.bf16.mxu0 %v3192_v42  ;;  %v776_v21 = vmul.f32 0.5, %v4392_v30 }
 0x150   :  { %v837_v0 = vmul.f32 %v821_v55, %v773_v26  ;;  %3405 = verf.f32 %v794_v23  ;;  %3195 = vmatpush3.bf16.msra.mxu0 %v3192_v42  ;;  %v4422_v14 = vpop.permute.xlu0 %866  ;;  %v778_v55 = vmul.f32 0.5, %v756_v22  ;;  %1516 = vperm.xlu0 %3371, %v4228_v17   ;;  %v5103_v22 = vld [vmem:[#allocation12_spill] sm:$0xff] }
 0x151   :  { %v3396_v46 = vpop.eup %3395  ;;  %v836_v28 = vmul.f32 %v820_v45, %v772_v10  ;;  %3197 = vmatprep.subr.bf16.mxu0 %v3196_v49  ;;  %v4420_v40 = vpop.permute.xlu1 %871  ;;  %1512 = vperm.xlu1 %3372, %v4233_v18   ;;  %v5105_v18 = vld [vmem:[#allocation20_spill] sm:$0xff] }
 0x152   :  { %v3398_v29 = vpop.eup %3397  ;;  %v823_v27 = vadd.f32 1.0, %v3396_v46  ;;  %v5104_v46 = vld [vmem:[#allocation21_spill] sm:$0xff] }
 0x153   :  { %v822_v19 = vadd.f32 1.0, %v3398_v29  ;;  %v3200_v54 = vpack.c.bf16 %v837_v0, %v836_v28  ;;  %v5106_v29 = vld [vmem:[#allocation13_spill] sm:$0xff] }
 0x154   :  { %v839_v33 = vmul.f32 %v823_v27, %v775_v52  ;;  %3199 = vmatpush3.bf16.msra.mxu0 %v3196_v49  ;;  %v4431_v3 = vpop.permute.xlu0 %876  ;;  %1315 = vperm.xlu0 %3371, %v4240_v4   ;;  %v509_v49 = vld [vmem:[#allocation7 + $0x10] sm:$0xff]  ;;  %v511_v4 = vld [vmem:[#allocation7 + $0x20] sm:$0xff]  ;;  %v512_v52 = vld [vmem:[#allocation7 + $0x28] sm:$0xff] }
 0x155   :  { %v838_v53 = vmul.f32 %v822_v19, %v774_v44  ;;  %v3400_v45 = vpop.eup %3399  ;;  %3201 = vmatprep.subr.bf16.mxu0 %v3200_v54  ;;  %v4429_v42 = vpop.permute.xlu1 %881  ;;  %1311 = vperm.xlu1 %3372, %v4245_v58   ;;  %v510_v58 = vld [vmem:[#allocation7 + $0x18] sm:$0xff]  ;;  %v513_v44 = vld [vmem:[#allocation7 + $0x30] sm:$0xff] }
 0x156   :  { %v3402_v13 = vpop.eup %3401  ;;  %v825_v10 = vadd.f32 1.0, %v3400_v45  ;;  %v5107_v27 = vld [vmem:[#allocation14_spill] sm:$0xff]  ;;  %v5109_v45 = vld [vmem:[#allocation16_spill] sm:$0xff] }
 0x157   :  { %v3204_v36 = vpack.c.bf16 %v839_v33, %v838_v53  ;;  %v824_v63 = vadd.f32 1.0, %v3402_v13  ;;  %v515_v33 = vld [vmem:[#allocation7 + $0x40] sm:$0xff]  ;;  %v516_v53 = vld [vmem:[#allocation7 + $0x48] sm:$0xff]  ;;  %v517_v13 = vld [vmem:[#allocation7 + $0x50] sm:$0xff] }
 0x158   :  { %v841_v57 = vmul.f32 %v825_v10, %v777_v8  ;;  %3203 = vmatpush3.bf16.msra.mxu0 %v3200_v54  ;;  %v4437_v11 = vpop.permute.xlu0 %124  ;;  %1524 = vperm.xlu0 %3371, %v5105_v18   ;;  %v519_v8 = vld [vmem:[#allocation7 + $0x60] sm:$0xff]  ;;  %v520_v10 = vld [vmem:[#allocation7 + $0x68] sm:$0xff]  ;;  %v1567_v18 = vld [vmem:[#allocation5 + $0xf8] sm:$0xff] }
 0x159   :  { %v3404_v59 = vpop.eup %3403  ;;  %v840_v34 = vmul.f32 %v824_v63, %v776_v21  ;;  %3205 = vmatprep.subr.bf16.mxu0 %v3204_v36  ;;  %v4435_v39 = vpop.permute.xlu1 %129  ;;  %1520 = vperm.xlu1 %3372, %v5104_v46   ;;  %v521_v21 = vld [vmem:[#allocation7 + $0x70] sm:$0xff]  ;;  %v522_v63 = vld [vmem:[#allocation7 + $0x78] sm:$0xff] }
 0x15a   :  { %v3406_v56 = vpop.eup %3405  ;;  %v827_v26 = vadd.f32 1.0, %v3404_v59  ;;  %v1552_v59 = vld [vmem:[#allocation5 + $0x80] sm:$0xff]  ;;  %v1566_v46 = vld [vmem:[#allocation5 + $0xf0] sm:$0xff] }
 0x15b   :  { %v826_v25 = vadd.f32 1.0, %v3406_v56  ;;  %v3208_v23 = vpack.c.bf16 %v841_v57, %v840_v34  ;;  %v5112_v57 = vld [vmem:[#allocation19_spill] sm:$0xff]  ;;  %v1553_v34 = vld [vmem:[#allocation5 + $0x88] sm:$0xff]  ;;  %v1554_v56 = vld [vmem:[#allocation5 + $0x90] sm:$0xff] }
 0x15c   :  { %v843_v30 = vmul.f32 %v827_v26, %v779_v20  ;;  %3207 = vmatpush3.bf16.msra.mxu0 %v3204_v36  ;;  %v4446_v28 = vpop.permute.xlu0 %886  ;;  %1323 = vperm.xlu0 %3371, %v4264_v32   ;;  %v5108_v32 = vld [vmem:[#allocation15_spill] sm:$0xff]  ;;  %v5111_v36 = vld [vmem:[#allocation18_spill] sm:$0xff] }
 0x15d   :  { %v842_v62 = vmul.f32 %v826_v25, %v778_v55  ;;  %3209 = vmatprep.subr.bf16.mxu0 %v3208_v23  ;;  %v4444_v17 = vpop.permute.xlu1 %891  ;;  %1319 = vperm.xlu1 %3372, %v4269_v24   ;;  %v514_v24 = vld [vmem:[#allocation7 + $0x38] sm:$0xff]  ;;  %v1556_v26 = vld [vmem:[#allocation5 + $0xa0] sm:$0xff]  ;;  %v1557_v55 = vld [vmem:[#allocation5 + $0xa8] sm:$0xff] }
 0x15e   :  { %v1555_v20 = vld [vmem:[#allocation5 + $0x98] sm:$0xff]  ;;  %v1558_v25 = vld [vmem:[#allocation5 + $0xb0] sm:$0xff] }
 0x15f   :  { %v3212_v0 = vpack.c.bf16 %v843_v30, %v842_v62  ;;  %v1560_v30 = vld [vmem:[#allocation5 + $0xc0] sm:$0xff]  ;;  %v1561_v62 = vld [vmem:[#allocation5 + $0xc8] sm:$0xff] }
 0x160   :  { %3211 = vmatpush3.bf16.msra.mxu0 %v3208_v23  ;;  %v4456_v54 = vpop.permute.xlu0 %365  ;;  %1532 = vperm.xlu0 %3371, %v4276_v16   ;;  %v518_v16 = vld [vmem:[#allocation7 + $0x58] sm:$0xff] }
 0x161   :  { %3213 = vmatprep.subr.bf16.mxu0 %v3212_v0  ;;  %v4454_v19 = vpop.permute.xlu1 %370  ;;  %1528 = vperm.xlu1 %3372, %v4281_v50   ;;  %v5110_v50 = vld [vmem:[#allocation17_spill] sm:$0xff]  ;;  %v1559_v23 = vld [vmem:[#allocation5 + $0xb8] sm:$0xff] }
 0x164   :  { %3215 = vmatpush3.bf16.msra.mxu0 %v3212_v0  ;;  %v1562_v0 = vld [vmem:[#allocation5 + $0xd0] sm:$0xff] }
 0x165   :  { %3249 = vmatprep.subr.bf16.mxu0 %v5103_v22 }
 0x167   :  { %2873 = vmatmul.mubr.f32.vlgmr.msra.gmra.mrb[16].mxu0 %v508_v7  ;;  %v1563_v7 = vld [vmem:[#allocation5 + $0xd8] sm:$0xff] }
 0x168   :  { %3251 = vmatpush3.bf16.msra.mxu0 %v5103_v22  ;;  %2875 = vmatprep.mubr.f32.mxu0 %v509_v49  ;;  %v1564_v22 = vld [vmem:[#allocation5 + $0xe0] sm:$0xff]  ;;  %v1565_v49 = vld [vmem:[#allocation5 + $0xe8] sm:$0xff] }
 0x169   :  { %3253 = vmatprep.subr.bf16.mxu0 %v5106_v29 }
 0x16b   :  { %2876 = vmatmul.mubr.f32.gmra.mrb[18].mxu0 %v510_v58  ;;  %v140_v58 = vpop.permute.xlu1 %139 }
 0x16c   :  { %3255 = vmatpush3.bf16.msra.mxu0 %v5106_v29  ;;  %2878 = vmatprep.mubr.f32.mxu0 %v511_v4  ;;  %v135_v29 = vpop.permute.xlu0 %134 }
 0x16d   :  { %3257 = vmatprep.subr.bf16.mxu0 %v5107_v27 }
 0x16f   :  { %2879 = vmatmul.mubr.f32.gmra.mrb[20].mxu0 %v512_v52  ;;  %v4471_v4 = vpop.permute.xlu1 %901 }
 0x170   :  { %3259 = vmatpush3.bf16.msra.mxu0 %v5107_v27  ;;  %2881 = vmatprep.mubr.f32.mxu0 %v513_v44  ;;  %v4473_v52 = vpop.permute.xlu0 %896 }
 0x171   :  { %3261 = vmatprep.subr.bf16.mxu0 %v5108_v32 }
 0x173   :  { %2882 = vmatmul.mubr.f32.gmra.mrb[22].mxu0 %v514_v24  ;;  %v381_v27 = vpop.permute.xlu1 %380 }
 0x174   :  { %3263 = vmatpush3.bf16.msra.mxu0 %v5108_v32  ;;  %2884 = vmatprep.mubr.f32.mxu0 %v515_v33  ;;  %v376_v44 = vpop.permute.xlu0 %375 }
 0x175   :  { %3265 = vmatprep.subr.bf16.mxu0 %v5109_v45 }
 0x177   :  { %2885 = vmatmul.mubr.f32.gmra.mrb[24].mxu0 %v516_v53  ;;  %v150_v24 = vpop.permute.xlu1 %149 }
 0x178   :  { %3267 = vmatpush3.bf16.msra.mxu0 %v5109_v45  ;;  %2887 = vmatprep.mubr.f32.mxu0 %v517_v13  ;;  %v145_v32 = vpop.permute.xlu0 %144 }
 0x179   :  { %3269 = vmatprep.subr.bf16.mxu0 %v5110_v50 }
 0x17b   :  { %2888 = vmatmul.mubr.f32.gmra.mrb[26].mxu0 %v518_v16  ;;  %v4475_v33 = vpop.permute.xlu1 %911 }
 0x17c   :  { %3271 = vmatpush3.bf16.msra.mxu0 %v5110_v50  ;;  %2890 = vmatprep.mubr.f32.mxu0 %v519_v8  ;;  %5113 = vst [vmem:[#allocation12_spill] sm:$0xff] %v4475_v33  ;;  %v4477_v53 = vpop.permute.xlu0 %906  ;;  %v289_v33 = vadd.f32 %v4333_v61, %v145_v32 }
 0x17d   :  { %3273 = vmatprep.subr.bf16.mxu0 %v5111_v36  ;;  %5114 = vst [vmem:[#allocation21_spill] sm:$0xff] %v4477_v53  ;;  %v294_v53 = vadd.f32 %v4329_v51, %v150_v24 }
 0x17f   :  { %2891 = vmatmul.mubr.f32.gmra.mrb[28].mxu0 %v520_v10  ;;  %v391_v45 = vpop.permute.xlu1 %390 }
 0x180   :  { %3275 = vmatpush3.bf16.msra.mxu0 %v5111_v36  ;;  %2893 = vmatprep.mubr.f32.mxu0 %v521_v21  ;;  %v386_v13 = vpop.permute.xlu0 %385  ;;  %v2472_v36 = vld [vmem:[%s5066_s3 + $0x80] sm:$0xff] }
 0x181   :  { %3277 = vmatprep.subr.bf16.mxu0 %v5112_v57  ;;  %2928 = vmatprep.mubr.f32.mxu1 %v2472_v36  ;;  %v284_v36 = vadd.f32 %v4323_v5, %v140_v58  ;;  %v4511_v58 = vadd.f32 %v391_v45, %v294_v53 }
 0x183   :  { %2894 = vmatmul.mubr.f32.gmra.mrb[30].mxu0 %v522_v63  ;;  %v160_v16 = vpop.permute.xlu1 %159 }
 0x184   :  { %3279 = vmatpush3.bf16.msra.mxu0 %v5112_v57  ;;  %2984 = vmatprep.mubr.f32.mxu0 %v1552_v59  ;;  %v155_v50 = vpop.permute.xlu0 %154 }
 0x185   :  { %v299_v32 = vadd.f32 %v4345_v9, %v155_v50 }
 0x187   :  { %2985 = vmatmul.mubr.f32.vlgmr.msra.gmra.mrb[32].mxu0 %v1553_v34  ;;  %v4479_v8 = vpop.permute.xlu1 %921 }
 0x188   :  { %2987 = vmatprep.mubr.f32.mxu0 %v1554_v56  ;;  %5115 = vst [vmem:[#allocation20_spill] sm:$0xff] %v4479_v8  ;;  %v4481_v10 = vpop.permute.xlu0 %916  ;;  %v279_v8 = vadd.f32 %v4325_v15, %v135_v29  ;;  %v4513_v29 = vadd.f32 %v386_v13, %v289_v33 }
 0x189   :  { %5116 = vst [vmem:[#allocation13_spill] sm:$0xff] %v4481_v10 }
 0x18a   :  { %v4509_v61 = vadd.f32 %v376_v44, %v279_v8 }
 0x18b   :  { %2988 = vmatmul.mubr.f32.gmra.mrb[34].mxu0 %v1555_v20  ;;  %v401_v21 = vpop.permute.xlu1 %400 }
 0x18c   :  { %2990 = vmatprep.mubr.f32.mxu0 %v1556_v26  ;;  %v396_v63 = vpop.permute.xlu0 %395 }
 0x18f   :  { %2991 = vmatmul.mubr.f32.gmra.mrb[36].mxu0 %v1557_v55  ;;  %v170_v57 = vpop.permute.xlu1 %169 }
 0x190   :  { %2993 = vmatprep.mubr.f32.mxu0 %v1558_v25  ;;  %v165_v59 = vpop.permute.xlu0 %164 }
 0x193   :  { %2994 = vmatmul.mubr.f32.gmra.mrb[38].mxu0 %v1559_v23  ;;  %v411_v34 = vpop.permute.xlu1 %410 }
 0x194   :  { %2996 = vmatprep.mubr.f32.mxu0 %v1560_v30  ;;  %v406_v56 = vpop.permute.xlu0 %405 }
 0x197   :  { %2997 = vmatmul.mubr.f32.gmra.mrb[40].mxu0 %v1561_v62  ;;  %v180_v20 = vpop.permute.xlu1 %179 }
 0x198   :  { %2999 = vmatprep.mubr.f32.mxu0 %v1562_v0  ;;  %v175_v26 = vpop.permute.xlu0 %174 }
 0x199   :  { %v319_v33 = vadd.f32 %v4372_v35, %v175_v26 }
 0x19b   :  { %3000 = vmatmul.mubr.f32.gmra.mrb[42].mxu0 %v1563_v7  ;;  %v421_v55 = vpop.permute.xlu1 %420  ;;  %v274_v7 = vadd.f32 %v4317_v38, %v4435_v39 }
 0x19c   :  { %3002 = vmatprep.mubr.f32.mxu0 %v1564_v22  ;;  %v416_v25 = vpop.permute.xlu0 %415 }
 0x19f   :  { %3003 = vmatmul.mubr.f32.gmra.mrb[44].mxu0 %v1565_v49  ;;  %v190_v23 = vpop.permute.xlu1 %189 }
 0x1a0   :  { %3005 = vmatprep.mubr.f32.mxu0 %v1566_v46  ;;  %v185_v30 = vpop.permute.xlu0 %184  ;;  %v334_v45 = vadd.f32 %v4380_v2, %v190_v23  ;;  %v4538_v23 = vadd.f32 %v416_v25, %v319_v33 }
 0x1a1   :  { %v329_v9 = vadd.f32 %v4382_v41, %v185_v30 }
 0x1a3   :  { %3006 = vmatmul.mubr.f32.gmra.mrb[46].mxu0 %v1567_v18  ;;  %v431_v0 = vpop.permute.xlu1 %430  ;;  %v269_v18 = vadd.f32 %v4319_v48, %v4437_v11 }
 0x1a4   :  { %v426_v46 = vpop.permute.xlu0 %425 }
 0x1a5   :  { %v4504_v5 = vadd.f32 %v4456_v54, %v269_v18  ;;  %v314_v54 = vadd.f32 %v4355_v6, %v170_v57  ;;  %v5117_v6 = vld [vmem:[#allocation22_spill] sm:$0xff]  ;;  %v4543_v30 = vadd.f32 %v426_v46, %v329_v9 }
 0x1a7   :  { %v200_v51 = vpop.permute.xlu1 %199 }
 0x1a8   :  { %v195_v24 = vpop.permute.xlu0 %194  ;;  %v344_v13 = vadd.f32 %v5117_v6, %v200_v51 }
 0x1ac   :  { %v436_v26 = vpop.permute.xlu0 %435 }
 0x23a   :  { %v2874_v62 = vpop.f32.mrb[16].mxu0 }
 0x23b   :  { %v4489_v22 = vadd.f32 %v2874_v62, %v4401_v43  ;;  %v990_v49 = vpop.f32.mrb[17].mxu0  ;;  %v4500_v62 = vadd.f32 %v4454_v19, %v274_v7 }
 0x23c   :  { %v991_v10 = vadd.f32 %v990_v49, %v4403_v12  ;;  %v4506_v12 = vadd.f32 %v381_v27, %v284_v36  ;;  %v309_v49 = vadd.f32 %v4359_v31, %v165_v59 }
 0x23d   :  { %v1086_v38 = vmul.f32 0.70710677, %v4489_v22 }
 0x23e   :  { %v1085_v39 = vmul.f32 0.70710677, %v991_v10  ;;  %v2877_v43 = vpop.f32.mrb[18].mxu0  ;;  %v4533_v59 = vadd.f32 %v406_v56, %v309_v49 }
 0x23f   :  { %3407 = verf.f32 %v1086_v38  ;;  %v1006_v48 = vadd.f32 %v2877_v43, %v4411_v60  ;;  %v1000_v11 = vpop.f32.mrb[19].mxu0  ;;  %v304_v60 = vadd.f32 %v4341_v1, %v160_v16  ;;  %v5118_v16 = vld [vmem:[#allocation23_spill] sm:$0xff] }
 0x240   :  { %3409 = verf.f32 %v1085_v39  ;;  %v1001_v15 = vadd.f32 %v1000_v11, %v4413_v37  ;;  %v324_v37 = vadd.f32 %v4368_v47, %v180_v20  ;;  %v339_v50 = vadd.f32 %v5118_v16, %v195_v24  ;;  %v441_v20 = vpop.permute.xlu1 %440 }
 0x241   :  { %v1088_v19 = vmul.f32 0.70710677, %v1006_v48  ;;  %v4527_v8 = vadd.f32 %v401_v21, %v304_v60  ;;  %v4529_v47 = vadd.f32 %v396_v63, %v299_v32  ;;  %v4540_v21 = vadd.f32 %v431_v0, %v334_v45 }
 0x242   :  { %v1087_v27 = vmul.f32 0.70710677, %v1001_v15  ;;  %v2880_v7 = vpop.f32.mrb[20].mxu0  ;;  %v4535_v2 = vadd.f32 %v421_v55, %v324_v37  ;;  %v4545_v56 = vadd.f32 %v441_v20, %v344_v13  ;;  %v4547_v55 = vadd.f32 %v436_v26, %v339_v50 }
 0x243   :  { %3411 = verf.f32 %v1088_v19  ;;  %v1016_v44 = vadd.f32 %v2880_v7, %v4420_v40  ;;  %v1010_v53 = vpop.f32.mrb[21].mxu0  ;;  %v4531_v40 = vadd.f32 %v411_v34, %v314_v54  ;;  %v1069_v39 = vmul.f32 0.5, %v991_v10 }
 0x244   :  { %3413 = verf.f32 %v1087_v27  ;;  %v1011_v1 = vadd.f32 %v1010_v53, %v4422_v14  ;;  %v1072_v11 = vmul.f32 0.5, %v1006_v48  ;;  %v1071_v19 = vmul.f32 0.5, %v1001_v15 }
 0x245   :  { %v1090_v31 = vmul.f32 0.70710677, %v1016_v44  ;;  %v1074_v54 = vmul.f32 0.5, %v1016_v44 }
 0x246   :  { %v1089_v57 = vmul.f32 0.70710677, %v1011_v1  ;;  %v2883_v35 = vpop.f32.mrb[22].mxu0  ;;  %v1073_v27 = vmul.f32 0.5, %v1011_v1 }
 0x247   :  { %3415 = verf.f32 %v1090_v31  ;;  %v1026_v41 = vadd.f32 %v2883_v35, %v4429_v42  ;;  %v1020_v14 = vpop.f32.mrb[23].mxu0  ;;  %v1070_v42 = vmul.f32 0.5, %v4489_v22 }
 0x248   :  { %3417 = verf.f32 %v1089_v57  ;;  %v1021_v63 = vadd.f32 %v1020_v14, %v4431_v3 }
 0x249   :  { %v3408_v34 = vpop.eup %3407  ;;  %v1092_v18 = vmul.f32 0.70710677, %v1026_v41  ;;  %v1076_v48 = vmul.f32 0.5, %v1026_v41 }
 0x24a   :  { %v3410_v36 = vpop.eup %3409  ;;  %v1118_v38 = vadd.f32 1.0, %v3408_v34  ;;  %v1091_v25 = vmul.f32 0.70710677, %v1021_v63  ;;  %v2886_v43 = vpop.f32.mrb[24].mxu0  ;;  %v1075_v6 = vmul.f32 0.5, %v1021_v63  ;;  %v5119_v34 = vld [vmem:[#allocation12_spill] sm:$0xff] }
 0x24b   :  { %v1117_v0 = vadd.f32 1.0, %v3410_v36  ;;  %3419 = verf.f32 %v1092_v18  ;;  %v1036_v3 = vadd.f32 %v2886_v43, %v4444_v17  ;;  %v1030_v51 = vpop.f32.mrb[25].mxu0  ;;  %v1587_v43 = vpop.permute.xlu0 %1586 }
 0x24c   :  { %v1134_v46 = vmul.f32 %v1118_v38, %v1070_v42  ;;  %3421 = verf.f32 %v1091_v25  ;;  %v1031_v24 = vadd.f32 %v1030_v51, %v4446_v28  ;;  %v5120_v38 = vld [vmem:[#allocation21_spill] sm:$0xff] }
 0x24d   :  { %v3412_v60 = vpop.eup %3411  ;;  %v1133_v32 = vmul.f32 %v1117_v0, %v1069_v39  ;;  %v1094_v22 = vmul.f32 0.70710677, %v1036_v3  ;;  %v1078_v13 = vmul.f32 0.5, %v1036_v3 }
 0x24e   :  { %v3414_v7 = vpop.eup %3413  ;;  %v4553_v10 = vadd.f32 %v1134_v46, %v4500_v62  ;;  %v1120_v49 = vadd.f32 1.0, %v3412_v60  ;;  %v1093_v37 = vmul.f32 0.70710677, %v1031_v24  ;;  %v2889_v53 = vpop.f32.mrb[26].mxu0 }
 0x24f   :  { %v4556_v17 = vadd.f32 %v1133_v32, %v4504_v5  ;;  %v1119_v15 = vadd.f32 1.0, %v3414_v7  ;;  %3423 = verf.f32 %v1094_v22  ;;  %v1046_v28 = vadd.f32 %v2889_v53, %v4471_v4  ;;  %v1040_v33 = vpop.f32.mrb[27].mxu0  ;;  %v1591_v46 = vpop.permute.xlu1 %1590 }
 0x250   :  { %v1182_v44 = vmul.f32 0.70710677, %v4553_v10  ;;  %v1136_v45 = vmul.f32 %v1120_v49, %v1072_v11  ;;  %3425 = verf.f32 %v1093_v37  ;;  %v1041_v1 = vadd.f32 %v1040_v33, %v4473_v52  ;;  %v5121_v37 = vld [vmem:[#allocation20_spill] sm:$0xff]  ;;  %v5122_v33 = vld [vmem:[#allocation13_spill] sm:$0xff] }
 0x251   :  { %v3416_v62 = vpop.eup %3415  ;;  %v1135_v9 = vmul.f32 %v1119_v15, %v1071_v19  ;;  %v1096_v16 = vmul.f32 0.70710677, %v1046_v28  ;;  %v1181_v5 = vmul.f32 0.70710677, %v4556_v17  ;;  %v1077_v4 = vmul.f32 0.5, %v1031_v24 }
 0x252   :  { %v3418_v50 = vpop.eup %3417  ;;  %v4563_v31 = vadd.f32 %v1136_v45, %v4506_v12  ;;  %v1122_v57 = vadd.f32 1.0, %v3416_v62  ;;  %v2892_v35 = vpop.f32.mrb[28].mxu0  ;;  %3427 = verf.f32 %v1182_v44  ;;  %v1095_v52 = vmul.f32 0.70710677, %v1041_v1 }
 0x253   :  { %v4566_v41 = vadd.f32 %v1135_v9, %v4509_v61  ;;  %v1121_v14 = vadd.f32 1.0, %v3418_v50  ;;  %v1050_v20 = vpop.f32.mrb[29].mxu0  ;;  %3429 = verf.f32 %v1096_v16  ;;  %v1056_v18 = vadd.f32 %v2892_v35, %v5119_v34 }
 0x254   :  { %v1184_v26 = vmul.f32 0.70710677, %v4563_v31  ;;  %v1138_v63 = vmul.f32 %v1122_v57, %v1074_v54  ;;  %v4570_v12 = vmul.f32 0.5, %v1046_v28  ;;  %3431 = verf.f32 %v1095_v52 }
 0x255   :  { %v3420_v36 = vpop.eup %3419  ;;  %v1137_v42 = vmul.f32 %v1121_v14, %v1073_v27  ;;  %v1051_v39 = vadd.f32 %v1050_v20, %v5120_v38  ;;  %v1183_v61 = vmul.f32 0.70710677, %v4566_v41  ;;  %v4577_v3 = vmul.f32 0.5, %v1041_v1 }
 0x256   :  { %v3422_v25 = vpop.eup %3421  ;;  %v4575_v0 = vadd.f32 %v1138_v63, %v4511_v58  ;;  %v1124_v11 = vadd.f32 1.0, %v3420_v36  ;;  %v2895_v51 = vpop.f32.mrb[30].mxu0  ;;  %3433 = verf.f32 %v1181_v5  ;;  %v1098_v60 = vmul.f32 0.70710677, %v1056_v18 }
 0x257   :  { %v4580_v19 = vadd.f32 %v1137_v42, %v4513_v29  ;;  %v1123_v24 = vadd.f32 1.0, %v3422_v25  ;;  %v1060_v32 = vpop.f32.mrb[31].mxu0  ;;  %3435 = verf.f32 %v1184_v26  ;;  %v1097_v22 = vmul.f32 0.70710677, %v1051_v39 }
 0x258   :  { %v1186_v54 = vmul.f32 0.70710677, %v4575_v0  ;;  %v1140_v27 = vmul.f32 %v1124_v11, %v1076_v48  ;;  %3437 = verf.f32 %v1098_v60  ;;  %v1066_v53 = vadd.f32 %v2895_v51, %v5121_v37 }
 0x259   :  { %v3424_v7 = vpop.eup %3423  ;;  %v1185_v58 = vmul.f32 0.70710677, %v4580_v19  ;;  %v1139_v49 = vmul.f32 %v1123_v24, %v1075_v6  ;;  %3439 = verf.f32 %v1183_v61  ;;  %v1061_v44 = vadd.f32 %v1060_v32, %v5122_v33  ;;  %v1599_v6 = vpop.permute.xlu0 %1598 }
 0x25a   :  { %v3426_v15 = vpop.eup %3425  ;;  %v4586_v29 = vadd.f32 %v1140_v27, %v4527_v8  ;;  %v1126_v28 = vadd.f32 1.0, %v3424_v7  ;;  %v2986_v45 = vpop.f32.mrb[32].mxu0  ;;  %3441 = verf.f32 %v1186_v54  ;;  %v1082_v62 = vmul.f32 0.5, %v1056_v18 }
 0x25b   :  { %v4590_v48 = vadd.f32 %v1139_v49, %v4529_v47  ;;  %v1125_v1 = vadd.f32 1.0, %v3426_v15  ;;  %v1715_v9 = vpop.f32.mrb[33].mxu0  ;;  %3443 = verf.f32 %v1097_v22  ;;  %v1100_v5 = vmul.f32 0.70710677, %v1066_v53  ;;  %v1595_v8 = vpop.permute.xlu1 %1594 }
 0x25c   :  { %v1188_v16 = vmul.f32 0.70710677, %v4586_v29  ;;  %v1142_v50 = vmul.f32 %v1126_v28, %v1078_v13  ;;  %v4593_v57 = vpop.eup %3427  ;;  %3445 = verf.f32 %v1185_v58  ;;  %v4595_v14 = vmul.f32 0.5, %v1051_v39 }
 0x25d   :  { %v1141_v35 = vmul.f32 %v1125_v1, %v1077_v4  ;;  %v1099_v52 = vmul.f32 0.70710677, %v1061_v44  ;;  %v3430_v20 = vpop.eup %3429  ;;  %v1187_v47 = vmul.f32 0.70710677, %v4590_v48  ;;  %v1721_v63 = vadd.f32 %v2986_v45, %v1591_v46 }
 0x25e   :  { %v4599_v26 = vadd.f32 %v1142_v50, %v4531_v40  ;;  %v1716_v34 = vadd.f32 %v1715_v9, %v1587_v43  ;;  %v2989_v18 = vpop.f32.mrb[34].mxu0  ;;  %v3432_v13 = vpop.eup %3431  ;;  %3447 = verf.f32 %v1188_v16  ;;  %v1128_v42 = vadd.f32 1.0, %v3430_v20 }
 0x25f   :  { %v4602_v36 = vadd.f32 %v1141_v35, %v4533_v59  ;;  %v1731_v38 = vadd.f32 %v2989_v18, %v1599_v6  ;;  %v1725_v4 = vpop.f32.mrb[35].mxu0  ;;  %v1127_v25 = vadd.f32 1.0, %v3432_v13  ;;  %v4605_v61 = vmul.f32 0.5, %v1066_v53  ;;  %v1607_v59 = vpop.permute.xlu0 %1606 }
 0x260   :  { %v1190_v39 = vmul.f32 0.70710677, %v4599_v26  ;;  %3449 = verf.f32 %v1100_v5  ;;  %v3434_v11 = vpop.eup %3433  ;;  %v1144_v40 = vmul.f32 %v1128_v42, %v4570_v12  ;;  %v4608_v51 = vmul.f32 0.5, %v1061_v44  ;;  %v1603_v22 = vpop.permute.xlu1 %1602 }
 0x261   :  { %3451 = verf.f32 %v1099_v52  ;;  %v1811_v43 = vmul.f32 0.70710677, %v1721_v63  ;;  %v4610_v46 = vpop.eup %3435  ;;  %v1143_v24 = vmul.f32 %v1127_v25, %v4577_v3  ;;  %v4613_v60 = vmul.f32 0.5, %v1721_v63 }
 0x262   :  { %3453 = verf.f32 %v1187_v47  ;;  %v1810_v32 = vmul.f32 0.70710677, %v1716_v34  ;;  %v2992_v54 = vpop.f32.mrb[36].mxu0  ;;  %v3438_v27 = vpop.eup %3437  ;;  %v1189_v7 = vmul.f32 0.70710677, %v4602_v36  ;;  %v4617_v12 = vadd.f32 %v1144_v40, %v4535_v2 }
 0x263   :  { %3455 = verf.f32 %v1190_v39  ;;  %v1813_v58 = vmul.f32 0.70710677, %v1731_v38  ;;  %v1735_v49 = vpop.f32.mrb[37].mxu0  ;;  %v4619_v37 = vpop.eup %3439  ;;  %v4622_v53 = vadd.f32 %v1143_v24, %v4538_v23  ;;  %v1130_v3 = vadd.f32 1.0, %v3438_v27 }
 0x264   :  { %3457 = verf.f32 %v1811_v43  ;;  %v1726_v15 = vadd.f32 %v1725_v4, %v1595_v8  ;;  %v4624_v28 = vpop.eup %3441  ;;  %v1192_v33 = vmul.f32 0.70710677, %v4617_v12  ;;  %v1741_v44 = vadd.f32 %v2992_v54, %v1607_v59  ;;  %v1615_v52 = vpop.permute.xlu0 %1614 }
 0x265   :  { %3459 = verf.f32 %v1810_v32  ;;  %v1736_v45 = vadd.f32 %v1735_v49, %v1603_v22  ;;  %v3444_v1 = vpop.eup %3443  ;;  %v1146_v2 = vmul.f32 %v1130_v3, %v1082_v62  ;;  %v4627_v9 = vmul.f32 0.5, %v1716_v34  ;;  %v1611_v34 = vpop.permute.xlu1 %1610 }
 0x266   :  { %v4629_v6 = vmul.f32 0.5, %v1731_v38  ;;  %3461 = verf.f32 %v1813_v58  ;;  %v2995_v16 = vpop.f32.mrb[38].mxu0  ;;  %v4631_v23 = vpop.eup %3445  ;;  %v1191_v50 = vmul.f32 0.70710677, %v4622_v53  ;;  %v1129_v5 = vadd.f32 1.0, %v3444_v1 }
 0x267   :  { %3463 = verf.f32 %v1189_v7  ;;  %v1812_v8 = vmul.f32 0.70710677, %v1726_v15  ;;  %v1745_v35 = vpop.f32.mrb[39].mxu0  ;;  %v4635_v20 = vadd.f32 %v1146_v2, %v4540_v21  ;;  %v4637_v62 = vmul.f32 0.5, %v1726_v15 }
 0x268   :  { %3465 = verf.f32 %v1192_v33  ;;  %v1815_v47 = vmul.f32 0.70710677, %v1741_v44  ;;  %v4639_v63 = vpop.eup %3447  ;;  %v1145_v18 = vmul.f32 %v1129_v5, %v4595_v14  ;;  %v1814_v13 = vmul.f32 0.70710677, %v1736_v45  ;;  %v1623_v49 = vpop.permute.xlu0 %1622 }
 0x269   :  { %3467 = verf.f32 %v1812_v8  ;;  %v1165_v42 = vmul.f32 0.5, %v4556_v17  ;;  %v1194_v4 = vmul.f32 0.70710677, %v4635_v20  ;;  %v1166_v39 = vmul.f32 0.5, %v4553_v10  ;;  %v1619_v2 = vpop.permute.xlu1 %1618 }
 0x26a   :  { %v3450_v38 = vpop.eup %3449  ;;  %3469 = verf.f32 %v1815_v47  ;;  %v1213_v21 = vadd.f32 1.0, %v3434_v11  ;;  %v2998_v25 = vpop.f32.mrb[40].mxu0  ;;  %v4646_v43 = vadd.f32 %v1145_v18, %v4543_v30  ;;  %v1214_v14 = vadd.f32 1.0, %v4593_v57 }
 0x26b   :  { %v3452_v40 = vpop.eup %3451  ;;  %v1132_v59 = vadd.f32 1.0, %v3450_v38  ;;  %3471 = verf.f32 %v1814_v13  ;;  %v1755_v24 = vpop.f32.mrb[41].mxu0  ;;  %v4651_v54 = vmul.f32 0.5, %v1741_v44  ;;  %v1751_v22 = vadd.f32 %v2995_v16, %v1615_v52 }
 0x26c   :  { %v4649_v32 = vpop.eup %3453  ;;  %v1131_v17 = vadd.f32 1.0, %v3452_v40  ;;  %v1229_v27 = vmul.f32 %v1213_v21, %v1165_v42  ;;  %3473 = verf.f32 %v1191_v50  ;;  %v1230_v11 = vmul.f32 %v1214_v14, %v1166_v39 }
 0x26d   :  { %v4653_v7 = vpop.eup %3455  ;;  %v1148_v10 = vmul.f32 %v1132_v59, %v4605_v61  ;;  %v1746_v30 = vadd.f32 %v1745_v35, %v1611_v34  ;;  %v1193_v3 = vmul.f32 0.70710677, %v4646_v43  ;;  %v4658_v15 = vmul.f32 0.5, %v1736_v45 }
 0x26e   :  { %v3458_v58 = vpop.eup %3457  ;;  %v1147_v57 = vmul.f32 %v1131_v17, %v4608_v51  ;;  %v1817_v33 = vmul.f32 0.70710677, %v1751_v22  ;;  %v4660_v44 = vpop.f32.mrb[42].mxu0  ;;  %3475 = verf.f32 %v1194_v4  ;;  %v3216_v50 = vpack.c.bf16 %v1230_v11, %v1229_v27 }
 0x26f   :  { %v3460_v1 = vpop.eup %3459  ;;  %v4663_v16 = vadd.f32 %v1148_v10, %v4545_v56  ;;  %v1843_v61 = vadd.f32 1.0, %v3458_v58  ;;  %v1765_v5 = vpop.f32.mrb[43].mxu0  ;;  %v4668_v52 = vmul.f32 0.5, %v1751_v22  ;;  %v1167_v51 = vmul.f32 0.5, %v4566_v41 }
 0x270   :  { %v3462_v8 = vpop.eup %3461  ;;  %v4666_v35 = vadd.f32 %v1147_v57, %v4547_v55  ;;  %3477 = verf.f32 %v1817_v33  ;;  %v1842_v34 = vadd.f32 1.0, %v3460_v1  ;;  %3217 = vmatprep.subr.bf16.mxu1 %v3216_v50  ;;  %v1816_v56 = vmul.f32 0.70710677, %v1746_v30  ;;  %v1631_v27 = vpop.permute.xlu0 %1630 }
 0x271   :  { %v4671_v45 = vpop.eup %3463  ;;  %v1196_v47 = vmul.f32 0.70710677, %v4663_v16  ;;  %v1845_v18 = vadd.f32 1.0, %v3462_v8  ;;  %3479 = verf.f32 %v1193_v3  ;;  %3219 = vmatpush3.bf16.msra.mxu1 %v3216_v50  ;;  %v4677_v55 = vmul.f32 0.5, %v1746_v30  ;;  %v1627_v58 = vpop.permute.xlu1 %1626 }
 0x272   :  { %v4674_v13 = vpop.eup %3465  ;;  %v1195_v42 = vmul.f32 0.70710677, %v4666_v35  ;;  %v1215_v38 = vadd.f32 1.0, %v4619_v37  ;;  %v3004_v4 = vpop.f32.mrb[44].mxu0  ;;  %v4681_v39 = vmul.f32 %v1843_v61, %v4613_v60  ;;  %v1168_v21 = vmul.f32 0.5, %v4563_v31 }
 0x273   :  { %v3468_v41 = vpop.eup %3467  ;;  %v1216_v40 = vadd.f32 1.0, %v4610_v46  ;;  %v1761_v59 = vadd.f32 %v2998_v25, %v1623_v49  ;;  %v1775_v14 = vpop.f32.mrb[45].mxu0  ;;  %3481 = verf.f32 %v1196_v47  ;;  %v1756_v11 = vadd.f32 %v1755_v24, %v1619_v2 }
 0x274   :  { %v3470_v17 = vpop.eup %3469  ;;  %v1844_v22 = vadd.f32 1.0, %v3468_v41  ;;  %v1231_v10 = vmul.f32 %v1215_v38, %v1167_v51  ;;  %v4686_v37 = vmul.f32 %v1842_v34, %v4627_v9  ;;  %v4689_v60 = vmul.f32 %v1845_v18, %v4629_v6  ;;  %v1639_v18 = vpop.permute.xlu0 %1638 }
 0x275   :  { %v3472_v30 = vpop.eup %3471  ;;  %3483 = verf.f32 %v1816_v56  ;;  %v1232_v31 = vmul.f32 %v1216_v40, %v1168_v21  ;;  %v1847_v46 = vadd.f32 1.0, %v3470_v17  ;;  %v4691_v25 = vmul.f32 0.5, %v1761_v59  ;;  %v1635_v38 = vpop.permute.xlu1 %1634 }
 0x276   :  { %3485 = verf.f32 %v1195_v42  ;;  %v1819_v49 = vmul.f32 0.70710677, %v1761_v59  ;;  %v3007_v3 = vpop.f32.mrb[46].mxu0  ;;  %v4693_v57 = vpop.eup %3473  ;;  %v4696_v24 = vmul.f32 %v1844_v22, %v4637_v62  ;;  %v1846_v33 = vadd.f32 1.0, %v3472_v30 }
 0x277   :  { %v3220_v1 = vpack.c.bf16 %v1232_v31, %v1231_v10  ;;  %v1818_v9 = vmul.f32 0.70710677, %v1756_v11  ;;  %v1785_v2 = vpop.f32.mrb[47].mxu0  ;;  %v1169_v6 = vmul.f32 0.5, %v4580_v19  ;;  %v1170_v61 = vmul.f32 0.5, %v4575_v0 }
 0x278   :  { %3487 = verf.f32 %v1819_v49  ;;  %v1217_v50 = vadd.f32 1.0, %v4631_v23  ;;  %v4701_v8 = vpop.eup %3475  ;;  %v1218_v51 = vadd.f32 1.0, %v4624_v28  ;;  %v1771_v62 = vadd.f32 %v4660_v44, %v1631_v27 }
 0x279   :  { %3221 = vmatprep.subr.bf16.mxu1 %v3220_v1  ;;  %3489 = verf.f32 %v1818_v9  ;;  %v1766_v47 = vadd.f32 %v1765_v5, %v1627_v58  ;;  %v1802_v56 = vmul.f32 0.5, %v1756_v11  ;;  %v1171_v19 = vmul.f32 0.5, %v4590_v48  ;;  %v1643_v9 = vpop.permute.xlu1 %1642 }
 0x27a   :  { %v3478_v34 = vpop.eup %3477  ;;  %3223 = vmatpush3.bf16.msra.mxu1 %v3220_v1  ;;  %v1233_v42 = vmul.f32 %v1217_v50, %v1169_v6  ;;  %v1219_v0 = vadd.f32 1.0, %v4649_v32  ;;  %v4708_v23 = vmul.f32 %v1847_v46, %v4651_v54  ;;  %v4711_v41 = vmul.f32 %v1846_v33, %v4658_v15  ;;  %v1647_v46 = vpop.permute.xlu0 %1646 }
 0x27b   :  { %v1234_v28 = vmul.f32 %v1218_v51, %v1170_v61  ;;  %v1821_v21 = vmul.f32 0.70710677, %v1771_v62  ;;  %v3480_v44 = vpop.eup %3479  ;;  %v1820_v5 = vmul.f32 0.70710677, %v1766_v47  ;;  %v1172_v40 = vmul.f32 0.5, %v4586_v29 }
 0x27c   :  { %v1220_v59 = vadd.f32 1.0, %v4639_v63  ;;  %v1235_v17 = vmul.f32 %v1219_v0, %v1171_v19  ;;  %v1849_v27 = vadd.f32 1.0, %v3478_v34  ;;  %v1781_v32 = vadd.f32 %v3004_v4, %v1639_v18 }
 0x27d   :  { %v3224_v48 = vpack.c.bf16 %v1234_v28, %v1233_v42  ;;  %3491 = verf.f32 %v1821_v21  ;;  %v4715_v22 = vpop.eup %3481  ;;  %v1805_v54 = vmul.f32 0.5, %v1771_v62  ;;  %v4717_v15 = vadd.f32 %v1775_v14, %v1635_v38 }
 0x27e   :  { %3493 = verf.f32 %v1820_v5  ;;  %v1236_v10 = vmul.f32 %v1220_v59, %v1172_v40  ;;  %v1804_v30 = vmul.f32 0.5, %v1766_v47  ;;  %v1823_v58 = vmul.f32 0.70710677, %v1781_v32 }
 0x27f   :  { %v3484_v11 = vpop.eup %3483  ;;  %3225 = vmatprep.subr.bf16.mxu1 %v3224_v48  ;;  %v1173_v29 = vmul.f32 0.5, %v4602_v36  ;;  %v1221_v63 = vadd.f32 1.0, %v4671_v45  ;;  %v1822_v33 = vmul.f32 0.70710677, %v4717_v15  ;;  %v1174_v1 = vmul.f32 0.5, %v4599_v26 }
 0x280   :  { %v3486_v31 = vpop.eup %3485  ;;  %v1848_v49 = vadd.f32 1.0, %v3484_v11  ;;  %3227 = vmatpush3.bf16.msra.mxu1 %v3224_v48  ;;  %v3228_v4 = vpack.c.bf16 %v1236_v10, %v1235_v17  ;;  %3495 = verf.f32 %v1823_v58  ;;  %v1222_v14 = vadd.f32 1.0, %v4653_v7 }
 0x281   :  { %v1237_v6 = vmul.f32 %v1221_v63, %v1173_v29  ;;  %v4724_v61 = vadd.f32 %v3007_v3, %v1647_v46  ;;  %v1865_v36 = vmul.f32 %v1849_v27, %v4668_v52  ;;  %v1807_v45 = vmul.f32 0.5, %v1781_v32 }
 0x282   :  { %v3488_v50 = vpop.eup %3487  ;;  %3229 = vmatprep.subr.bf16.mxu1 %v3228_v4  ;;  %3497 = verf.f32 %v1822_v33  ;;  %v1786_v51 = vadd.f32 %v1785_v2, %v1643_v9  ;;  %v1864_v47 = vmul.f32 %v1848_v49, %v4677_v55  ;;  %v1238_v18 = vmul.f32 %v1222_v14, %v1174_v1 }
 0x283   :  { %v3490_v62 = vpop.eup %3489  ;;  %v1851_v34 = vadd.f32 1.0, %v3488_v50  ;;  %v1825_v26 = vmul.f32 0.70710677, %v4724_v61  ;;  %v1175_v3 = vmul.f32 0.5, %v4622_v53  ;;  %v1176_v19 = vmul.f32 0.5, %v4617_v12  ;;  %v2473_v50 = vld [vmem:[%s5066_s3 + $0x88] sm:$0xff] }
 0x284   :  { %v1850_v42 = vadd.f32 1.0, %v3490_v62  ;;  %3231 = vmatpush3.bf16.msra.mxu1 %v3228_v4  ;;  %v1824_v7 = vmul.f32 0.70710677, %v1786_v51  ;;  %v3232_v0 = vpack.c.bf16 %v1238_v18, %v1237_v6  ;;  %v1223_v2 = vadd.f32 1.0, %v4693_v57  ;;  %v2477_v62 = vld [vmem:[%s5066_s3 + $0xa8] sm:$0xff]  ;;  %v2480_v18 = vld [vmem:[%s5066_s3 + $0xc0] sm:$0xff] }
 0x285   :  { %v1867_v52 = vmul.f32 %v1851_v34, %v4691_v25  ;;  %3499 = verf.f32 %v1825_v26  ;;  %v1224_v55 = vadd.f32 1.0, %v4674_v13  ;;  %v1177_v28 = vmul.f32 0.5, %v4646_v43  ;;  %v2479_v34 = vld [vmem:[%s5066_s3 + $0xb8] sm:$0xff]  ;;  %v2481_v26 = vld [vmem:[%s5066_s3 + $0xc8] sm:$0xff] }
 0x286   :  { %v1866_v38 = vmul.f32 %v1850_v42, %v1802_v56  ;;  %3501 = verf.f32 %v1824_v7  ;;  %3233 = vmatprep.subr.bf16.mxu1 %v3232_v0  ;;  %v1239_v5 = vmul.f32 %v1223_v2, %v1175_v3  ;;  %v1178_v40 = vmul.f32 0.5, %v4635_v20  ;;  %v2482_v42 = vld [vmem:[%s5066_s3 + $0xd0] sm:$0xff]  ;;  %v2483_v7 = vld [vmem:[%s5066_s3 + $0xd8] sm:$0xff]  ;;  %v2484_v3 = vld [vmem:[%s5066_s3 + $0xe0] sm:$0xff] }
 0x287   :  { %v3492_v21 = vpop.eup %3491  ;;  %v1225_v53 = vadd.f32 1.0, %v3480_v44  ;;  %v1226_v12 = vadd.f32 1.0, %v4701_v8  ;;  %v1240_v17 = vmul.f32 %v1224_v55, %v1176_v19  ;;  %v1179_v57 = vmul.f32 0.5, %v4666_v35  ;;  %v2485_v19 = vld [vmem:[%s5066_s3 + $0xe8] sm:$0xff]  ;;  %v1569_v2 = vld [vmem:[#allocation7 + $0x80] sm:$0xff]  ;;  %v1571_v55 = vld [vmem:[#allocation7 + $0x90] sm:$0xff] }
 0x288   :  { %v3494_v59 = vpop.eup %3493  ;;  %v1853_v25 = vadd.f32 1.0, %v3492_v21  ;;  %3235 = vmatpush3.bf16.msra.mxu1 %v3232_v0  ;;  %v1180_v56 = vmul.f32 0.5, %v4663_v16  ;;  %v1227_v43 = vadd.f32 1.0, %v3486_v31  ;;  %v1228_v11 = vadd.f32 1.0, %v4715_v22  ;;  %v2487_v0 = vld [vmem:[%s5066_s3 + $0xf8] sm:$0xff]  ;;  %v1573_v21 = vld [vmem:[#allocation7 + $0xa0] sm:$0xff] }
 0x289   :  { %v1852_v27 = vadd.f32 1.0, %v3494_v59  ;;  %v1241_v13 = vmul.f32 %v1225_v53, %v1177_v28  ;;  %v1242_v48 = vmul.f32 %v1226_v12, %v1178_v40  ;;  %v3236_v10 = vpack.c.bf16 %v1240_v17, %v1239_v5  ;;  %v1572_v28 = vld [vmem:[#allocation7 + $0x98] sm:$0xff]  ;;  %v1574_v5 = vld [vmem:[#allocation7 + $0xa8] sm:$0xff]  ;;  %v1575_v40 = vld [vmem:[#allocation7 + $0xb0] sm:$0xff] }
 0x28a   :  { %v1869_v32 = vmul.f32 %v1853_v25, %v1805_v54  ;;  %v3280_v20 = vpack.c.bf16 %v4681_v39, %v4686_v37  ;;  %v3496_v8 = vpop.eup %3495  ;;  %v1243_v29 = vmul.f32 %v1227_v43, %v1179_v57  ;;  %v3284_v35 = vpack.c.bf16 %v4689_v60, %v4696_v24  ;;  %v1576_v53 = vld [vmem:[#allocation7 + $0xb8] sm:$0xff]  ;;  %v1577_v12 = vld [vmem:[#allocation7 + $0xc0] sm:$0xff]  ;;  %v1578_v59 = vld [vmem:[#allocation7 + $0xc8] sm:$0xff]  ;;  %v4793_v43 = vpop.permute.xlu1 %1875 }
 0x28b   :  { %v1868_v44 = vmul.f32 %v1852_v27, %v1804_v30  ;;  %v3240_v58 = vpack.c.bf16 %v1242_v48, %v1241_v13  ;;  %v1855_v16 = vadd.f32 1.0, %v3496_v8  ;;  %3237 = vmatprep.subr.bf16.mxu1 %v3236_v10  ;;  %v1244_v46 = vmul.f32 %v1228_v11, %v1180_v56  ;;  %v1579_v25 = vld [vmem:[#allocation7 + $0xd0] sm:$0xff]  ;;  %v1580_v17 = vld [vmem:[#allocation7 + $0xd8] sm:$0xff]  ;;  %v1581_v57 = vld [vmem:[#allocation7 + $0xe0] sm:$0xff]  ;;  %v1880_v48 = vpop.permute.xlu0 %1879 }
 0x28c   :  { %v3498_v63 = vpop.eup %3497  ;;  %v3288_v54 = vpack.c.bf16 %v4708_v23, %v4711_v41  ;;  %v3292_v31 = vpack.c.bf16 %v1865_v36, %v1864_v47  ;;  %v1806_v22 = vmul.f32 0.5, %v4717_v15  ;;  %3239 = vmatpush3.bf16.msra.mxu1 %v3236_v10  ;;  %v3296_v39 = vpack.c.bf16 %v1867_v52, %v1866_v38  ;;  %v2478_v47 = vld [vmem:[%s5066_s3 + $0xb0] sm:$0xff]  ;;  %v1570_v38 = vld [vmem:[#allocation7 + $0x88] sm:$0xff]  ;;  %v1584_v13 = vld [vmem:[#allocation7 + $0xf8] sm:$0xff] }
 0x28d   :  { %v1854_v49 = vadd.f32 1.0, %v3498_v63  ;;  %v3300_v37 = vpack.c.bf16 %v1869_v32, %v1868_v44  ;;  %v1871_v30 = vmul.f32 %v1855_v16, %v1807_v45  ;;  %3241 = vmatprep.subr.bf16.mxu1 %v3240_v58  ;;  %v3244_v4 = vpack.c.bf16 %v1244_v46, %v1243_v29  ;;  %v2474_v45 = vld [vmem:[%s5066_s3 + $0x90] sm:$0xff]  ;;  %v1582_v56 = vld [vmem:[#allocation7 + $0xe8] sm:$0xff] }
 0x28e   :  { %v1809_v24 = vmul.f32 0.5, %v4724_v61  ;;  %v1808_v14 = vmul.f32 0.5, %v1786_v51  ;;  %v2475_v61 = vld [vmem:[%s5066_s3 + $0x98] sm:$0xff]  ;;  %v2476_v51 = vld [vmem:[%s5066_s3 + $0xa0] sm:$0xff]  ;;  %v2486_v52 = vld [vmem:[%s5066_s3 + $0xf0] sm:$0xff]  ;;  %v4797_v10 = vpop.permute.xlu1 %1883 }
 0x28f   :  { %v3500_v33 = vpop.eup %3499  ;;  %v1870_v1 = vmul.f32 %v1854_v49, %v1806_v22  ;;  %v1583_v27 = vld [vmem:[#allocation7 + $0xf0] sm:$0xff]  ;;  %v4795_v32 = vpop.permute.xlu0 %1887 }
 0x290   :  { %v3502_v60 = vpop.eup %3501  ;;  %v1857_v9 = vadd.f32 1.0, %v3500_v33  ;;  %3243 = vmatpush3.bf16.msra.mxu1 %v3240_v58 }
 0x291   :  { %v1856_v6 = vadd.f32 1.0, %v3502_v60  ;;  %v3304_v23 = vpack.c.bf16 %v1871_v30, %v1870_v1  ;;  %3245 = vmatprep.subr.bf16.mxu1 %v3244_v4  ;;  %v2488_v30 = vld [vmem:[%s5066_s3 + $0x100] sm:$0xff] }
 0x292   :  { %v1873_v41 = vmul.f32 %v1857_v9, %v1809_v24  ;;  %3096 = vmatprep.mubr.f32.mxu0 %v2488_v30 }
 0x293   :  { %v1872_v15 = vmul.f32 %v1856_v6, %v1808_v14  ;;  %v4799_v11 = vpop.permute.xlu0 %1895 }
 0x294   :  { %3247 = vmatpush3.bf16.msra.mxu1 %v3244_v4  ;;  %v2496_v4 = vld [vmem:[%s5066_s3 + $0x140] sm:$0xff] }
 0x295   :  { %v3308_v36 = vpack.c.bf16 %v1873_v41, %v1872_v15  ;;  %3281 = vmatprep.subr.bf16.mxu1 %v3280_v20  ;;  %v3567_v15 = vld [vmem:[%s5067_s4] sm:$0xff]  ;;  %s2462_s4 = sshll.u32 %s3670_s6, 4  ;;  %s2463_s4 = int_to_ptr.vmem [resolvable:$true] %s2462_s4 }
 0x296   :  { %s3634_s23 = scalar_lea.vmem %s2463_s4, 128  ;;  %p3639_p11 = scmp.lt.s32.totalorder %s2463_s4, %s2463_s4 }
 0x297   :  { %2929 = vmatmul.mubr.f32.vlgmr.msra.gmra.mrb[16].mxu1 %v2473_v50  ;;  %v4803_v8 = vpop.permute.xlu0 %1903  ;;  %p3635_p10 = scmp.ne.s32.totalorder %s2463_s4, %s3634_s23  ;;  %p3640_p12 = scmp.lt.s32.totalorder %s3634_s23, %s3634_s23 }
 0x298   :  { %3283 = vmatpush3.bf16.msra.mxu1 %v3280_v20  ;;  %2931 = vmatprep.mubr.f32.mxu1 %v2474_v45  ;;  %v4801_v20 = vpop.permute.xlu1 %1891 }
 0x299   :  { %3285 = vmatprep.subr.bf16.mxu1 %v3284_v35  ;;  %p3641_p13 = por %p3640_p12, %p3639_p11 }
 0x29b   :  { %2932 = vmatmul.mubr.f32.gmra.mrb[18].mxu1 %v2475_v61  ;;  %v1268_v58 = vpop.permute.xlu0 %1267  ;;  %p3642_p0 = pnand %p3641_p13, %p3635_p10 }
 0x29c   :  { %3287 = vmatpush3.bf16.msra.mxu1 %v3284_v35  ;;  %2934 = vmatprep.mubr.f32.mxu1 %v2476_v51  ;;  %v4805_v44 = vpop.permute.xlu1 %1899 }
 0x29d   :  { %3289 = vmatprep.subr.bf16.mxu1 %v3288_v54 }
 0x29f   :  { %2935 = vmatmul.mubr.f32.gmra.mrb[20].mxu1 %v2477_v62  ;;  %v4807_v35 = vpop.permute.xlu0 %1911 }
 0x2a0   :  { %3291 = vmatpush3.bf16.msra.mxu1 %v3288_v54  ;;  %2937 = vmatprep.mubr.f32.mxu1 %v2478_v47  ;;  %v1264_v29 = vpop.permute.xlu1 %1263 }
 0x2a1   :  { %3293 = vmatprep.subr.bf16.mxu1 %v3292_v31 }
 0x2a3   :  { %2938 = vmatmul.mubr.f32.gmra.mrb[22].mxu1 %v2479_v34  ;;  %v4811_v16 = vpop.permute.xlu0 %1476 }
 0x2a4   :  { %3295 = vmatpush3.bf16.msra.mxu1 %v3292_v31  ;;  %2940 = vmatprep.mubr.f32.mxu1 %v2480_v18  ;;  %v4809_v63 = vpop.permute.xlu1 %1907 }
 0x2a5   :  { %3297 = vmatprep.subr.bf16.mxu1 %v3296_v39 }
 0x2a7   :  { %2941 = vmatmul.mubr.f32.gmra.mrb[24].mxu1 %v2481_v26  ;;  %v4815_v54 = vpop.permute.xlu0 %1275 }
 0x2a8   :  { %3299 = vmatpush3.bf16.msra.mxu1 %v3296_v39  ;;  %2943 = vmatprep.mubr.f32.mxu1 %v2482_v42  ;;  %v4813_v46 = vpop.permute.xlu1 %1472 }
 0x2a9   :  { %3301 = vmatprep.subr.bf16.mxu1 %v3300_v37 }
 0x2ab   :  { %2944 = vmatmul.mubr.f32.gmra.mrb[26].mxu1 %v2483_v7  ;;  %v4819_v22 = vpop.permute.xlu0 %1919 }
 0x2ac   :  { %3303 = vmatpush3.bf16.msra.mxu1 %v3300_v37  ;;  %2946 = vmatprep.mubr.f32.mxu1 %v2484_v3  ;;  %v4817_v31 = vpop.permute.xlu1 %1271 }
 0x2ad   :  { %3305 = vmatprep.subr.bf16.mxu1 %v3304_v23 }
 0x2af   :  { %2947 = vmatmul.mubr.f32.gmra.mrb[28].mxu1 %v2485_v19  ;;  %v4823_v39 = vpop.permute.xlu0 %1484 }
 0x2b0   :  { %3307 = vmatpush3.bf16.msra.mxu1 %v3304_v23  ;;  %2949 = vmatprep.mubr.f32.mxu1 %v2486_v52  ;;  %v4821_v49 = vpop.permute.xlu1 %1915  ;;  %v3669_v23 = vmov 2  }
 0x2b1   :  { %3309 = vmatprep.subr.bf16.mxu1 %v3308_v36  ;;  %3373 = vset.pattern.permute.xlu1 %v3669_v23 }
 0x2b2   :  { %3374 = vset.pattern.permute.xlu0 %v3669_v23  ;;  %2277 = vperm.xlu1 %3373, %v3567_v15  }
 0x2b3   :  { %2950 = vmatmul.mubr.f32.gmra.mrb[30].mxu1 %v2487_v0  ;;  %v1284_v33 = vpop.permute.xlu0 %1283 }
 0x2b4   :  { %3311 = vmatpush3.bf16.msra.mxu1 %v3308_v36  ;;  %3040 = vmatprep.mubr.f32.mxu1 %v1569_v2  ;;  %v4825_v37 = vpop.permute.xlu1 %1480 }
 0x2b7   :  { %3041 = vmatmul.mubr.f32.vlgmr.msra.gmra.mrb[32].mxu1 %v1570_v38  ;;  %v4833_v60 = vpop.permute.xlu0 %1927 }
 0x2b8   :  { %3043 = vmatprep.mubr.f32.mxu1 %v1571_v55  ;;  %v1280_v1 = vpop.permute.xlu1 %1279 }
 0x2bb   :  { %3044 = vmatmul.mubr.f32.gmra.mrb[34].mxu1 %v1572_v28  ;;  %v4837_v9 = vpop.permute.xlu0 %1492 }
 0x2bc   :  { %3046 = vmatprep.mubr.f32.mxu1 %v1573_v21  ;;  %v4835_v24 = vpop.permute.xlu1 %1923 }
 0x2bf   :  { %3047 = vmatmul.mubr.f32.gmra.mrb[36].mxu1 %v1574_v5  ;;  %v1292_v36 = vpop.permute.xlu0 %1291 }
 0x2c0   :  { %3049 = vmatprep.mubr.f32.mxu1 %v1575_v40  ;;  %v4839_v14 = vpop.permute.xlu1 %1488 }
 0x2c3   :  { %3050 = vmatmul.mubr.f32.gmra.mrb[38].mxu1 %v1576_v53  ;;  %v4844_v47 = vpop.permute.xlu0 %1935 }
 0x2c4   :  { %3052 = vmatprep.mubr.f32.mxu1 %v1577_v12  ;;  %v1288_v61 = vpop.permute.xlu1 %1287 }
 0x2c7   :  { %3053 = vmatmul.mubr.f32.gmra.mrb[40].mxu1 %v1578_v59  ;;  %v1501_v7 = vpop.permute.xlu0 %1500 }
 0x2c8   :  { %3055 = vmatprep.mubr.f32.mxu1 %v1579_v25  ;;  %v4846_v34 = vpop.permute.xlu1 %1931 }
 0x2cb   :  { %3056 = vmatmul.mubr.f32.gmra.mrb[42].mxu1 %v1580_v17  ;;  %v1300_v2 = vpop.permute.xlu0 %1299 }
 0x2cc   :  { %3058 = vmatprep.mubr.f32.mxu1 %v1581_v57  ;;  %v1497_v19 = vpop.permute.xlu1 %1496 }
 0x2cf   :  { %3059 = vmatmul.mubr.f32.gmra.mrb[44].mxu1 %v1582_v56  ;;  %v1509_v5 = vpop.permute.xlu0 %1508 }
 0x2d0   :  { %3061 = vmatprep.mubr.f32.mxu1 %v1583_v27  ;;  %v1296_v38 = vpop.permute.xlu1 %1295 }
 0x2d3   :  { %3062 = vmatmul.mubr.f32.gmra.mrb[46].mxu1 %v1584_v13  ;;  %v1308_v57 = vpop.permute.xlu0 %1307 }
 0x2d4   :  { %3108 = vmatprep.mubr.f32.mxu1 %v2496_v4  ;;  %v1505_v53 = vpop.permute.xlu1 %1504 }
 0x2d8   :  { %v1304_v13 = vpop.permute.xlu1 %1303 }
 0x36a   :  { %v2930_v6 = vpop.f32.mrb[16].mxu1 }
 0x36b   :  { %v1392_v41 = vpop.f32.mrb[17].mxu1  ;;  %v1398_v56 = vadd.f32 %v2930_v6, %v1268_v58 }
 0x36c   :  { %v1393_v30 = vadd.f32 %v1392_v41, %v1264_v29 }
 0x36e   :  { %v2933_v50 = vpop.f32.mrb[18].mxu1  ;;  %v4868_v58 = vadd.f32 %v4813_v46, %v1393_v30 }
 0x36f   :  { %v1402_v45 = vpop.f32.mrb[19].mxu1  ;;  %v1408_v29 = vadd.f32 %v2933_v50, %v4815_v54 }
 0x370   :  { %v1403_v6 = vadd.f32 %v1402_v45, %v4817_v31 }
 0x372   :  { %v2936_v51 = vpop.f32.mrb[20].mxu1 }
 0x373   :  { %v1412_v62 = vpop.f32.mrb[21].mxu1 }
 0x376   :  { %v2939_v18 = vpop.f32.mrb[22].mxu1 }
 0x377   :  { %v1422_v26 = vpop.f32.mrb[23].mxu1 }
 0x37a   :  { %v2942_v42 = vpop.f32.mrb[24].mxu1 }
 0x37b   :  { %v1432_v3 = vpop.f32.mrb[25].mxu1  ;;  %v1438_v54 = vadd.f32 %v2942_v42, %v1300_v2 }
 0x37c   :  { %v1433_v31 = vadd.f32 %v1432_v3, %v1296_v38 }
 0x37e   :  { %v2945_v52 = vpop.f32.mrb[26].mxu1 }
 0x37f   :  { %v1442_v0 = vpop.f32.mrb[27].mxu1  ;;  %v1448_v50 = vadd.f32 %v2945_v52, %v1308_v57  ;;  %v4905_v52 = vadd.f32 %v1505_v53, %v1433_v31 }
 0x382   :  { %v4848_v55 = vpop.f32.mrb[28].mxu1 }
 0x383   :  { %v4850_v28 = vpop.f32.mrb[29].mxu1 }
 0x386   :  { %v4852_v21 = vpop.f32.mrb[30].mxu1 }
 0x387   :  { %5123 = vst [vmem:[#allocation14_spill] sm:$0xff] %v4852_v21  ;;  %v4854_v40 = vpop.f32.mrb[31].mxu1 }
 0x388   :  { %5124 = vst [vmem:[#allocation15_spill] sm:$0xff] %v4854_v40 }
 0x38a   :  { %v3042_v12 = vpop.f32.mrb[32].mxu1 }
 0x38b   :  { %v2010_v59 = vadd.f32 %v3042_v12, %v1880_v48  ;;  %v2004_v25 = vpop.f32.mrb[33].mxu1  ;;  %v4864_v48 = vadd.f32 %v4811_v16, %v1398_v56  ;;  %v1517_v12 = vpop.permute.xlu0 %1516  ;;  %v1428_v56 = vadd.f32 %v2939_v18, %v1292_v36 }
 0x38c   :  { %v2005_v17 = vadd.f32 %v2004_v25, %v4793_v43  ;;  %v1418_v25 = vadd.f32 %v2936_v51, %v1284_v33  ;;  %v4881_v33 = vadd.f32 %v4823_v39, %v1408_v29 }
 0x38d   :  { %v2100_v27 = vmul.f32 0.70710677, %v2010_v59  ;;  %v4896_v39 = vadd.f32 %v1501_v7, %v1428_v56 }
 0x38e   :  { %v2099_v4 = vmul.f32 0.70710677, %v2005_v17  ;;  %v3045_v23 = vpop.f32.mrb[34].mxu1 }
 0x38f   :  { %3503 = verf.f32 %v2100_v27  ;;  %v4858_v15 = vadd.f32 %v3045_v23, %v4795_v32  ;;  %v2014_v21 = vpop.f32.mrb[35].mxu1  ;;  %v1413_v27 = vadd.f32 %v1412_v62, %v1280_v1  ;;  %v4884_v1 = vadd.f32 %v4825_v37, %v1403_v6  ;;  %v1316_v3 = vpop.permute.xlu0 %1315 }
 0x390   :  { %3505 = verf.f32 %v2099_v4  ;;  %v4861_v40 = vadd.f32 %v2014_v21, %v4797_v10  ;;  %v1513_v21 = vpop.permute.xlu1 %1512  ;;  %v1423_v4 = vadd.f32 %v1422_v26, %v1288_v61  ;;  %v4888_v61 = vadd.f32 %v4837_v9, %v1418_v25 }
 0x391   :  { %v2102_v43 = vmul.f32 0.70710677, %v4858_v15  ;;  %v4903_v9 = vadd.f32 %v1509_v5, %v1438_v54  ;;  %v1458_v23 = vadd.f32 %v4848_v55, %v1316_v3 }
 0x392   :  { %v2101_v32 = vmul.f32 0.70710677, %v4861_v40  ;;  %v3048_v41 = vpop.f32.mrb[36].mxu1  ;;  %v4898_v26 = vadd.f32 %v1497_v19, %v1423_v4  ;;  %v2084_v19 = vmul.f32 0.5, %v2010_v59 }
 0x393   :  { %3507 = verf.f32 %v2102_v43  ;;  %v4874_v10 = vadd.f32 %v3048_v41, %v4799_v11  ;;  %v2024_v16 = vpop.f32.mrb[37].mxu1  ;;  %v1443_v11 = vadd.f32 %v1442_v0, %v1304_v13  ;;  %v2083_v13 = vmul.f32 0.5, %v2005_v17 }
 0x394   :  { %3509 = verf.f32 %v2101_v32  ;;  %v4877_v46 = vadd.f32 %v2024_v16, %v4801_v20  ;;  %v4891_v20 = vadd.f32 %v4839_v14, %v1413_v27  ;;  %v4907_v14 = vadd.f32 %v1517_v12, %v1448_v50  ;;  %v1312_v2 = vpop.permute.xlu1 %1311 }
 0x395   :  { %v2104_v45 = vmul.f32 0.70710677, %v4874_v10  ;;  %v4910_v7 = vadd.f32 %v1513_v21, %v1443_v11  ;;  %v1453_v59 = vadd.f32 %v4850_v28, %v1312_v2  ;;  %v2086_v41 = vmul.f32 0.5, %v4858_v15  ;;  %v1525_v21 = vpop.permute.xlu0 %1524 }
 0x396   :  { %v2103_v51 = vmul.f32 0.70710677, %v4877_v46  ;;  %v3051_v36 = vpop.f32.mrb[38].mxu1  ;;  %v2085_v27 = vmul.f32 0.5, %v4861_v40  ;;  %v4932_v54 = vadd.f32 %v1525_v21, %v1458_v23 }
 0x397   :  { %3511 = verf.f32 %v2104_v45  ;;  %v4894_v62 = vadd.f32 %v3051_v36, %v4803_v8  ;;  %v2034_v18 = vpop.f32.mrb[39].mxu1 }
 0x398   :  { %3513 = verf.f32 %v2103_v51  ;;  %v4901_v37 = vadd.f32 %v2034_v18, %v4805_v44  ;;  %v1521_v4 = vpop.permute.xlu1 %1520  ;;  %v2087_v18 = vmul.f32 0.5, %v4877_v46 }
 0x399   :  { %v3504_v42 = vpop.eup %3503  ;;  %v2106_v8 = vmul.f32 0.70710677, %v4894_v62  ;;  %v4934_v50 = vadd.f32 %v1521_v4, %v1453_v59 }
 0x39a   :  { %v3506_v0 = vpop.eup %3505  ;;  %v2132_v38 = vadd.f32 1.0, %v3504_v42  ;;  %v2105_v57 = vmul.f32 0.70710677, %v4901_v37  ;;  %v3054_v44 = vpop.f32.mrb[40].mxu1  ;;  %v2089_v46 = vmul.f32 0.5, %v4901_v37 }
 0x39b   :  { %v2131_v30 = vadd.f32 1.0, %v3506_v0  ;;  %3515 = verf.f32 %v2106_v8  ;;  %v4914_v5 = vadd.f32 %v3054_v44, %v4807_v35  ;;  %v2044_v53 = vpop.f32.mrb[41].mxu1 }
 0x39c   :  { %v2148_v43 = vmul.f32 %v2132_v38, %v2084_v19  ;;  %3517 = verf.f32 %v2105_v57  ;;  %v4918_v29 = vadd.f32 %v2044_v53, %v4809_v63 }
 0x39d   :  { %v3508_v6 = vpop.eup %3507  ;;  %v2147_v32 = vmul.f32 %v2131_v30, %v2083_v13  ;;  %v2108_v17 = vmul.f32 0.70710677, %v4914_v5 }
 0x39e   :  { %v3510_v12 = vpop.eup %3509  ;;  %v2164_v35 = vadd.f32 %v2148_v43, %v4864_v48  ;;  %v2134_v25 = vadd.f32 1.0, %v3508_v6  ;;  %v2107_v55 = vmul.f32 0.70710677, %v4918_v29  ;;  %v3057_v16 = vpop.f32.mrb[42].mxu1 }
 0x39f   :  { %v4927_v63 = vadd.f32 %v2147_v32, %v4868_v58  ;;  %v2133_v56 = vadd.f32 1.0, %v3510_v12  ;;  %3519 = verf.f32 %v2108_v17  ;;  %v4930_v28 = vadd.f32 %v3057_v16, %v4819_v22  ;;  %v2054_v15 = vpop.f32.mrb[43].mxu1 }
 0x3a0   :  { %v2196_v48 = vmul.f32 0.70710677, %v2164_v35  ;;  %v2150_v31 = vmul.f32 %v2134_v25, %v2086_v41  ;;  %3521 = verf.f32 %v2107_v55  ;;  %v2088_v58 = vmul.f32 0.5, %v4874_v10 }
 0x3a1   :  { %v3512_v40 = vpop.eup %3511  ;;  %v2195_v45 = vmul.f32 0.70710677, %v4927_v63  ;;  %v2149_v11 = vmul.f32 %v2133_v56, %v2085_v27  ;;  %v2110_v42 = vmul.f32 0.70710677, %v4930_v28  ;;  %v2055_v2 = vadd.f32 %v2054_v15, %v4821_v49 }
 0x3a2   :  { %v3514_v51 = vpop.eup %3513  ;;  %v2166_v36 = vadd.f32 %v2150_v31, %v4881_v33  ;;  %v2136_v22 = vadd.f32 1.0, %v3512_v40  ;;  %v3060_v3 = vpop.f32.mrb[44].mxu1  ;;  %3523 = verf.f32 %v2196_v48  ;;  %v2090_v10 = vmul.f32 0.5, %v4894_v62 }
 0x3a3   :  { %v2165_v8 = vadd.f32 %v2149_v11, %v4884_v1  ;;  %v2135_v0 = vadd.f32 1.0, %v3514_v51  ;;  %v2064_v19 = vpop.f32.mrb[45].mxu1  ;;  %3525 = verf.f32 %v2110_v42  ;;  %v2109_v23 = vmul.f32 0.70710677, %v2055_v2 }
 0x3a4   :  { %v2198_v38 = vmul.f32 0.70710677, %v2166_v36  ;;  %v2152_v57 = vmul.f32 %v2136_v22, %v2088_v58  ;;  %3527 = verf.f32 %v2195_v45  ;;  %v4948_v62 = vadd.f32 %v3060_v3, %v4833_v60 }
 0x3a5   :  { %v3516_v44 = vpop.eup %3515  ;;  %v2197_v33 = vmul.f32 0.70710677, %v2165_v8  ;;  %v2151_v13 = vmul.f32 %v2135_v0, %v2087_v18  ;;  %v2092_v17 = vmul.f32 0.5, %v4914_v5  ;;  %v2180_v12 = vmul.f32 0.5, %v2164_v35 }
 0x3a6   :  { %v3518_v30 = vpop.eup %3517  ;;  %3529 = verf.f32 %v2198_v38  ;;  %v2168_v53 = vadd.f32 %v2152_v57, %v4888_v61  ;;  %v2138_v1 = vadd.f32 1.0, %v3516_v44  ;;  %v3063_v43 = vpop.f32.mrb[46].mxu1  ;;  %v2091_v27 = vmul.f32 0.5, %v4918_v29 }
 0x3a7   :  { %3531 = verf.f32 %v2197_v33  ;;  %v2167_v49 = vadd.f32 %v2151_v13, %v4891_v20  ;;  %v2137_v6 = vadd.f32 1.0, %v3518_v30  ;;  %v2074_v59 = vpop.f32.mrb[47].mxu1  ;;  %v2112_v60 = vmul.f32 0.70710677, %v4948_v62 }
 0x3a8   :  { %v2200_v32 = vmul.f32 0.70710677, %v2168_v53  ;;  %v2154_v41 = vmul.f32 %v2138_v1, %v2090_v10  ;;  %3533 = verf.f32 %v2109_v23  ;;  %v4960_v56 = vadd.f32 %v2064_v19, %v4835_v24 }
 0x3a9   :  { %v3520_v37 = vpop.eup %3519  ;;  %v2199_v25 = vmul.f32 0.70710677, %v2167_v49  ;;  %v2153_v61 = vmul.f32 %v2137_v6, %v2089_v46  ;;  %v2179_v35 = vmul.f32 0.5, %v4927_v63  ;;  %v2094_v40 = vmul.f32 0.5, %v4930_v28 }
 0x3aa   :  { %v3522_v55 = vpop.eup %3521  ;;  %3535 = verf.f32 %v2200_v32  ;;  %v4953_v20 = vadd.f32 %v2154_v41, %v4896_v39  ;;  %v2140_v16 = vadd.f32 1.0, %v3520_v37  ;;  %v2182_v39 = vmul.f32 0.5, %v2166_v36  ;;  %v1324_v32 = vpop.permute.xlu0 %1323 }
 0x3ab   :  { %3537 = verf.f32 %v2199_v25  ;;  %v4957_v21 = vadd.f32 %v2153_v61, %v4898_v26  ;;  %v2139_v5 = vadd.f32 1.0, %v3522_v55  ;;  %v2111_v24 = vmul.f32 0.70710677, %v4960_v56  ;;  %v5125_v61 = vld [vmem:[#allocation14_spill] sm:$0xff] }
 0x3ac   :  { %v2202_v29 = vmul.f32 0.70710677, %v4953_v20  ;;  %v2156_v15 = vmul.f32 %v2140_v16, %v2092_v17  ;;  %3539 = verf.f32 %v2112_v60  ;;  %v3524_v4 = vpop.eup %3523  ;;  %v4971_v63 = vadd.f32 %v3063_v43, %v4844_v47 }
 0x3ad   :  { %v2201_v48 = vmul.f32 0.70710677, %v4957_v21  ;;  %v2155_v31 = vmul.f32 %v2139_v5, %v2091_v27  ;;  %v3526_v45 = vpop.eup %3525  ;;  %v4977_v36 = vadd.f32 %v2074_v59, %v4846_v34  ;;  %v2181_v22 = vmul.f32 0.5, %v2165_v8 }
 0x3ae   :  { %3541 = verf.f32 %v2202_v29  ;;  %v4967_v26 = vadd.f32 %v2156_v15, %v4903_v9  ;;  %v3528_v11 = vpop.eup %3527  ;;  %v2142_v51 = vadd.f32 1.0, %v3526_v45  ;;  %v2093_v9 = vmul.f32 0.5, %v2055_v2 }
 0x3af   :  { %3543 = verf.f32 %v2201_v48  ;;  %v4974_v58 = vadd.f32 %v2155_v31, %v4905_v52  ;;  %v2184_v3 = vmul.f32 0.5, %v2168_v53  ;;  %v2114_v19 = vmul.f32 0.70710677, %v4971_v63  ;;  %v1320_v31 = vpop.permute.xlu1 %1319 }
 0x3b0   :  { %v3530_v28 = vpop.eup %3529  ;;  %v2204_v18 = vmul.f32 0.70710677, %v4967_v26  ;;  %3545 = verf.f32 %v2111_v24  ;;  %v2158_v0 = vmul.f32 %v2142_v51, %v2094_v40  ;;  %v2183_v52 = vmul.f32 0.5, %v2167_v49 }
 0x3b1   :  { %v3532_v42 = vpop.eup %3531  ;;  %v2203_v47 = vmul.f32 0.70710677, %v4974_v58  ;;  %v2113_v57 = vmul.f32 0.70710677, %v4977_v36  ;;  %v2227_v34 = vadd.f32 1.0, %v3528_v11  ;;  %v2228_v2 = vadd.f32 1.0, %v3524_v4 }
 0x3b2   :  { %v3534_v38 = vpop.eup %3533  ;;  %3547 = verf.f32 %v2204_v18  ;;  %v4984_v8 = vadd.f32 %v2158_v0, %v4907_v14  ;;  %v2229_v13 = vadd.f32 1.0, %v3532_v42  ;;  %v2230_v46 = vadd.f32 1.0, %v3530_v28  ;;  %v5126_v11 = vld [vmem:[#allocation15_spill] sm:$0xff] }
 0x3b3   :  { %3549 = verf.f32 %v2203_v47  ;;  %v2141_v10 = vadd.f32 1.0, %v3534_v38  ;;  %v2243_v33 = vmul.f32 %v2227_v34, %v2179_v35  ;;  %v2096_v23 = vmul.f32 0.5, %v4948_v62 }
 0x3b4   :  { %v3536_v44 = vpop.eup %3535  ;;  %3551 = verf.f32 %v2114_v19  ;;  %v2206_v53 = vmul.f32 0.70710677, %v4984_v8  ;;  %v2244_v49 = vmul.f32 %v2228_v2, %v2180_v12  ;;  %v2245_v6 = vmul.f32 %v2229_v13, %v2181_v22 }
 0x3b5   :  { %v3538_v30 = vpop.eup %3537  ;;  %v2157_v1 = vmul.f32 %v2141_v10, %v2093_v9  ;;  %3553 = verf.f32 %v2113_v57  ;;  %v2246_v59 = vmul.f32 %v2230_v46, %v2182_v39  ;;  %v2232_v37 = vadd.f32 1.0, %v3536_v44 }
 0x3b6   :  { %v3540_v43 = vpop.eup %3539  ;;  %v2231_v14 = vadd.f32 1.0, %v3538_v30  ;;  %3555 = verf.f32 %v2206_v53  ;;  %v1468_v27 = vadd.f32 %v5125_v61, %v1324_v32  ;;  %v3312_v55 = vpack.c.bf16 %v2244_v49, %v2243_v33  ;;  %v1529_v33 = vpop.permute.xlu1 %1528 }
 0x3b7   :  { %v4989_v41 = vadd.f32 %v2157_v1, %v4910_v7  ;;  %v2144_v17 = vadd.f32 1.0, %v3540_v43  ;;  %v3316_v16 = vpack.c.bf16 %v2246_v59, %v2245_v6  ;;  %v2186_v5 = vmul.f32 0.5, %v4953_v20 }
 0x3b8   :  { %v3542_v25 = vpop.eup %3541  ;;  %v2247_v60 = vmul.f32 %v2231_v14, %v2183_v52  ;;  %v2248_v29 = vmul.f32 %v2232_v37, %v2184_v3  ;;  %v2185_v4 = vmul.f32 0.5, %v4957_v21  ;;  %v2095_v7 = vmul.f32 0.5, %v4960_v56  ;;  %3313 = vmatprep.subr.bf16.mxu0 %v3312_v55  ;;  %3344 = vmatprep.subr.bf16.mxu1 %v3312_v55 }
 0x3b9   :  { %v3544_v62 = vpop.eup %3543  ;;  %v2205_v12 = vmul.f32 0.70710677, %v4989_v41  ;;  %v2160_v35 = vmul.f32 %v2144_v17, %v2096_v23  ;;  %v2234_v48 = vadd.f32 1.0, %v3542_v25  ;;  %3315 = vmatpush3.bf16.msra.mxu0 %v3312_v55  ;;  %3352 = vmatpush3.bf16.msra.mxu1 %v3312_v55  ;;  %v1463_v51 = vadd.f32 %v5126_v11, %v1320_v31  ;;  %v2491_v11 = vld [vmem:[%s5066_s3 + $0x118] sm:$0xff] }
 0x3ba   :  { %v3546_v15 = vpop.eup %3545  ;;  %v2233_v39 = vadd.f32 1.0, %v3544_v62  ;;  %v3320_v20 = vpack.c.bf16 %v2248_v29, %v2247_v60  ;;  %3317 = vmatprep.subr.bf16.mxu0 %v3316_v16  ;;  %3345 = vmatprep.subr.bf16.mxu1 %v3316_v16  ;;  %v2188_v22 = vmul.f32 0.5, %v4967_v26  ;;  %v2187_v3 = vmul.f32 0.5, %v4974_v58  ;;  %v1533_v26 = vpop.permute.xlu0 %1532 }
 0x3bb   :  { %3557 = verf.f32 %v2205_v12  ;;  %v4997_v40 = vadd.f32 %v2160_v35, %v4932_v54  ;;  %v2143_v45 = vadd.f32 1.0, %v3546_v15  ;;  %v2250_v56 = vmul.f32 %v2234_v48, %v2186_v5 }
 0x3bc   :  { %v3548_v24 = vpop.eup %3547  ;;  %v2249_v21 = vmul.f32 %v2233_v39, %v2185_v4  ;;  %v2098_v47 = vmul.f32 0.5, %v4971_v63  ;;  %v2097_v10 = vmul.f32 0.5, %v4977_v36  ;;  %v1550_v63 = vadd.f32 %v1533_v26, %v1468_v27 }
 0x3bd   :  { %v3550_v28 = vpop.eup %3549  ;;  %v2208_v18 = vmul.f32 0.70710677, %v4997_v40  ;;  %v2159_v9 = vmul.f32 %v2143_v45, %v2095_v7  ;;  %v2236_v42 = vadd.f32 1.0, %v3548_v24  ;;  %3319 = vmatpush3.bf16.msra.mxu0 %v3316_v16  ;;  %3353 = vmatpush3.bf16.msra.mxu1 %v3316_v16  ;;  %v1549_v30 = vadd.f32 %v1529_v33, %v1463_v51  ;;  %v2497_v45 = vld [vmem:[%s5066_s3 + $0x148] sm:$0xff]  ;;  %v2498_v24 = vld [vmem:[%s5066_s3 + $0x150] sm:$0xff]  ;;  %v2499_v51 = vld [vmem:[%s5066_s3 + $0x158] sm:$0xff] }
 0x3be   :  { %v3552_v54 = vpop.eup %3551  ;;  %v3324_v0 = vpack.c.bf16 %v2250_v56, %v2249_v21  ;;  %v2235_v19 = vadd.f32 1.0, %v3550_v28  ;;  %3321 = vmatprep.subr.bf16.mxu0 %v3320_v20  ;;  %3346 = vmatprep.subr.bf16.mxu1 %v3320_v20  ;;  %v2190_v43 = vmul.f32 0.5, %v4984_v8  ;;  %v2189_v59 = vmul.f32 0.5, %v4989_v41  ;;  %v2492_v21 = vld [vmem:[%s5066_s3 + $0x120] sm:$0xff]  ;;  %v2493_v28 = vld [vmem:[%s5066_s3 + $0x128] sm:$0xff] }
 0x3bf   :  { %v3554_v38 = vpop.eup %3553  ;;  %3559 = verf.f32 %v2208_v18  ;;  %v2175_v52 = vadd.f32 %v2159_v9, %v4934_v50  ;;  %v2146_v57 = vadd.f32 1.0, %v3552_v54  ;;  %v2252_v34 = vmul.f32 %v2236_v42, %v2188_v22  ;;  %v2500_v56 = vld [vmem:[%s5066_s3 + $0x160] sm:$0xff]  ;;  %v2501_v22 = vld [vmem:[%s5066_s3 + $0x168] sm:$0xff]  ;;  %v2494_v18 = vld [vmem:[%s5066_s3 + $0x130] sm:$0xff] }
 0x3c0   :  { %v2145_v2 = vadd.f32 1.0, %v3554_v38  ;;  %v2251_v44 = vmul.f32 %v2235_v19, %v2187_v3  ;;  %v3556_v58 = vpop.eup %3555  ;;  %v2192_v27 = vmul.f32 0.5, %v4997_v40  ;;  %v2489_v40 = vld [vmem:[%s5066_s3 + $0x108] sm:$0xff]  ;;  %v2502_v9 = vld [vmem:[%s5066_s3 + $0x170] sm:$0xff]  ;;  %v2495_v42 = vld [vmem:[%s5066_s3 + $0x138] sm:$0xff]  ;;  %v2278_v3 = vpop.permute.xlu1 %2277 }
 0x3c1   :  { %v2207_v13 = vmul.f32 0.70710677, %v2175_v52  ;;  %v2162_v46 = vmul.f32 %v2146_v57, %v2098_v47  ;;  %v2238_v50 = vadd.f32 1.0, %v3556_v58  ;;  %3323 = vmatpush3.bf16.msra.mxu0 %v3320_v20  ;;  %3354 = vmatpush3.bf16.msra.mxu1 %v3320_v20  ;;  %v2191_v55 = vmul.f32 0.5, %v2175_v52  ;;  %v2490_v20 = vld [vmem:[%s5066_s3 + $0x110] sm:$0xff]  ;;  %v2503_v54 = vld [vmem:[%s5066_s3 + $0x178] sm:$0xff] }
 0x3c2   :  { %v2161_v53 = vmul.f32 %v2145_v2, %v2097_v10  ;;  %v3328_v1 = vpack.c.bf16 %v2252_v34, %v2251_v44  ;;  %3325 = vmatprep.subr.bf16.mxu0 %v3324_v0  ;;  %3347 = vmatprep.subr.bf16.mxu1 %v3324_v0 }
 0x3c3   :  { %3561 = verf.f32 %v2207_v13  ;;  %v2178_v23 = vadd.f32 %v2162_v46, %v1550_v63  ;;  %v2254_v17 = vmul.f32 %v2238_v50, %v2190_v43 }
 0x3c4   :  { %v2177_v36 = vadd.f32 %v2161_v53, %v1549_v30 }
 0x3c5   :  { %v3558_v49 = vpop.eup %3557  ;;  %v2210_v6 = vmul.f32 0.70710677, %v2178_v23  ;;  %3327 = vmatpush3.bf16.msra.mxu0 %v3324_v0  ;;  %3355 = vmatpush3.bf16.msra.mxu1 %v3324_v0  ;;  %v2194_v35 = vmul.f32 0.5, %v2178_v23 }
 0x3c6   :  { %v2209_v14 = vmul.f32 0.70710677, %v2177_v36  ;;  %v2237_v32 = vadd.f32 1.0, %v3558_v49  ;;  %3329 = vmatprep.subr.bf16.mxu0 %v3328_v1  ;;  %3348 = vmatprep.subr.bf16.mxu1 %v3328_v1  ;;  %v2193_v4 = vmul.f32 0.5, %v2177_v36 }
 0x3c7   :  { %3563 = verf.f32 %v2210_v6 }
 0x3c8   :  { %3565 = verf.f32 %v2209_v14  ;;  %v2253_v37 = vmul.f32 %v2237_v32, %v2189_v59 }
 0x3c9   :  { %v3560_v25 = vpop.eup %3559  ;;  %3331 = vmatpush3.bf16.msra.mxu0 %v3328_v1  ;;  %3356 = vmatpush3.bf16.msra.mxu1 %v3328_v1 }
 0x3ca   :  { %v3332_v61 = vpack.c.bf16 %v2254_v17, %v2253_v37  ;;  %v2240_v8 = vadd.f32 1.0, %v3560_v25 }
 0x3cc   :  { %3333 = vmatprep.subr.bf16.mxu0 %v3332_v61  ;;  %3349 = vmatprep.subr.bf16.mxu1 %v3332_v61  ;;  %v2256_v60 = vmul.f32 %v2240_v8, %v2192_v27 }
 0x3cd   :  { %v3562_v41 = vpop.eup %3561  ;;  %3335 = vmatpush3.bf16.msra.mxu0 %v3332_v61  ;;  %3357 = vmatpush3.bf16.msra.mxu1 %v3332_v61 }
 0x3ce   :  { %v2239_v16 = vadd.f32 1.0, %v3562_v41 }
 0x3d0   :  { %v2255_v62 = vmul.f32 %v2239_v16, %v2191_v55 }
 0x3d1   :  { %v3564_v5 = vpop.eup %3563 }
 0x3d2   :  { %v3566_v12 = vpop.eup %3565  ;;  %v3336_v29 = vpack.c.bf16 %v2256_v60, %v2255_v62  ;;  %v2242_v15 = vadd.f32 1.0, %v3564_v5 }
 0x3d3   :  { %v2241_v7 = vadd.f32 1.0, %v3566_v12 }
 0x3d4   :  { %3337 = vmatprep.subr.bf16.mxu0 %v3336_v29  ;;  %3350 = vmatprep.subr.bf16.mxu1 %v3336_v29  ;;  %v2258_v39 = vmul.f32 %v2242_v15, %v2194_v35 }
 0x3d5   :  { %3339 = vmatpush3.bf16.msra.mxu0 %v3336_v29  ;;  %3358 = vmatpush3.bf16.msra.mxu1 %v3336_v29  ;;  %v2257_v48 = vmul.f32 %v2241_v7, %v2193_v4 }
 0x3d7   :  { %v3340_v31 = vpack.c.bf16 %v2258_v39, %v2257_v48 }
 0x3d9   :  { %3341 = vmatprep.subr.bf16.mxu0 %v3340_v31  ;;  %3351 = vmatprep.subr.bf16.mxu1 %v3340_v31 }
 0x3da   :  { %3343 = vmatpush3.bf16.msra.mxu0 %v3340_v31  ;;  %3359 = vmatpush3.bf16.msra.mxu1 %v3340_v31 }
 0x3dd   :  { %3097 = vmatmul.mubr.f32.vlgmr.msra.gmra.mrb[48].mxu0 %v2489_v40  ;;  %3109 = vmatmul.mubr.f32.vlgmr.msra.gmra.mrb[48].mxu1 %v2497_v45 }
 0x3de   :  { %3099 = vmatprep.mubr.f32.mxu0 %v2490_v20  ;;  %3111 = vmatprep.mubr.f32.mxu1 %v2498_v24 }
 0x3e1   :  { %3100 = vmatmul.mubr.f32.gmra.mrb[50].mxu0 %v2491_v11  ;;  %3112 = vmatmul.mubr.f32.gmra.mrb[50].mxu1 %v2499_v51 }
 0x3e2   :  { %3102 = vmatprep.mubr.f32.mxu0 %v2492_v21  ;;  %3114 = vmatprep.mubr.f32.mxu1 %v2500_v56 }
 0x3e5   :  { %3103 = vmatmul.mubr.f32.gmra.mrb[52].mxu0 %v2493_v28  ;;  %3115 = vmatmul.mubr.f32.gmra.mrb[52].mxu1 %v2501_v22 }
 0x3e6   :  { %3105 = vmatprep.mubr.f32.mxu0 %v2494_v18  ;;  %3117 = vmatprep.mubr.f32.mxu1 %v2502_v9 }
 0x3e9   :  { %3106 = vmatmul.mubr.f32.gmra.mrb[54].mxu0 %v2495_v42  ;;  %3118 = vmatmul.mubr.f32.gmra.mrb[54].mxu1 %v2503_v54 }
 0x4b0   :  { %v3098_v47 = vpop.f32.mrb[48].mxu0  ;;  %v3110_v0 = vpop.f32.mrb[48].mxu1 }
 0x4b1   :  { %v2391_v19 = vpop.f32.mrb[49].mxu0  ;;  %v2424_v38 = vpop.f32.mrb[49].mxu1 }
 0x4b2   :  { %v2392_v52 = vadd.f32 %v2391_v19, %v2278_v3 }
 0x4b4   :  { %2455 = vst [vmem:[#allocation8] sm:$0xff] %v2392_v52  ;;  %v3101_v57 = vpop.f32.mrb[50].mxu0  ;;  %v3113_v34 = vpop.f32.mrb[50].mxu1 }
 0x4b5   :  { %v2400_v26 = vpop.f32.mrb[51].mxu0  ;;  %v2432_v10 = vpop.f32.mrb[51].mxu1 }
 0x4b6   :  { %3645 = shalt.err (!%p3642_p0)
}
 0x4b7   :  { %s3646_s25 = scalar_lea.hbm %s5072_s9, 128 }
 0x4b8   :  { %p3647_p1 = scmp.ne.s32.totalorder %s5072_s9, %s3646_s25  ;;  %p3650_p2 = scmp.lt.u32.totalorder %s3646_s25, %s5072_s9 }
 0x4ba   :  { %p3652_p3 = pnand %p3650_p2, %p3647_p1 }
 0x4bc   :  { %3655 = shalt.err (!%p3652_p3)
}
 0x4bd   :  { %2465 = dma.vmem_to_hbm [thread:$0]  %s2463_s4, 128, %s5072_s9, [#allocation4]   ;;  %v3104_v2 = vpop.f32.mrb[52].mxu0  ;;  %v3116_v44 = vpop.f32.mrb[52].mxu1 }
 0x4be   :  { %v2408_v58 = vpop.f32.mrb[53].mxu0  ;;  %v2440_v33 = vpop.f32.mrb[53].mxu1 }
 0x4bf   :  { %v3107_v63 = vpop.f32.mrb[54].mxu0  ;;  %v3119_v13 = vpop.f32.mrb[54].mxu1 }
 0x4c0   :  { %v2416_v46 = vpop.f32.mrb[55].mxu0  ;;  %v2448_v30 = vpop.f32.mrb[55].mxu1 }
 0x4c1   :  { %3660 = dma.done.wait [#allocation4], 128  }
 0x4c2   :  { %3661 = vsyncadd [#allocation4], 4294967168 }
 0x4c3   :  { %2469 = vsyncpa [#allocation3], 1 }
 0x4c4   :  { %2470 = vsyncpa [#allocation6], 1 }
 0x4c5   :  { %2471 = vsyncpa [#allocation4], 1 }

// kernel: tpu_custom_call.1
= control target key start
LH: loop header
LB: loop body
LE: loop exit
PB: predicated region body
PF: predicated region fallthrough
CT: control target
= control target key end

     0   :  { %14 = vsyncpa [#allocation3], 0  ;;  %s5063_s0 = inlined_call_operand.vmem [shape: f32[128,128], index: 0, kind: input, shape index: {}]   ;;  %s5064_s1 = inlined_call_operand.hbm [shape: f32[128,128], index: 1, kind: input, shape index: {}]   ;;  %s5065_s2 = inlined_call_operand.vmem [shape: f32[128,2], index: 2, kind: input, shape index: {}]   ;;  %s5066_s3 = inlined_call_operand.vmem [shape: f32[3,128,128], index: 3, kind: input, shape index: {}]   ;;  %s5067_s4 = inlined_call_operand.vmem [shape: f32[128,3], index: 4, kind: input, shape index: {}]   ;;  %s5068_s5 = inlined_call_operand.hbm [shape: f32[2,128,128], index: 5, kind: input, shape index: {}]   ;;  %s5069_s6 = inlined_call_operand.vmem [shape: f32[128,2], index: 6, kind: input, shape index: {}]   ;;  %s5070_s7 = inlined_call_operand.hbm [shape: f32[2,128,128], index: 7, kind: input, shape index: {}]   ;;  %s5071_s8 = inlined_call_operand.vmem [shape: f32[128,2], index: 8, kind: input, shape index: {}]   ;;  %s5072_s9 = inlined_call_operand.hbm [shape: f32[8,128], index: 9, kind: output, shape index: {}]  }
   0x1   :  { %15 = vsyncpa [#allocation6], 0 }
   0x2   :  { %16 = vsyncpa [#allocation4], 0  ;;  %s3662_s30 = smov [#allocation5]   ;;  %s3663_s11 = smov [#allocation2]  }
   0x3   :  { %s42_s10 = sshll.u32 %s3662_s30, 4  ;;  %s24_s12 = sshll.u32 %s3663_s11, 4  ;;  %s43_s10 = int_to_ptr.vmem [resolvable:$true] %s42_s10  ;;  %s3721_s12 = int_to_ptr.vmem [resolvable:$true] %s24_s12 }
   0x4   :  { %s3568_s15 = scalar_lea.hbm %s5068_s5, 4096 }
   0x5   :  { %p3569_p0 = scmp.ne.s32.totalorder %s5068_s5, %s3568_s15  ;;  %p3572_p1 = scmp.lt.u32.totalorder %s3568_s15, %s5068_s5 }
   0x7   :  { %p3574_p2 = pnand %p3572_p1, %p3569_p0 }
   0x9   :  { %3577 = shalt.err (!%p3574_p2)
}
   0xa   :  { %s3578_s20 = scalar_lea.vmem %s43_s10, 4096  ;;  %p3583_p4 = scmp.lt.s32.totalorder %s43_s10, %s43_s10 }
   0xb   :  { %p3579_p3 = scmp.ne.s32.totalorder %s43_s10, %s3578_s20  ;;  %p3584_p5 = scmp.lt.s32.totalorder %s3578_s20, %s3578_s20 }
   0xd   :  { %p3585_p6 = por %p3584_p5, %p3583_p4 }
   0xf   :  { %p3586_p7 = pnand %p3585_p6, %p3579_p3 }
  0x11   :  { %3589 = shalt.err (!%p3586_p7)
}
  0x12   :  { %s3664_s21 = smov 128   ;;  %s3665_s22 = smov 8  }
  0x13   :  { %48 = dma.hbm_to_vmem [thread:$0]  %s5068_s5, 4096, %s43_s10, [#allocation6], %s3664_s21, %s3664_s21, %s3665_s22  }
  0x14   :  { %s3590_s27 = scalar_lea.hbm %s5064_s1, 2048 }
  0x15   :  { %p3591_p8 = scmp.ne.s32.totalorder %s5064_s1, %s3590_s27  ;;  %p3594_p9 = scmp.lt.u32.totalorder %s3590_s27, %s5064_s1 }
  0x17   :  { %p3596_p10 = pnand %p3594_p9, %p3591_p8 }
  0x19   :  { %3599 = shalt.err (!%p3596_p10)
}
  0x1a   :  { %s3600_s13 = scalar_lea.vmem %s3721_s12, 2048  ;;  %p3605_p12 = scmp.lt.s32.totalorder %s3721_s12, %s3721_s12 }
  0x1b   :  { %p3601_p11 = scmp.ne.s32.totalorder %s3721_s12, %s3600_s13  ;;  %p3606_p13 = scmp.lt.s32.totalorder %s3600_s13, %s3600_s13 }
  0x1d   :  { %p3607_p0 = por %p3606_p13, %p3605_p12 }
  0x1f   :  { %p3608_p1 = pnand %p3607_p0, %p3601_p11 }
  0x21   :  { %3611 = shalt.err (!%p3608_p1)
}
  0x22   :  { %30 = dma.hbm_to_vmem [thread:$0]  %s5064_s1, 2048, %s3721_s12, [#allocation3], %s3664_s21, %s3664_s21, %s3665_s22  }
  0x23   :  { %s3666_s14 = smov [#allocation7]   ;;  %s3612_s18 = scalar_lea.hbm %s5070_s7, 4096 }
  0x24   :  { %s56_s15 = sshll.u32 %s3666_s14, 4  ;;  %p3613_p2 = scmp.ne.s32.totalorder %s5070_s7, %s3612_s18  ;;  %s57_s15 = int_to_ptr.vmem [resolvable:$true] %s56_s15 }
  0x25   :  { %p3616_p3 = scmp.lt.u32.totalorder %s3612_s18, %s5070_s7 }
  0x27   :  { %p3618_p4 = pnand %p3616_p3, %p3613_p2 }
  0x29   :  { %3621 = shalt.err (!%p3618_p4)
}
  0x2a   :  { %s3622_s25 = scalar_lea.vmem %s57_s15, 4096  ;;  %p3627_p6 = scmp.lt.s32.totalorder %s57_s15, %s57_s15 }
  0x2b   :  { %p3623_p5 = scmp.ne.s32.totalorder %s57_s15, %s3622_s25  ;;  %p3628_p7 = scmp.lt.s32.totalorder %s3622_s25, %s3622_s25 }
  0x2d   :  { %p3629_p8 = por %p3628_p7, %p3627_p6 }
  0x2f   :  { %p3630_p9 = pnand %p3629_p8, %p3623_p5 }
  0x31   :  { %3633 = shalt.err (!%p3630_p9)
}
  0x32   :  { %62 = dma.hbm_to_vmem [thread:$0]  %s5070_s7, 4096, %s57_s15, [#allocation6], %s3664_s21, %s3664_s21, %s3665_s22  }
  0x33   :  { %3656 = dma.done.wait [#allocation3], 2048  }
  0x34   :  { %3657 = vsyncadd [#allocation3], 4294965248 }
  0x35   :  { %3658 = dma.done.wait [#allocation6], 8192  }
  0x36   :  { %3659 = vsyncadd [#allocation6], 4294959104  ;;  %v3667_v0 = vmov 0   ;;  %v3776_v1 = vld [vmem:[%s5069_s6 + $0x10] sm:$0xff]  ;;  %v3781_v2 = vld [vmem:[%s5069_s6] sm:$0xff] }
  0x37   :  { %3370 = vset.pattern.permute.xlu1 %v3667_v0  ;;  %3369 = vset.pattern.permute.xlu0 %v3667_v0  ;;  %v74_v3 = vld [vmem:[%s5063_s0] sm:$0xff]  ;;  %v75_v4 = vld [vmem:[%s5063_s0 + $0x8] sm:$0xff]  ;;  %v3796_v9 = vld [vmem:[%s5069_s6 + $0x18] sm:$0xff] }
  0x38   :  { %551 = vperm.xlu1 %3370, %v3776_v1   ;;  %541 = vperm.xlu0 %3369, %v3781_v2   ;;  %v459_v5 = vld [vmem:[#allocation2] sm:$0xff]  ;;  %v460_v6 = vld [vmem:[#allocation2 + $0x8] sm:$0xff]  ;;  %v3120_v7 = vpack.c.bf16 %v75_v4, %v74_v3  ;;  %v76_v11 = vld [vmem:[%s5063_s0 + $0x10] sm:$0xff] }
  0x39   :  { %v3791_v8 = vpack.c.bf16 %v460_v6, %v459_v5  ;;  %v3801_v10 = vld [vmem:[%s5069_s6 + $0x8] sm:$0xff]  ;;  %v77_v12 = vld [vmem:[%s5063_s0 + $0x18] sm:$0xff]  ;;  %v461_v13 = vld [vmem:[#allocation2 + $0x10] sm:$0xff] }
  0x3a   :  { %v462_v14 = vld [vmem:[#allocation2 + $0x18] sm:$0xff]  ;;  %3121 = vmatprep.subr.bf16.mxu0 %v3120_v7  ;;  %v3124_v15 = vpack.c.bf16 %v77_v12, %v76_v11  ;;  %v78_v17 = vld [vmem:[%s5063_s0 + $0x20] sm:$0xff]  ;;  %v79_v18 = vld [vmem:[%s5063_s0 + $0x28] sm:$0xff] }
  0x3b   :  { %5091 = vst [vmem:[#allocation12_spill] sm:$0xff] %v3791_v8  ;;  %3153 = vmatprep.subr.bf16.mxu1 %v3791_v8  ;;  %v3810_v16 = vpack.c.bf16 %v462_v14, %v461_v13  ;;  %3123 = vmatpush3.bf16.msra.mxu0 %v3120_v7  ;;  %v463_v19 = vld [vmem:[#allocation2 + $0x20] sm:$0xff]  ;;  %v464_v20 = vld [vmem:[#allocation2 + $0x28] sm:$0xff]  ;;  %v3128_v23 = vpack.c.bf16 %v79_v18, %v78_v17  ;;  %v80_v25 = vld [vmem:[%s5063_s0 + $0x30] sm:$0xff] }
  0x3c   :  { %3155 = vmatpush3.bf16.msra.mxu1 %v3791_v8  ;;  %556 = vperm.xlu1 %3370, %v3796_v9   ;;  %v3825_v21 = vld [vmem:[%s5069_s6 + $0x28] sm:$0xff]  ;;  %v3830_v22 = vld [vmem:[%s5069_s6 + $0x20] sm:$0xff]  ;;  %v3832_v24 = vpack.c.bf16 %v464_v20, %v463_v19  ;;  %v81_v26 = vld [vmem:[%s5063_s0 + $0x38] sm:$0xff]  ;;  %v3668_v8 = vmov 1  }
  0x3d   :  { %5092 = vst [vmem:[#allocation13_spill] sm:$0xff] %v3810_v16  ;;  %546 = vperm.xlu0 %3369, %v3801_v10   ;;  %3125 = vmatprep.subr.bf16.mxu0 %v3124_v15  ;;  %v465_v27 = vld [vmem:[#allocation2 + $0x30] sm:$0xff]  ;;  %v466_v28 = vld [vmem:[#allocation2 + $0x38] sm:$0xff]  ;;  %v3132_v31 = vpack.c.bf16 %v81_v26, %v80_v25  ;;  %v82_v33 = vld [vmem:[%s5063_s0 + $0x40] sm:$0xff] }
  0x3e   :  { %3157 = vmatprep.subr.bf16.mxu1 %v3810_v16  ;;  %5093 = vst [vmem:[#allocation14_spill] sm:$0xff] %v3832_v24  ;;  %v3847_v29 = vld [vmem:[%s5069_s6 + $0x38] sm:$0xff]  ;;  %v3852_v30 = vld [vmem:[%s5069_s6 + $0x30] sm:$0xff]  ;;  %v3854_v32 = vpack.c.bf16 %v466_v28, %v465_v27  ;;  %v83_v34 = vld [vmem:[%s5063_s0 + $0x48] sm:$0xff] }
  0x3f   :  { %3127 = vmatpush3.bf16.msra.mxu0 %v3124_v15  ;;  %v467_v35 = vld [vmem:[#allocation2 + $0x40] sm:$0xff]  ;;  %v468_v36 = vld [vmem:[#allocation2 + $0x48] sm:$0xff]  ;;  %v3136_v39 = vpack.c.bf16 %v83_v34, %v82_v33  ;;  %v84_v41 = vld [vmem:[%s5063_s0 + $0x50] sm:$0xff] }
  0x40   :  { %3159 = vmatpush3.bf16.msra.mxu1 %v3810_v16  ;;  %566 = vperm.xlu1 %3370, %v3825_v21   ;;  %5094 = vst [vmem:[#allocation15_spill] sm:$0xff] %v3854_v32  ;;  %v3869_v37 = vld [vmem:[%s5069_s6 + $0x48] sm:$0xff]  ;;  %v3874_v38 = vld [vmem:[%s5069_s6 + $0x40] sm:$0xff]  ;;  %v3876_v40 = vpack.c.bf16 %v468_v36, %v467_v35  ;;  %v85_v42 = vld [vmem:[%s5063_s0 + $0x58] sm:$0xff] }
  0x41   :  { %561 = vperm.xlu0 %3369, %v3830_v22   ;;  %3129 = vmatprep.subr.bf16.mxu0 %v3128_v23  ;;  %v469_v43 = vld [vmem:[#allocation2 + $0x50] sm:$0xff]  ;;  %v470_v44 = vld [vmem:[#allocation2 + $0x58] sm:$0xff]  ;;  %v90_v45 = vld [vmem:[%s5066_s3] sm:$0xff]  ;;  %v3140_v49 = vpack.c.bf16 %v85_v42, %v84_v41 }
  0x42   :  { %3161 = vmatprep.subr.bf16.mxu1 %v3832_v24  ;;  %5095 = vst [vmem:[#allocation16_spill] sm:$0xff] %v3876_v40  ;;  %v475_v46 = vld [vmem:[#allocation5] sm:$0xff]  ;;  %v3894_v47 = vld [vmem:[%s5069_s6 + $0x58] sm:$0xff]  ;;  %v3899_v48 = vld [vmem:[%s5069_s6 + $0x50] sm:$0xff]  ;;  %v3901_v50 = vpack.c.bf16 %v470_v44, %v469_v43  ;;  %2760 = vmatprep.mubr.f32.mxu0 %v90_v45 }
  0x43   :  { %3131 = vmatpush3.bf16.msra.mxu0 %v3128_v23  ;;  %v86_v51 = vld [vmem:[%s5063_s0 + $0x60] sm:$0xff]  ;;  %v87_v52 = vld [vmem:[%s5063_s0 + $0x68] sm:$0xff]  ;;  %2816 = vmatprep.mubr.f32.mxu1 %v475_v46  ;;  %v88_v59 = vld [vmem:[%s5063_s0 + $0x70] sm:$0xff] }
  0x44   :  { %3163 = vmatpush3.bf16.msra.mxu1 %v3832_v24  ;;  %576 = vperm.xlu1 %3370, %v3847_v29   ;;  %5096 = vst [vmem:[#allocation17_spill] sm:$0xff] %v3901_v50  ;;  %v471_v53 = vld [vmem:[#allocation2 + $0x60] sm:$0xff]  ;;  %v472_v54 = vld [vmem:[#allocation2 + $0x68] sm:$0xff]  ;;  %v3144_v57 = vpack.c.bf16 %v87_v52, %v86_v51  ;;  %v89_v60 = vld [vmem:[%s5063_s0 + $0x78] sm:$0xff] }
  0x45   :  { %571 = vperm.xlu0 %3369, %v3852_v30   ;;  %3133 = vmatprep.subr.bf16.mxu0 %v3132_v31  ;;  %v3916_v55 = vld [vmem:[%s5069_s6 + $0x68] sm:$0xff]  ;;  %v3921_v56 = vld [vmem:[%s5069_s6 + $0x60] sm:$0xff]  ;;  %v3923_v58 = vpack.c.bf16 %v472_v54, %v471_v53  ;;  %v473_v61 = vld [vmem:[#allocation2 + $0x70] sm:$0xff]  ;;  %v3148_v3 = vpack.c.bf16 %v89_v60, %v88_v59 }
  0x46   :  { %3165 = vmatprep.subr.bf16.mxu1 %v3854_v32  ;;  %v474_v62 = vld [vmem:[#allocation2 + $0x78] sm:$0xff]  ;;  %v3943_v0 = vld [vmem:[%s5069_s6 + $0x70] sm:$0xff]  ;;  %v3954_v5 = vld [vmem:[%s5071_s8 + $0x8] sm:$0xff] }
  0x47   :  { %3135 = vmatpush3.bf16.msra.mxu0 %v3132_v31  ;;  %5097 = vst [vmem:[#allocation18_spill] sm:$0xff] %v3923_v58  ;;  %v3938_v63 = vld [vmem:[%s5069_s6 + $0x78] sm:$0xff]  ;;  %v3945_v4 = vpack.c.bf16 %v474_v62, %v473_v61  ;;  %v3959_v6 = vld [vmem:[%s5071_s8] sm:$0xff]  ;;  %v91_v7 = vld [vmem:[%s5066_s3 + $0x8] sm:$0xff]  ;;  %s3670_s6 = smov [#allocation8]  }
  0x48   :  { %3167 = vmatpush3.bf16.msra.mxu1 %v3854_v32  ;;  %586 = vperm.xlu1 %3370, %v3869_v37   ;;  %v476_v11 = vld [vmem:[#allocation5 + $0x8] sm:$0xff]  ;;  %v92_v12 = vld [vmem:[%s5066_s3 + $0x10] sm:$0xff]  ;;  %v3973_v14 = vld [vmem:[%s5071_s8 + $0x18] sm:$0xff] }
  0x49   :  { %581 = vperm.xlu0 %3369, %v3874_v38   ;;  %3137 = vmatprep.subr.bf16.mxu0 %v3136_v39  ;;  %5098 = vst [vmem:[#allocation19_spill] sm:$0xff] %v3945_v4  ;;  %v477_v13 = vld [vmem:[#allocation5 + $0x10] sm:$0xff]  ;;  %v93_v17 = vld [vmem:[%s5066_s3 + $0x18] sm:$0xff]  ;;  %v94_v19 = vld [vmem:[%s5066_s3 + $0x20] sm:$0xff] }
  0x4a   :  { %3169 = vmatprep.subr.bf16.mxu1 %v3876_v40  ;;  %v3978_v15 = vld [vmem:[%s5071_s8 + $0x10] sm:$0xff]  ;;  %v478_v18 = vld [vmem:[#allocation5 + $0x18] sm:$0xff]  ;;  %v479_v20 = vld [vmem:[#allocation5 + $0x20] sm:$0xff] }
  0x4b   :  { %3139 = vmatpush3.bf16.msra.mxu0 %v3136_v39  ;;  %v3991_v23 = vld [vmem:[%s5071_s8 + $0x28] sm:$0xff]  ;;  %v3996_v25 = vld [vmem:[%s5071_s8 + $0x20] sm:$0xff]  ;;  %v96_v28 = vld [vmem:[%s5066_s3 + $0x30] sm:$0xff] }
  0x4c   :  { %3171 = vmatpush3.bf16.msra.mxu1 %v3876_v40  ;;  %596 = vperm.xlu1 %3370, %v3894_v47   ;;  %v95_v26 = vld [vmem:[%s5066_s3 + $0x28] sm:$0xff]  ;;  %v481_v31 = vld [vmem:[#allocation5 + $0x30] sm:$0xff]  ;;  %v4009_v33 = vld [vmem:[%s5071_s8 + $0x38] sm:$0xff] }
  0x4d   :  { %591 = vperm.xlu0 %3369, %v3899_v48   ;;  %3141 = vmatprep.subr.bf16.mxu0 %v3140_v49  ;;  %v480_v27 = vld [vmem:[#allocation5 + $0x28] sm:$0xff]  ;;  %v4014_v34 = vld [vmem:[%s5071_s8 + $0x30] sm:$0xff]  ;;  %v97_v35 = vld [vmem:[%s5066_s3 + $0x38] sm:$0xff] }
  0x4e   :  { %3173 = vmatprep.subr.bf16.mxu1 %v3901_v50  ;;  %v482_v36 = vld [vmem:[#allocation5 + $0x38] sm:$0xff]  ;;  %v98_v39 = vld [vmem:[%s5066_s3 + $0x40] sm:$0xff]  ;;  %v4027_v42 = vld [vmem:[%s5067_s4 + $0x8] sm:$0xff] }
  0x4f   :  { %3143 = vmatpush3.bf16.msra.mxu0 %v3140_v49  ;;  %v483_v41 = vld [vmem:[#allocation5 + $0x40] sm:$0xff]  ;;  %v99_v44 = vld [vmem:[%s5066_s3 + $0x48] sm:$0xff]  ;;  %v100_v46 = vld [vmem:[%s5066_s3 + $0x50] sm:$0xff] }
  0x50   :  { %3175 = vmatpush3.bf16.msra.mxu1 %v3901_v50  ;;  %606 = vperm.xlu1 %3370, %v3916_v55   ;;  %v4032_v43 = vld [vmem:[%s5067_s4] sm:$0xff]  ;;  %v484_v45 = vld [vmem:[#allocation5 + $0x48] sm:$0xff]  ;;  %v485_v49 = vld [vmem:[#allocation5 + $0x50] sm:$0xff] }
  0x51   :  { %601 = vperm.xlu0 %3369, %v3921_v56   ;;  %3145 = vmatprep.subr.bf16.mxu0 %v3144_v57  ;;  %v4045_v51 = vld [vmem:[%s5071_s8 + $0x48] sm:$0xff]  ;;  %v4050_v52 = vld [vmem:[%s5071_s8 + $0x40] sm:$0xff]  ;;  %v101_v53 = vld [vmem:[%s5066_s3 + $0x58] sm:$0xff] }
  0x52   :  { %3177 = vmatprep.subr.bf16.mxu1 %v3923_v58  ;;  %v486_v54 = vld [vmem:[#allocation5 + $0x58] sm:$0xff]  ;;  %v487_v59 = vld [vmem:[#allocation5 + $0x60] sm:$0xff]  ;;  %v4063_v60 = vld [vmem:[%s5065_s2 + $0x8] sm:$0xff] }
  0x53   :  { %3147 = vmatpush3.bf16.msra.mxu0 %v3144_v57  ;;  %v102_v57 = vld [vmem:[%s5066_s3 + $0x60] sm:$0xff]  ;;  %v103_v62 = vld [vmem:[%s5066_s3 + $0x68] sm:$0xff]  ;;  %v4264_v32 = vld [vmem:[%s5067_s4 + $0x78] sm:$0xff] }
  0x54   :  { %3179 = vmatpush3.bf16.msra.mxu1 %v3923_v58  ;;  %616 = vperm.xlu1 %3370, %v3938_v63   ;;  %v4068_v61 = vld [vmem:[%s5065_s2] sm:$0xff]  ;;  %v4252_v50 = vld [vmem:[%s5065_s2 + $0x68] sm:$0xff]  ;;  %v4269_v24 = vld [vmem:[%s5067_s4 + $0x70] sm:$0xff] }
  0x55   :  { %611 = vperm.xlu0 %3369, %v3943_v0   ;;  %3149 = vmatprep.subr.bf16.mxu0 %v3148_v3  ;;  %v4245_v58 = vld [vmem:[%s5067_s4 + $0x60] sm:$0xff]  ;;  %5099 = vst [vmem:[#allocation20_spill] sm:$0xff] %v4252_v50  ;;  %v4276_v16 = vld [vmem:[%s5065_s2 + $0x78] sm:$0xff] }
  0x56   :  { %3181 = vmatprep.subr.bf16.mxu1 %v3945_v4  ;;  %v4257_v40 = vld [vmem:[%s5065_s2 + $0x60] sm:$0xff] }
  0x57   :  { %3151 = vmatpush3.bf16.msra.mxu0 %v3148_v3  ;;  %v488_v3 = vld [vmem:[#allocation5 + $0x68] sm:$0xff]  ;;  %5100 = vst [vmem:[#allocation21_spill] sm:$0xff] %v4257_v40 }
  0x58   :  { %3183 = vmatpush3.bf16.msra.mxu1 %v3945_v4  ;;  %851 = vperm.xlu1 %3370, %v3954_v5   ;;  %v4240_v4 = vld [vmem:[%s5067_s4 + $0x68] sm:$0xff] }
  0x59   :  { %846 = vperm.xlu0 %3369, %v3959_v6  }
  0x5a   :  { %2761 = vmatmul.mubr.f32.vlgmr.msra.gmra.mrb[0].mxu0 %v91_v7  ;;  %v104_v7 = vld [vmem:[%s5066_s3 + $0x70] sm:$0xff] }
  0x5b   :  { %2817 = vmatmul.mubr.f32.vlgmr.msra.gmra.mrb[0].mxu1 %v476_v11  ;;  %2763 = vmatprep.mubr.f32.mxu0 %v92_v12  ;;  %v489_v11 = vld [vmem:[#allocation5 + $0x70] sm:$0xff]  ;;  %v4081_v12 = vld [vmem:[%s5067_s4 + $0x18] sm:$0xff] }
  0x5c   :  { %2819 = vmatprep.mubr.f32.mxu1 %v477_v13  ;;  %861 = vperm.xlu1 %3370, %v3973_v14   ;;  %v4086_v13 = vld [vmem:[%s5067_s4 + $0x10] sm:$0xff] }
  0x5d   :  { %856 = vperm.xlu0 %3369, %v3978_v15  }
  0x5e   :  { %2764 = vmatmul.mubr.f32.gmra.mrb[2].mxu0 %v93_v17  ;;  %v105_v17 = vld [vmem:[%s5066_s3 + $0x78] sm:$0xff] }
  0x5f   :  { %2820 = vmatmul.mubr.f32.gmra.mrb[2].mxu1 %v478_v18  ;;  %2766 = vmatprep.mubr.f32.mxu0 %v94_v19  ;;  %v490_v18 = vld [vmem:[#allocation5 + $0x78] sm:$0xff] }
  0x60   :  { %2822 = vmatprep.mubr.f32.mxu1 %v479_v20  ;;  %871 = vperm.xlu1 %3370, %v3991_v23   ;;  %v4096_v19 = vld [vmem:[%s5071_s8 + $0x58] sm:$0xff]  ;;  %v4101_v20 = vld [vmem:[%s5071_s8 + $0x50] sm:$0xff] }
  0x61   :  { %866 = vperm.xlu0 %3369, %v3996_v25  }
  0x62   :  { %2767 = vmatmul.mubr.f32.gmra.mrb[4].mxu0 %v95_v26  ;;  %v4108_v26 = vld [vmem:[%s5065_s2 + $0x18] sm:$0xff] }
  0x63   :  { %2823 = vmatmul.mubr.f32.gmra.mrb[4].mxu1 %v480_v27  ;;  %2769 = vmatprep.mubr.f32.mxu0 %v96_v28  ;;  %v4113_v27 = vld [vmem:[%s5065_s2 + $0x10] sm:$0xff]  ;;  %v4120_v28 = vld [vmem:[%s5067_s4 + $0x28] sm:$0xff] }
  0x64   :  { %2825 = vmatprep.mubr.f32.mxu1 %v481_v31  ;;  %881 = vperm.xlu1 %3370, %v4009_v33   ;;  %v4125_v31 = vld [vmem:[%s5067_s4 + $0x20] sm:$0xff] }
  0x65   :  { %876 = vperm.xlu0 %3369, %v4014_v34  }
  0x66   :  { %2770 = vmatmul.mubr.f32.gmra.mrb[6].mxu0 %v97_v35  ;;  %v4132_v35 = vld [vmem:[%s5071_s8 + $0x68] sm:$0xff] }
  0x67   :  { %2826 = vmatmul.mubr.f32.gmra.mrb[6].mxu1 %v482_v36  ;;  %2772 = vmatprep.mubr.f32.mxu0 %v98_v39  ;;  %v4137_v36 = vld [vmem:[%s5071_s8 + $0x60] sm:$0xff]  ;;  %v4144_v39 = vld [vmem:[%s5065_s2 + $0x28] sm:$0xff] }
  0x68   :  { %2828 = vmatprep.mubr.f32.mxu1 %v483_v41  ;;  %129 = vperm.xlu1 %3370, %v4027_v42   ;;  %v4149_v41 = vld [vmem:[%s5065_s2 + $0x20] sm:$0xff] }
  0x69   :  { %124 = vperm.xlu0 %3369, %v4032_v43  }
  0x6a   :  { %2773 = vmatmul.mubr.f32.gmra.mrb[8].mxu0 %v99_v44  ;;  %v4156_v44 = vld [vmem:[%s5067_s4 + $0x38] sm:$0xff] }
  0x6b   :  { %2829 = vmatmul.mubr.f32.gmra.mrb[8].mxu1 %v484_v45  ;;  %2775 = vmatprep.mubr.f32.mxu0 %v100_v46  ;;  %v4161_v45 = vld [vmem:[%s5067_s4 + $0x30] sm:$0xff]  ;;  %v4168_v46 = vld [vmem:[%s5071_s8 + $0x78] sm:$0xff] }
  0x6c   :  { %2831 = vmatprep.mubr.f32.mxu1 %v485_v49  ;;  %891 = vperm.xlu1 %3370, %v4045_v51   ;;  %v4173_v49 = vld [vmem:[%s5071_s8 + $0x70] sm:$0xff] }
  0x6d   :  { %886 = vperm.xlu0 %3369, %v4050_v52  }
  0x6e   :  { %2776 = vmatmul.mubr.f32.gmra.mrb[10].mxu0 %v101_v53  ;;  %v4180_v53 = vld [vmem:[%s5065_s2 + $0x38] sm:$0xff] }
  0x6f   :  { %2832 = vmatmul.mubr.f32.gmra.mrb[10].mxu1 %v486_v54  ;;  %2778 = vmatprep.mubr.f32.mxu0 %v102_v57  ;;  %v4185_v54 = vld [vmem:[%s5065_s2 + $0x30] sm:$0xff]  ;;  %v4192_v57 = vld [vmem:[%s5067_s4 + $0x48] sm:$0xff] }
  0x70   :  { %2834 = vmatprep.mubr.f32.mxu1 %v487_v59  ;;  %370 = vperm.xlu1 %3370, %v4063_v60   ;;  %v4197_v59 = vld [vmem:[%s5067_s4 + $0x40] sm:$0xff] }
  0x71   :  { %365 = vperm.xlu0 %3369, %v4068_v61  }
  0x72   :  { %2779 = vmatmul.mubr.f32.gmra.mrb[12].mxu0 %v103_v62  ;;  %v4204_v62 = vld [vmem:[%s5065_s2 + $0x48] sm:$0xff] }
  0x73   :  { %2835 = vmatmul.mubr.f32.gmra.mrb[12].mxu1 %v488_v3  ;;  %2781 = vmatprep.mubr.f32.mxu0 %v104_v7  ;;  %v4209_v3 = vld [vmem:[%s5065_s2 + $0x40] sm:$0xff]  ;;  %v4216_v7 = vld [vmem:[%s5067_s4 + $0x58] sm:$0xff] }
  0x74   :  { %2837 = vmatprep.mubr.f32.mxu1 %v489_v11  ;;  %139 = vperm.xlu1 %3370, %v4081_v12   ;;  %v4221_v11 = vld [vmem:[%s5067_s4 + $0x50] sm:$0xff] }
  0x75   :  { %134 = vperm.xlu0 %3369, %v4086_v13  }
  0x76   :  { %2782 = vmatmul.mubr.f32.gmra.mrb[14].mxu0 %v105_v17  ;;  %v4228_v17 = vld [vmem:[%s5065_s2 + $0x58] sm:$0xff] }
  0x77   :  { %2838 = vmatmul.mubr.f32.gmra.mrb[14].mxu1 %v490_v18  ;;  %v4233_v18 = vld [vmem:[%s5065_s2 + $0x50] sm:$0xff] }
  0x78   :  { %901 = vperm.xlu1 %3370, %v4096_v19  }
  0x79   :  { %896 = vperm.xlu0 %3369, %v4101_v20  }
  0x7c   :  { %380 = vperm.xlu1 %3370, %v4108_v26  }
  0x7d   :  { %375 = vperm.xlu0 %3369, %v4113_v27  }
  0x80   :  { %149 = vperm.xlu1 %3370, %v4120_v28  }
  0x81   :  { %144 = vperm.xlu0 %3369, %v4125_v31  }
  0x84   :  { %911 = vperm.xlu1 %3370, %v4132_v35  }
  0x85   :  { %906 = vperm.xlu0 %3369, %v4137_v36  }
  0x88   :  { %390 = vperm.xlu1 %3370, %v4144_v39  }
  0x89   :  { %385 = vperm.xlu0 %3369, %v4149_v41  }
  0x8c   :  { %159 = vperm.xlu1 %3370, %v4156_v44  }
  0x8d   :  { %154 = vperm.xlu0 %3369, %v4161_v45  }
  0x90   :  { %921 = vperm.xlu1 %3370, %v4168_v46  }
  0x91   :  { %916 = vperm.xlu0 %3369, %v4173_v49  }
  0x94   :  { %400 = vperm.xlu1 %3370, %v4180_v53  }
  0x95   :  { %395 = vperm.xlu0 %3369, %v4185_v54  }
  0x98   :  { %169 = vperm.xlu1 %3370, %v4192_v57  }
  0x99   :  { %164 = vperm.xlu0 %3369, %v4197_v59  }
  0x9c   :  { %410 = vperm.xlu1 %3370, %v4204_v62  }
  0x9d   :  { %405 = vperm.xlu0 %3369, %v4209_v3  }
  0xa0   :  { %179 = vperm.xlu1 %3370, %v4216_v7  }
  0xa1   :  { %174 = vperm.xlu0 %3369, %v4221_v11  }
  0xa4   :  { %420 = vperm.xlu1 %3370, %v4228_v17  }
  0xa5   :  { %415 = vperm.xlu0 %3369, %v4233_v18  }
  0xa8   :  { %189 = vperm.xlu1 %3370, %v4240_v4  }
  0xa9   :  { %184 = vperm.xlu0 %3369, %v4245_v58  }
  0xac   :  { %430 = vperm.xlu1 %3370, %v4252_v50   ;;  %v4281_v50 = vld [vmem:[%s5065_s2 + $0x70] sm:$0xff] }
  0xad   :  { %425 = vperm.xlu0 %3369, %v4257_v40   ;;  %v507_v40 = vld [vmem:[#allocation7] sm:$0xff] }
  0xae   :  { %2872 = vmatprep.mubr.f32.mxu0 %v507_v40 }
  0xb0   :  { %199 = vperm.xlu1 %3370, %v4264_v32  }
  0xb1   :  { %194 = vperm.xlu0 %3369, %v4269_v24  }
  0xb4   :  { %440 = vperm.xlu1 %3370, %v4276_v16  }
  0xb5   :  { %435 = vperm.xlu0 %3369, %v4281_v50  }
  0xb8   :  { %3372 = vset.pattern.permute.xlu1 %v3668_v8 }
  0xb9   :  { %3371 = vset.pattern.permute.xlu0 %v3668_v8  ;;  %1590 = vperm.xlu1 %3372, %v3801_v10  }
  0xba   :  { %1586 = vperm.xlu0 %3371, %v3781_v2   ;;  %v542_v2 = vpop.permute.xlu0 %541 }
  0xbd   :  { %1594 = vperm.xlu1 %3372, %v3776_v1   ;;  %v552_v1 = vpop.permute.xlu1 %551 }
  0xbe   :  { %1598 = vperm.xlu0 %3371, %v3796_v9   ;;  %v547_v9 = vpop.permute.xlu0 %546 }
  0xc1   :  { %1602 = vperm.xlu1 %3372, %v3830_v22   ;;  %v557_v8 = vpop.permute.xlu1 %556 }
  0xc2   :  { %1606 = vperm.xlu0 %3371, %v3825_v21   ;;  %v562_v21 = vpop.permute.xlu0 %561 }
  0xc5   :  { %1610 = vperm.xlu1 %3372, %v3852_v30   ;;  %v567_v10 = vpop.permute.xlu1 %566 }
  0xc6   :  { %1614 = vperm.xlu0 %3371, %v3847_v29   ;;  %v572_v29 = vpop.permute.xlu0 %571 }
  0xc9   :  { %1618 = vperm.xlu1 %3372, %v3874_v38   ;;  %v577_v22 = vpop.permute.xlu1 %576 }
  0xca   :  { %1622 = vperm.xlu0 %3371, %v3869_v37   ;;  %v4315_v37 = vpop.permute.xlu0 %581 }
  0xcd   :  { %1626 = vperm.xlu1 %3372, %v3899_v48   ;;  %v587_v30 = vpop.permute.xlu1 %586 }
  0xce   :  { %1630 = vperm.xlu0 %3371, %v3894_v47  }
  0xd1   :  { %1634 = vperm.xlu1 %3372, %v3921_v56  }
  0xd2   :  { %1638 = vperm.xlu0 %3371, %v3916_v55  }
  0xd5   :  { %1642 = vperm.xlu1 %3372, %v3943_v0  }
  0xd6   :  { %1646 = vperm.xlu0 %3371, %v3938_v63  }
  0xd9   :  { %1875 = vperm.xlu1 %3372, %v3959_v6  }
  0xda   :  { %1879 = vperm.xlu0 %3371, %v3954_v5  }
  0xdd   :  { %1883 = vperm.xlu1 %3372, %v3978_v15  }
  0xde   :  { %1887 = vperm.xlu0 %3371, %v3973_v14  }
  0xe1   :  { %1891 = vperm.xlu1 %3372, %v3996_v25  }
  0xe2   :  { %1895 = vperm.xlu0 %3371, %v3991_v23  }
  0xe5   :  { %1899 = vperm.xlu1 %3372, %v4014_v34   ;;  %v592_v34 = vpop.permute.xlu0 %591 }
  0xe6   :  { %1903 = vperm.xlu0 %3371, %v4009_v33   ;;  %v597_v33 = vpop.permute.xlu1 %596 }
  0xe9   :  { %1263 = vperm.xlu1 %3372, %v4032_v43  }
  0xea   :  { %1267 = vperm.xlu0 %3371, %v4027_v42  }
  0xed   :  { %1907 = vperm.xlu1 %3372, %v4050_v52  }
  0xee   :  { %1911 = vperm.xlu0 %3371, %v4045_v51  }
  0xf1   :  { %1472 = vperm.xlu1 %3372, %v4068_v61  }
  0xf2   :  { %1476 = vperm.xlu0 %3371, %v4063_v60  }
  0xf5   :  { %1271 = vperm.xlu1 %3372, %v4086_v13  }
  0xf6   :  { %1275 = vperm.xlu0 %3371, %v4081_v12  }
  0xf9   :  { %1915 = vperm.xlu1 %3372, %v4101_v20  }
  0xfa   :  { %1919 = vperm.xlu0 %3371, %v4096_v19  }
  0xfd   :  { %1480 = vperm.xlu1 %3372, %v4113_v27   ;;  %v607_v27 = vpop.permute.xlu1 %606 }
  0xfe   :  { %1484 = vperm.xlu0 %3371, %v4108_v26  }
 0x101   :  { %1279 = vperm.xlu1 %3372, %v4125_v31  }
 0x102   :  { %1283 = vperm.xlu0 %3371, %v4120_v28  }
 0x105   :  { %1923 = vperm.xlu1 %3372, %v4137_v36  }
 0x106   :  { %1927 = vperm.xlu0 %3371, %v4132_v35  }
 0x109   :  { %1488 = vperm.xlu1 %3372, %v4149_v41  }
 0x10a   :  { %1492 = vperm.xlu0 %3371, %v4144_v39  }
 0x10d   :  { %1287 = vperm.xlu1 %3372, %v4161_v45  }
 0x10e   :  { %1291 = vperm.xlu0 %3371, %v4156_v44  }
 0x111   :  { %1931 = vperm.xlu1 %3372, %v4173_v49  }
 0x112   :  { %1935 = vperm.xlu0 %3371, %v4168_v46  }
 0x115   :  { %1496 = vperm.xlu1 %3372, %v4185_v54  }
 0x12d   :  { %v4317_v38 = vpop.f32.mrb[0].mxu0 }
 0x12e   :  { %v2818_v40 = vpop.f32.mrb[0].mxu1  ;;  %v4319_v48 = vpop.f32.mrb[1].mxu0 }
 0x12f   :  { %v691_v47 = vadd.f32 %v2818_v40, %v547_v9  ;;  %v685_v55 = vpop.f32.mrb[1].mxu1  ;;  %v4351_v40 = vpop.permute.xlu0 %601  ;;  %1500 = vperm.xlu0 %3371, %v4180_v53  }
 0x130   :  { %v686_v56 = vadd.f32 %v685_v55, %v542_v2 }
 0x131   :  { %v781_v63 = vmul.f32 0.70710677, %v691_v47  ;;  %v4323_v5 = vpop.f32.mrb[2].mxu0 }
 0x132   :  { %v780_v0 = vmul.f32 0.70710677, %v686_v56  ;;  %v2821_v6 = vpop.f32.mrb[2].mxu1  ;;  %v4325_v15 = vpop.f32.mrb[3].mxu0 }
 0x133   :  { %3375 = verf.f32 %v781_v63  ;;  %v701_v14 = vadd.f32 %v2821_v6, %v557_v8  ;;  %v695_v23 = vpop.f32.mrb[3].mxu1 }
 0x134   :  { %3377 = verf.f32 %v780_v0  ;;  %v696_v25 = vadd.f32 %v695_v23, %v552_v1 }
 0x135   :  { %v783_v42 = vmul.f32 0.70710677, %v701_v14  ;;  %v4329_v51 = vpop.f32.mrb[4].mxu0 }
 0x136   :  { %v782_v43 = vmul.f32 0.70710677, %v696_v25  ;;  %v2824_v52 = vpop.f32.mrb[4].mxu1  ;;  %v4333_v61 = vpop.f32.mrb[5].mxu0 }
 0x137   :  { %3379 = verf.f32 %v783_v42  ;;  %v4331_v60 = vadd.f32 %v2824_v52, %v567_v10  ;;  %v705_v12 = vpop.f32.mrb[5].mxu1 }
 0x138   :  { %3381 = verf.f32 %v782_v43  ;;  %v4335_v13 = vadd.f32 %v705_v12, %v562_v21  ;;  %v765_v43 = vmul.f32 0.5, %v691_v47 }
 0x139   :  { %v785_v19 = vmul.f32 0.70710677, %v4331_v60  ;;  %v4341_v1 = vpop.f32.mrb[6].mxu0 }
 0x13a   :  { %v784_v20 = vmul.f32 0.70710677, %v4335_v13  ;;  %v2827_v2 = vpop.f32.mrb[6].mxu1  ;;  %v4345_v9 = vpop.f32.mrb[7].mxu0 }
 0x13b   :  { %3383 = verf.f32 %v785_v19  ;;  %v4343_v8 = vadd.f32 %v2827_v2, %v577_v22  ;;  %v715_v10 = vpop.f32.mrb[7].mxu1  ;;  %v764_v19 = vmul.f32 0.5, %v686_v56 }
 0x13c   :  { %3385 = verf.f32 %v784_v20  ;;  %v4347_v21 = vadd.f32 %v715_v10, %v572_v29  ;;  %v767_v20 = vmul.f32 0.5, %v701_v14 }
 0x13d   :  { %v3376_v26 = vpop.eup %3375  ;;  %v787_v55 = vmul.f32 0.70710677, %v4343_v8  ;;  %v4355_v6 = vpop.f32.mrb[8].mxu0 }
 0x13e   :  { %v3378_v63 = vpop.eup %3377  ;;  %v813_v0 = vadd.f32 1.0, %v3376_v26  ;;  %v786_v22 = vmul.f32 0.70710677, %v4347_v21  ;;  %v2830_v23 = vpop.f32.mrb[8].mxu1 }
 0x13f   :  { %v812_v42 = vadd.f32 1.0, %v3378_v63  ;;  %3387 = verf.f32 %v787_v55  ;;  %v4357_v29 = vadd.f32 %v2830_v23, %v587_v30  ;;  %v4359_v31 = vpop.f32.mrb[9].mxu0  ;;  %v725_v28 = vpop.f32.mrb[9].mxu1  ;;  %v766_v55 = vmul.f32 0.5, %v696_v25 }
 0x140   :  { %3389 = verf.f32 %v786_v22  ;;  %v4362_v52 = vadd.f32 %v725_v28, %v4315_v37  ;;  %v829_v30 = vmul.f32 %v813_v0, %v765_v43  ;;  %v617_v0 = vpop.permute.xlu1 %616  ;;  %v612_v28 = vpop.permute.xlu0 %611  ;;  %1295 = vperm.xlu1 %3372, %v4197_v59   ;;  %1299 = vperm.xlu0 %3371, %v4192_v57  }
 0x141   :  { %v3380_v12 = vpop.eup %3379  ;;  %v789_v2 = vmul.f32 0.70710677, %v4357_v29  ;;  %v4368_v47 = vpop.f32.mrb[10].mxu0  ;;  %v828_v37 = vmul.f32 %v812_v42, %v764_v19 }
 0x142   :  { %v3382_v10 = vpop.eup %3381  ;;  %v815_v26 = vadd.f32 1.0, %v3380_v12  ;;  %v788_v63 = vmul.f32 0.70710677, %v4362_v52  ;;  %v2833_v22 = vpop.f32.mrb[10].mxu1 }
 0x143   :  { %v814_v23 = vadd.f32 1.0, %v3382_v10  ;;  %3391 = verf.f32 %v789_v2  ;;  %v4370_v36 = vadd.f32 %v2833_v22, %v597_v33  ;;  %v4372_v35 = vpop.f32.mrb[11].mxu0  ;;  %v735_v56 = vpop.f32.mrb[11].mxu1  ;;  %v3184_v22 = vpack.c.bf16 %v829_v30, %v828_v37 }
 0x144   :  { %3393 = verf.f32 %v788_v63  ;;  %v4374_v14 = vadd.f32 %v735_v56, %v592_v34  ;;  %v831_v43 = vmul.f32 %v815_v26, %v767_v20  ;;  %v769_v56 = vmul.f32 0.5, %v4331_v60 }
 0x145   :  { %v3384_v25 = vpop.eup %3383  ;;  %v830_v12 = vmul.f32 %v814_v23, %v766_v55  ;;  %v791_v42 = vmul.f32 0.70710677, %v4370_v36  ;;  %v4380_v2 = vpop.f32.mrb[12].mxu0  ;;  %v768_v55 = vmul.f32 0.5, %v4335_v13  ;;  %v771_v23 = vmul.f32 0.5, %v4343_v8  ;;  %3185 = vmatprep.subr.bf16.mxu0 %v3184_v22 }
 0x146   :  { %v3386_v19 = vpop.eup %3385  ;;  %v790_v33 = vmul.f32 0.70710677, %v4374_v14  ;;  %v2836_v10 = vpop.f32.mrb[12].mxu1  ;;  %v817_v63 = vadd.f32 1.0, %v3384_v25  ;;  %v770_v60 = vmul.f32 0.5, %v4347_v21  ;;  %3187 = vmatpush3.bf16.msra.mxu0 %v3184_v22 }
 0x147   :  { %v816_v34 = vadd.f32 1.0, %v3386_v19  ;;  %3395 = verf.f32 %v791_v42  ;;  %v4382_v41 = vpop.f32.mrb[13].mxu0  ;;  %v745_v39 = vpop.f32.mrb[13].mxu1  ;;  %v4385_v20 = vadd.f32 %v2836_v10, %v607_v27  ;;  %v3188_v37 = vpack.c.bf16 %v831_v43, %v830_v12 }
 0x148   :  { %3397 = verf.f32 %v790_v33  ;;  %v4392_v30 = vadd.f32 %v745_v39, %v4351_v40  ;;  %v833_v19 = vmul.f32 %v817_v63, %v769_v56  ;;  %v4401_v43 = vpop.permute.xlu1 %851  ;;  %v4403_v12 = vpop.permute.xlu0 %846  ;;  %1504 = vperm.xlu1 %3372, %v4209_v3   ;;  %1508 = vperm.xlu0 %3371, %v4204_v62  }
 0x149   :  { %v3388_v26 = vpop.eup %3387  ;;  %v793_v27 = vmul.f32 0.70710677, %v4385_v20  ;;  %v4396_v45 = vpop.f32.mrb[14].mxu0  ;;  %v832_v33 = vmul.f32 %v816_v34, %v768_v55  ;;  %3189 = vmatprep.subr.bf16.mxu0 %v3188_v37 }
 0x14a   :  { %v3390_v25 = vpop.eup %3389  ;;  %v819_v42 = vadd.f32 1.0, %v3388_v26  ;;  %5101 = vst [vmem:[#allocation22_spill] sm:$0xff] %v4396_v45  ;;  %v2839_v44 = vpop.f32.mrb[14].mxu1  ;;  %v792_v8 = vmul.f32 0.70710677, %v4392_v30  ;;  %v773_v26 = vmul.f32 0.5, %v4357_v29  ;;  %3191 = vmatpush3.bf16.msra.mxu0 %v3188_v37 }
 0x14b   :  { %v818_v13 = vadd.f32 1.0, %v3390_v25  ;;  %v4399_v10 = vpop.f32.mrb[15].mxu0  ;;  %v755_v40 = vpop.f32.mrb[15].mxu1  ;;  %3399 = verf.f32 %v793_v27  ;;  %v761_v39 = vadd.f32 %v2839_v44, %v617_v0  ;;  %v774_v44 = vmul.f32 0.5, %v4374_v14 }
 0x14c   :  { %5102 = vst [vmem:[#allocation23_spill] sm:$0xff] %v4399_v10  ;;  %v835_v21 = vmul.f32 %v819_v42, %v771_v23  ;;  %3401 = verf.f32 %v792_v8  ;;  %v756_v22 = vadd.f32 %v755_v40, %v612_v28  ;;  %v772_v10 = vmul.f32 0.5, %v4362_v52  ;;  %v4413_v37 = vpop.permute.xlu0 %856  ;;  %1307 = vperm.xlu0 %3371, %v4216_v7   ;;  %v508_v7 = vld [vmem:[#allocation7 + $0x8] sm:$0xff] }
 0x14d   :  { %v3392_v63 = vpop.eup %3391  ;;  %v834_v34 = vmul.f32 %v818_v13, %v770_v60  ;;  %v795_v25 = vmul.f32 0.70710677, %v761_v39  ;;  %v3192_v42 = vpack.c.bf16 %v833_v19, %v832_v33  ;;  %v4411_v60 = vpop.permute.xlu1 %861  ;;  %v775_v52 = vmul.f32 0.5, %v4370_v36  ;;  %1303 = vperm.xlu1 %3372, %v4221_v11  }
 0x14e   :  { %v3394_v56 = vpop.eup %3393  ;;  %v821_v55 = vadd.f32 1.0, %v3392_v63  ;;  %v794_v23 = vmul.f32 0.70710677, %v756_v22  ;;  %v777_v8 = vmul.f32 0.5, %v4385_v20  ;;  %v779_v20 = vmul.f32 0.5, %v761_v39 }
 0x14f   :  { %v820_v45 = vadd.f32 1.0, %v3394_v56  ;;  %3403 = verf.f32 %v795_v25  ;;  %v3196_v49 = vpack.c.bf16 %v835_v21, %v834_v34  ;;  %3193 = vmatprep.subr.bf16.mxu0 %v3192_v42  ;;  %v776_v21 = vmul.f32 0.5, %v4392_v30 }
 0x150   :  { %v837_v0 = vmul.f32 %v821_v55, %v773_v26  ;;  %3405 = verf.f32 %v794_v23  ;;  %3195 = vmatpush3.bf16.msra.mxu0 %v3192_v42  ;;  %v4422_v14 = vpop.permute.xlu0 %866  ;;  %v778_v55 = vmul.f32 0.5, %v756_v22  ;;  %1516 = vperm.xlu0 %3371, %v4228_v17   ;;  %v5103_v22 = vld [vmem:[#allocation12_spill] sm:$0xff] }
 0x151   :  { %v3396_v46 = vpop.eup %3395  ;;  %v836_v28 = vmul.f32 %v820_v45, %v772_v10  ;;  %3197 = vmatprep.subr.bf16.mxu0 %v3196_v49  ;;  %v4420_v40 = vpop.permute.xlu1 %871  ;;  %1512 = vperm.xlu1 %3372, %v4233_v18   ;;  %v5105_v18 = vld [vmem:[#allocation20_spill] sm:$0xff] }
 0x152   :  { %v3398_v29 = vpop.eup %3397  ;;  %v823_v27 = vadd.f32 1.0, %v3396_v46  ;;  %v5104_v46 = vld [vmem:[#allocation21_spill] sm:$0xff] }
 0x153   :  { %v822_v19 = vadd.f32 1.0, %v3398_v29  ;;  %v3200_v54 = vpack.c.bf16 %v837_v0, %v836_v28  ;;  %v5106_v29 = vld [vmem:[#allocation13_spill] sm:$0xff] }
 0x154   :  { %v839_v33 = vmul.f32 %v823_v27, %v775_v52  ;;  %3199 = vmatpush3.bf16.msra.mxu0 %v3196_v49  ;;  %v4431_v3 = vpop.permute.xlu0 %876  ;;  %1315 = vperm.xlu0 %3371, %v4240_v4   ;;  %v509_v49 = vld [vmem:[#allocation7 + $0x10] sm:$0xff]  ;;  %v511_v4 = vld [vmem:[#allocation7 + $0x20] sm:$0xff]  ;;  %v512_v52 = vld [vmem:[#allocation7 + $0x28] sm:$0xff] }
 0x155   :  { %v838_v53 = vmul.f32 %v822_v19, %v774_v44  ;;  %v3400_v45 = vpop.eup %3399  ;;  %3201 = vmatprep.subr.bf16.mxu0 %v3200_v54  ;;  %v4429_v42 = vpop.permute.xlu1 %881  ;;  %1311 = vperm.xlu1 %3372, %v4245_v58   ;;  %v510_v58 = vld [vmem:[#allocation7 + $0x18] sm:$0xff]  ;;  %v513_v44 = vld [vmem:[#allocation7 + $0x30] sm:$0xff] }
 0x156   :  { %v3402_v13 = vpop.eup %3401  ;;  %v825_v10 = vadd.f32 1.0, %v3400_v45  ;;  %v5107_v27 = vld [vmem:[#allocation14_spill] sm:$0xff]  ;;  %v5109_v45 = vld [vmem:[#allocation16_spill] sm:$0xff] }
 0x157   :  { %v3204_v36 = vpack.c.bf16 %v839_v33, %v838_v53  ;;  %v824_v63 = vadd.f32 1.0, %v3402_v13  ;;  %v515_v33 = vld [vmem:[#allocation7 + $0x40] sm:$0xff]  ;;  %v516_v53 = vld [vmem:[#allocation7 + $0x48] sm:$0xff]  ;;  %v517_v13 = vld [vmem:[#allocation7 + $0x50] sm:$0xff] }
 0x158   :  { %v841_v57 = vmul.f32 %v825_v10, %v777_v8  ;;  %3203 = vmatpush3.bf16.msra.mxu0 %v3200_v54  ;;  %v4437_v11 = vpop.permute.xlu0 %124  ;;  %1524 = vperm.xlu0 %3371, %v5105_v18   ;;  %v519_v8 = vld [vmem:[#allocation7 + $0x60] sm:$0xff]  ;;  %v520_v10 = vld [vmem:[#allocation7 + $0x68] sm:$0xff]  ;;  %v1567_v18 = vld [vmem:[#allocation5 + $0xf8] sm:$0xff] }
 0x159   :  { %v3404_v59 = vpop.eup %3403  ;;  %v840_v34 = vmul.f32 %v824_v63, %v776_v21  ;;  %3205 = vmatprep.subr.bf16.mxu0 %v3204_v36  ;;  %v4435_v39 = vpop.permute.xlu1 %129  ;;  %1520 = vperm.xlu1 %3372, %v5104_v46   ;;  %v521_v21 = vld [vmem:[#allocation7 + $0x70] sm:$0xff]  ;;  %v522_v63 = vld [vmem:[#allocation7 + $0x78] sm:$0xff] }
 0x15a   :  { %v3406_v56 = vpop.eup %3405  ;;  %v827_v26 = vadd.f32 1.0, %v3404_v59  ;;  %v1552_v59 = vld [vmem:[#allocation5 + $0x80] sm:$0xff]  ;;  %v1566_v46 = vld [vmem:[#allocation5 + $0xf0] sm:$0xff] }
 0x15b   :  { %v826_v25 = vadd.f32 1.0, %v3406_v56  ;;  %v3208_v23 = vpack.c.bf16 %v841_v57, %v840_v34  ;;  %v5112_v57 = vld [vmem:[#allocation19_spill] sm:$0xff]  ;;  %v1553_v34 = vld [vmem:[#allocation5 + $0x88] sm:$0xff]  ;;  %v1554_v56 = vld [vmem:[#allocation5 + $0x90] sm:$0xff] }
 0x15c   :  { %v843_v30 = vmul.f32 %v827_v26, %v779_v20  ;;  %3207 = vmatpush3.bf16.msra.mxu0 %v3204_v36  ;;  %v4446_v28 = vpop.permute.xlu0 %886  ;;  %1323 = vperm.xlu0 %3371, %v4264_v32   ;;  %v5108_v32 = vld [vmem:[#allocation15_spill] sm:$0xff]  ;;  %v5111_v36 = vld [vmem:[#allocation18_spill] sm:$0xff] }
 0x15d   :  { %v842_v62 = vmul.f32 %v826_v25, %v778_v55  ;;  %3209 = vmatprep.subr.bf16.mxu0 %v3208_v23  ;;  %v4444_v17 = vpop.permute.xlu1 %891  ;;  %1319 = vperm.xlu1 %3372, %v4269_v24   ;;  %v514_v24 = vld [vmem:[#allocation7 + $0x38] sm:$0xff]  ;;  %v1556_v26 = vld [vmem:[#allocation5 + $0xa0] sm:$0xff]  ;;  %v1557_v55 = vld [vmem:[#allocation5 + $0xa8] sm:$0xff] }
 0x15e   :  { %v1555_v20 = vld [vmem:[#allocation5 + $0x98] sm:$0xff]  ;;  %v1558_v25 = vld [vmem:[#allocation5 + $0xb0] sm:$0xff] }
 0x15f   :  { %v3212_v0 = vpack.c.bf16 %v843_v30, %v842_v62  ;;  %v1560_v30 = vld [vmem:[#allocation5 + $0xc0] sm:$0xff]  ;;  %v1561_v62 = vld [vmem:[#allocation5 + $0xc8] sm:$0xff] }
 0x160   :  { %3211 = vmatpush3.bf16.msra.mxu0 %v3208_v23  ;;  %v4456_v54 = vpop.permute.xlu0 %365  ;;  %1532 = vperm.xlu0 %3371, %v4276_v16   ;;  %v518_v16 = vld [vmem:[#allocation7 + $0x58] sm:$0xff] }
 0x161   :  { %3213 = vmatprep.subr.bf16.mxu0 %v3212_v0  ;;  %v4454_v19 = vpop.permute.xlu1 %370  ;;  %1528 = vperm.xlu1 %3372, %v4281_v50   ;;  %v5110_v50 = vld [vmem:[#allocation17_spill] sm:$0xff]  ;;  %v1559_v23 = vld [vmem:[#allocation5 + $0xb8] sm:$0xff] }
 0x164   :  { %3215 = vmatpush3.bf16.msra.mxu0 %v3212_v0  ;;  %v1562_v0 = vld [vmem:[#allocation5 + $0xd0] sm:$0xff] }
 0x165   :  { %3249 = vmatprep.subr.bf16.mxu0 %v5103_v22 }
 0x167   :  { %2873 = vmatmul.mubr.f32.vlgmr.msra.gmra.mrb[16].mxu0 %v508_v7  ;;  %v1563_v7 = vld [vmem:[#allocation5 + $0xd8] sm:$0xff] }
 0x168   :  { %3251 = vmatpush3.bf16.msra.mxu0 %v5103_v22  ;;  %2875 = vmatprep.mubr.f32.mxu0 %v509_v49  ;;  %v1564_v22 = vld [vmem:[#allocation5 + $0xe0] sm:$0xff]  ;;  %v1565_v49 = vld [vmem:[#allocation5 + $0xe8] sm:$0xff] }
 0x169   :  { %3253 = vmatprep.subr.bf16.mxu0 %v5106_v29 }
 0x16b   :  { %2876 = vmatmul.mubr.f32.gmra.mrb[18].mxu0 %v510_v58  ;;  %v140_v58 = vpop.permute.xlu1 %139 }
 0x16c   :  { %3255 = vmatpush3.bf16.msra.mxu0 %v5106_v29  ;;  %2878 = vmatprep.mubr.f32.mxu0 %v511_v4  ;;  %v135_v29 = vpop.permute.xlu0 %134 }
 0x16d   :  { %3257 = vmatprep.subr.bf16.mxu0 %v5107_v27 }
 0x16f   :  { %2879 = vmatmul.mubr.f32.gmra.mrb[20].mxu0 %v512_v52  ;;  %v4471_v4 = vpop.permute.xlu1 %901 }
 0x170   :  { %3259 = vmatpush3.bf16.msra.mxu0 %v5107_v27  ;;  %2881 = vmatprep.mubr.f32.mxu0 %v513_v44  ;;  %v4473_v52 = vpop.permute.xlu0 %896 }
 0x171   :  { %3261 = vmatprep.subr.bf16.mxu0 %v5108_v32 }
 0x173   :  { %2882 = vmatmul.mubr.f32.gmra.mrb[22].mxu0 %v514_v24  ;;  %v381_v27 = vpop.permute.xlu1 %380 }
 0x174   :  { %3263 = vmatpush3.bf16.msra.mxu0 %v5108_v32  ;;  %2884 = vmatprep.mubr.f32.mxu0 %v515_v33  ;;  %v376_v44 = vpop.permute.xlu0 %375 }
 0x175   :  { %3265 = vmatprep.subr.bf16.mxu0 %v5109_v45 }
 0x177   :  { %2885 = vmatmul.mubr.f32.gmra.mrb[24].mxu0 %v516_v53  ;;  %v150_v24 = vpop.permute.xlu1 %149 }
 0x178   :  { %3267 = vmatpush3.bf16.msra.mxu0 %v5109_v45  ;;  %2887 = vmatprep.mubr.f32.mxu0 %v517_v13  ;;  %v145_v32 = vpop.permute.xlu0 %144 }
 0x179   :  { %3269 = vmatprep.subr.bf16.mxu0 %v5110_v50 }
 0x17b   :  { %2888 = vmatmul.mubr.f32.gmra.mrb[26].mxu0 %v518_v16  ;;  %v4475_v33 = vpop.permute.xlu1 %911 }
 0x17c   :  { %3271 = vmatpush3.bf16.msra.mxu0 %v5110_v50  ;;  %2890 = vmatprep.mubr.f32.mxu0 %v519_v8  ;;  %5113 = vst [vmem:[#allocation12_spill] sm:$0xff] %v4475_v33  ;;  %v4477_v53 = vpop.permute.xlu0 %906  ;;  %v289_v33 = vadd.f32 %v4333_v61, %v145_v32 }
 0x17d   :  { %3273 = vmatprep.subr.bf16.mxu0 %v5111_v36  ;;  %5114 = vst [vmem:[#allocation21_spill] sm:$0xff] %v4477_v53  ;;  %v294_v53 = vadd.f32 %v4329_v51, %v150_v24 }
 0x17f   :  { %2891 = vmatmul.mubr.f32.gmra.mrb[28].mxu0 %v520_v10  ;;  %v391_v45 = vpop.permute.xlu1 %390 }
 0x180   :  { %3275 = vmatpush3.bf16.msra.mxu0 %v5111_v36  ;;  %2893 = vmatprep.mubr.f32.mxu0 %v521_v21  ;;  %v386_v13 = vpop.permute.xlu0 %385  ;;  %v2472_v36 = vld [vmem:[%s5066_s3 + $0x80] sm:$0xff] }
 0x181   :  { %3277 = vmatprep.subr.bf16.mxu0 %v5112_v57  ;;  %2928 = vmatprep.mubr.f32.mxu1 %v2472_v36  ;;  %v284_v36 = vadd.f32 %v4323_v5, %v140_v58  ;;  %v4511_v58 = vadd.f32 %v391_v45, %v294_v53 }
 0x183   :  { %2894 = vmatmul.mubr.f32.gmra.mrb[30].mxu0 %v522_v63  ;;  %v160_v16 = vpop.permute.xlu1 %159 }
 0x184   :  { %3279 = vmatpush3.bf16.msra.mxu0 %v5112_v57  ;;  %2984 = vmatprep.mubr.f32.mxu0 %v1552_v59  ;;  %v155_v50 = vpop.permute.xlu0 %154 }
 0x185   :  { %v299_v32 = vadd.f32 %v4345_v9, %v155_v50 }
 0x187   :  { %2985 = vmatmul.mubr.f32.vlgmr.msra.gmra.mrb[32].mxu0 %v1553_v34  ;;  %v4479_v8 = vpop.permute.xlu1 %921 }
 0x188   :  { %2987 = vmatprep.mubr.f32.mxu0 %v1554_v56  ;;  %5115 = vst [vmem:[#allocation20_spill] sm:$0xff] %v4479_v8  ;;  %v4481_v10 = vpop.permute.xlu0 %916  ;;  %v279_v8 = vadd.f32 %v4325_v15, %v135_v29  ;;  %v4513_v29 = vadd.f32 %v386_v13, %v289_v33 }
 0x189   :  { %5116 = vst [vmem:[#allocation13_spill] sm:$0xff] %v4481_v10 }
 0x18a   :  { %v4509_v61 = vadd.f32 %v376_v44, %v279_v8 }
 0x18b   :  { %2988 = vmatmul.mubr.f32.gmra.mrb[34].mxu0 %v1555_v20  ;;  %v401_v21 = vpop.permute.xlu1 %400 }
 0x18c   :  { %2990 = vmatprep.mubr.f32.mxu0 %v1556_v26  ;;  %v396_v63 = vpop.permute.xlu0 %395 }
 0x18f   :  { %2991 = vmatmul.mubr.f32.gmra.mrb[36].mxu0 %v1557_v55  ;;  %v170_v57 = vpop.permute.xlu1 %169 }
 0x190   :  { %2993 = vmatprep.mubr.f32.mxu0 %v1558_v25  ;;  %v165_v59 = vpop.permute.xlu0 %164 }
 0x193   :  { %2994 = vmatmul.mubr.f32.gmra.mrb[38].mxu0 %v1559_v23  ;;  %v411_v34 = vpop.permute.xlu1 %410 }
 0x194   :  { %2996 = vmatprep.mubr.f32.mxu0 %v1560_v30  ;;  %v406_v56 = vpop.permute.xlu0 %405 }
 0x197   :  { %2997 = vmatmul.mubr.f32.gmra.mrb[40].mxu0 %v1561_v62  ;;  %v180_v20 = vpop.permute.xlu1 %179 }
 0x198   :  { %2999 = vmatprep.mubr.f32.mxu0 %v1562_v0  ;;  %v175_v26 = vpop.permute.xlu0 %174 }
 0x199   :  { %v319_v33 = vadd.f32 %v4372_v35, %v175_v26 }
 0x19b   :  { %3000 = vmatmul.mubr.f32.gmra.mrb[42].mxu0 %v1563_v7  ;;  %v421_v55 = vpop.permute.xlu1 %420  ;;  %v274_v7 = vadd.f32 %v4317_v38, %v4435_v39 }
 0x19c   :  { %3002 = vmatprep.mubr.f32.mxu0 %v1564_v22  ;;  %v416_v25 = vpop.permute.xlu0 %415 }
 0x19f   :  { %3003 = vmatmul.mubr.f32.gmra.mrb[44].mxu0 %v1565_v49  ;;  %v190_v23 = vpop.permute.xlu1 %189 }
 0x1a0   :  { %3005 = vmatprep.mubr.f32.mxu0 %v1566_v46  ;;  %v185_v30 = vpop.permute.xlu0 %184  ;;  %v334_v45 = vadd.f32 %v4380_v2, %v190_v23  ;;  %v4538_v23 = vadd.f32 %v416_v25, %v319_v33 }
 0x1a1   :  { %v329_v9 = vadd.f32 %v4382_v41, %v185_v30 }
 0x1a3   :  { %3006 = vmatmul.mubr.f32.gmra.mrb[46].mxu0 %v1567_v18  ;;  %v431_v0 = vpop.permute.xlu1 %430  ;;  %v269_v18 = vadd.f32 %v4319_v48, %v4437_v11 }
 0x1a4   :  { %v426_v46 = vpop.permute.xlu0 %425 }
 0x1a5   :  { %v4504_v5 = vadd.f32 %v4456_v54, %v269_v18  ;;  %v314_v54 = vadd.f32 %v4355_v6, %v170_v57  ;;  %v5117_v6 = vld [vmem:[#allocation22_spill] sm:$0xff]  ;;  %v4543_v30 = vadd.f32 %v426_v46, %v329_v9 }
 0x1a7   :  { %v200_v51 = vpop.permute.xlu1 %199 }
 0x1a8   :  { %v195_v24 = vpop.permute.xlu0 %194  ;;  %v344_v13 = vadd.f32 %v5117_v6, %v200_v51 }
 0x1ac   :  { %v436_v26 = vpop.permute.xlu0 %435 }
 0x23a   :  { %v2874_v62 = vpop.f32.mrb[16].mxu0 }
 0x23b   :  { %v4489_v22 = vadd.f32 %v2874_v62, %v4401_v43  ;;  %v990_v49 = vpop.f32.mrb[17].mxu0  ;;  %v4500_v62 = vadd.f32 %v4454_v19, %v274_v7 }
 0x23c   :  { %v991_v10 = vadd.f32 %v990_v49, %v4403_v12  ;;  %v4506_v12 = vadd.f32 %v381_v27, %v284_v36  ;;  %v309_v49 = vadd.f32 %v4359_v31, %v165_v59 }
 0x23d   :  { %v1086_v38 = vmul.f32 0.70710677, %v4489_v22 }
 0x23e   :  { %v1085_v39 = vmul.f32 0.70710677, %v991_v10  ;;  %v2877_v43 = vpop.f32.mrb[18].mxu0  ;;  %v4533_v59 = vadd.f32 %v406_v56, %v309_v49 }
 0x23f   :  { %3407 = verf.f32 %v1086_v38  ;;  %v1006_v48 = vadd.f32 %v2877_v43, %v4411_v60  ;;  %v1000_v11 = vpop.f32.mrb[19].mxu0  ;;  %v304_v60 = vadd.f32 %v4341_v1, %v160_v16  ;;  %v5118_v16 = vld [vmem:[#allocation23_spill] sm:$0xff] }
 0x240   :  { %3409 = verf.f32 %v1085_v39  ;;  %v1001_v15 = vadd.f32 %v1000_v11, %v4413_v37  ;;  %v324_v37 = vadd.f32 %v4368_v47, %v180_v20  ;;  %v339_v50 = vadd.f32 %v5118_v16, %v195_v24  ;;  %v441_v20 = vpop.permute.xlu1 %440 }
 0x241   :  { %v1088_v19 = vmul.f32 0.70710677, %v1006_v48  ;;  %v4527_v8 = vadd.f32 %v401_v21, %v304_v60  ;;  %v4529_v47 = vadd.f32 %v396_v63, %v299_v32  ;;  %v4540_v21 = vadd.f32 %v431_v0, %v334_v45 }
 0x242   :  { %v1087_v27 = vmul.f32 0.70710677, %v1001_v15  ;;  %v2880_v7 = vpop.f32.mrb[20].mxu0  ;;  %v4535_v2 = vadd.f32 %v421_v55, %v324_v37  ;;  %v4545_v56 = vadd.f32 %v441_v20, %v344_v13  ;;  %v4547_v55 = vadd.f32 %v436_v26, %v339_v50 }
 0x243   :  { %3411 = verf.f32 %v1088_v19  ;;  %v1016_v44 = vadd.f32 %v2880_v7, %v4420_v40  ;;  %v1010_v53 = vpop.f32.mrb[21].mxu0  ;;  %v4531_v40 = vadd.f32 %v411_v34, %v314_v54  ;;  %v1069_v39 = vmul.f32 0.5, %v991_v10 }
 0x244   :  { %3413 = verf.f32 %v1087_v27  ;;  %v1011_v1 = vadd.f32 %v1010_v53, %v4422_v14  ;;  %v1072_v11 = vmul.f32 0.5, %v1006_v48  ;;  %v1071_v19 = vmul.f32 0.5, %v1001_v15 }
 0x245   :  { %v1090_v31 = vmul.f32 0.70710677, %v1016_v44  ;;  %v1074_v54 = vmul.f32 0.5, %v1016_v44 }
 0x246   :  { %v1089_v57 = vmul.f32 0.70710677, %v1011_v1  ;;  %v2883_v35 = vpop.f32.mrb[22].mxu0  ;;  %v1073_v27 = vmul.f32 0.5, %v1011_v1 }
 0x247   :  { %3415 = verf.f32 %v1090_v31  ;;  %v1026_v41 = vadd.f32 %v2883_v35, %v4429_v42  ;;  %v1020_v14 = vpop.f32.mrb[23].mxu0  ;;  %v1070_v42 = vmul.f32 0.5, %v4489_v22 }
 0x248   :  { %3417 = verf.f32 %v1089_v57  ;;  %v1021_v63 = vadd.f32 %v1020_v14, %v4431_v3 }
 0x249   :  { %v3408_v34 = vpop.eup %3407  ;;  %v1092_v18 = vmul.f32 0.70710677, %v1026_v41  ;;  %v1076_v48 = vmul.f32 0.5, %v1026_v41 }
 0x24a   :  { %v3410_v36 = vpop.eup %3409  ;;  %v1118_v38 = vadd.f32 1.0, %v3408_v34  ;;  %v1091_v25 = vmul.f32 0.70710677, %v1021_v63  ;;  %v2886_v43 = vpop.f32.mrb[24].mxu0  ;;  %v1075_v6 = vmul.f32 0.5, %v1021_v63  ;;  %v5119_v34 = vld [vmem:[#allocation12_spill] sm:$0xff] }
 0x24b   :  { %v1117_v0 = vadd.f32 1.0, %v3410_v36  ;;  %3419 = verf.f32 %v1092_v18  ;;  %v1036_v3 = vadd.f32 %v2886_v43, %v4444_v17  ;;  %v1030_v51 = vpop.f32.mrb[25].mxu0  ;;  %v1587_v43 = vpop.permute.xlu0 %1586 }
 0x24c   :  { %v1134_v46 = vmul.f32 %v1118_v38, %v1070_v42  ;;  %3421 = verf.f32 %v1091_v25  ;;  %v1031_v24 = vadd.f32 %v1030_v51, %v4446_v28  ;;  %v5120_v38 = vld [vmem:[#allocation21_spill] sm:$0xff] }
 0x24d   :  { %v3412_v60 = vpop.eup %3411  ;;  %v1133_v32 = vmul.f32 %v1117_v0, %v1069_v39  ;;  %v1094_v22 = vmul.f32 0.70710677, %v1036_v3  ;;  %v1078_v13 = vmul.f32 0.5, %v1036_v3 }
 0x24e   :  { %v3414_v7 = vpop.eup %3413  ;;  %v4553_v10 = vadd.f32 %v1134_v46, %v4500_v62  ;;  %v1120_v49 = vadd.f32 1.0, %v3412_v60  ;;  %v1093_v37 = vmul.f32 0.70710677, %v1031_v24  ;;  %v2889_v53 = vpop.f32.mrb[26].mxu0 }
 0x24f   :  { %v4556_v17 = vadd.f32 %v1133_v32, %v4504_v5  ;;  %v1119_v15 = vadd.f32 1.0, %v3414_v7  ;;  %3423 = verf.f32 %v1094_v22  ;;  %v1046_v28 = vadd.f32 %v2889_v53, %v4471_v4  ;;  %v1040_v33 = vpop.f32.mrb[27].mxu0  ;;  %v1591_v46 = vpop.permute.xlu1 %1590 }
 0x250   :  { %v1182_v44 = vmul.f32 0.70710677, %v4553_v10  ;;  %v1136_v45 = vmul.f32 %v1120_v49, %v1072_v11  ;;  %3425 = verf.f32 %v1093_v37  ;;  %v1041_v1 = vadd.f32 %v1040_v33, %v4473_v52  ;;  %v5121_v37 = vld [vmem:[#allocation20_spill] sm:$0xff]  ;;  %v5122_v33 = vld [vmem:[#allocation13_spill] sm:$0xff] }
 0x251   :  { %v3416_v62 = vpop.eup %3415  ;;  %v1135_v9 = vmul.f32 %v1119_v15, %v1071_v19  ;;  %v1096_v16 = vmul.f32 0.70710677, %v1046_v28  ;;  %v1181_v5 = vmul.f32 0.70710677, %v4556_v17  ;;  %v1077_v4 = vmul.f32 0.5, %v1031_v24 }
 0x252   :  { %v3418_v50 = vpop.eup %3417  ;;  %v4563_v31 = vadd.f32 %v1136_v45, %v4506_v12  ;;  %v1122_v57 = vadd.f32 1.0, %v3416_v62  ;;  %v2892_v35 = vpop.f32.mrb[28].mxu0  ;;  %3427 = verf.f32 %v1182_v44  ;;  %v1095_v52 = vmul.f32 0.70710677, %v1041_v1 }
 0x253   :  { %v4566_v41 = vadd.f32 %v1135_v9, %v4509_v61  ;;  %v1121_v14 = vadd.f32 1.0, %v3418_v50  ;;  %v1050_v20 = vpop.f32.mrb[29].mxu0  ;;  %3429 = verf.f32 %v1096_v16  ;;  %v1056_v18 = vadd.f32 %v2892_v35, %v5119_v34 }
 0x254   :  { %v1184_v26 = vmul.f32 0.70710677, %v4563_v31  ;;  %v1138_v63 = vmul.f32 %v1122_v57, %v1074_v54  ;;  %v4570_v12 = vmul.f32 0.5, %v1046_v28  ;;  %3431 = verf.f32 %v1095_v52 }
 0x255   :  { %v3420_v36 = vpop.eup %3419  ;;  %v1137_v42 = vmul.f32 %v1121_v14, %v1073_v27  ;;  %v1051_v39 = vadd.f32 %v1050_v20, %v5120_v38  ;;  %v1183_v61 = vmul.f32 0.70710677, %v4566_v41  ;;  %v4577_v3 = vmul.f32 0.5, %v1041_v1 }
 0x256   :  { %v3422_v25 = vpop.eup %3421  ;;  %v4575_v0 = vadd.f32 %v1138_v63, %v4511_v58  ;;  %v1124_v11 = vadd.f32 1.0, %v3420_v36  ;;  %v2895_v51 = vpop.f32.mrb[30].mxu0  ;;  %3433 = verf.f32 %v1181_v5  ;;  %v1098_v60 = vmul.f32 0.70710677, %v1056_v18 }
 0x257   :  { %v4580_v19 = vadd.f32 %v1137_v42, %v4513_v29  ;;  %v1123_v24 = vadd.f32 1.0, %v3422_v25  ;;  %v1060_v32 = vpop.f32.mrb[31].mxu0  ;;  %3435 = verf.f32 %v1184_v26  ;;  %v1097_v22 = vmul.f32 0.70710677, %v1051_v39 }
 0x258   :  { %v1186_v54 = vmul.f32 0.70710677, %v4575_v0  ;;  %v1140_v27 = vmul.f32 %v1124_v11, %v1076_v48  ;;  %3437 = verf.f32 %v1098_v60  ;;  %v1066_v53 = vadd.f32 %v2895_v51, %v5121_v37 }
 0x259   :  { %v3424_v7 = vpop.eup %3423  ;;  %v1185_v58 = vmul.f32 0.70710677, %v4580_v19  ;;  %v1139_v49 = vmul.f32 %v1123_v24, %v1075_v6  ;;  %3439 = verf.f32 %v1183_v61  ;;  %v1061_v44 = vadd.f32 %v1060_v32, %v5122_v33  ;;  %v1599_v6 = vpop.permute.xlu0 %1598 }
 0x25a   :  { %v3426_v15 = vpop.eup %3425  ;;  %v4586_v29 = vadd.f32 %v1140_v27, %v4527_v8  ;;  %v1126_v28 = vadd.f32 1.0, %v3424_v7  ;;  %v2986_v45 = vpop.f32.mrb[32].mxu0  ;;  %3441 = verf.f32 %v1186_v54  ;;  %v1082_v62 = vmul.f32 0.5, %v1056_v18 }
 0x25b   :  { %v4590_v48 = vadd.f32 %v1139_v49, %v4529_v47  ;;  %v1125_v1 = vadd.f32 1.0, %v3426_v15  ;;  %v1715_v9 = vpop.f32.mrb[33].mxu0  ;;  %3443 = verf.f32 %v1097_v22  ;;  %v1100_v5 = vmul.f32 0.70710677, %v1066_v53  ;;  %v1595_v8 = vpop.permute.xlu1 %1594 }
 0x25c   :  { %v1188_v16 = vmul.f32 0.70710677, %v4586_v29  ;;  %v1142_v50 = vmul.f32 %v1126_v28, %v1078_v13  ;;  %v4593_v57 = vpop.eup %3427  ;;  %3445 = verf.f32 %v1185_v58  ;;  %v4595_v14 = vmul.f32 0.5, %v1051_v39 }
 0x25d   :  { %v1141_v35 = vmul.f32 %v1125_v1, %v1077_v4  ;;  %v1099_v52 = vmul.f32 0.70710677, %v1061_v44  ;;  %v3430_v20 = vpop.eup %3429  ;;  %v1187_v47 = vmul.f32 0.70710677, %v4590_v48  ;;  %v1721_v63 = vadd.f32 %v2986_v45, %v1591_v46 }
 0x25e   :  { %v4599_v26 = vadd.f32 %v1142_v50, %v4531_v40  ;;  %v1716_v34 = vadd.f32 %v1715_v9, %v1587_v43  ;;  %v2989_v18 = vpop.f32.mrb[34].mxu0  ;;  %v3432_v13 = vpop.eup %3431  ;;  %3447 = verf.f32 %v1188_v16  ;;  %v1128_v42 = vadd.f32 1.0, %v3430_v20 }
 0x25f   :  { %v4602_v36 = vadd.f32 %v1141_v35, %v4533_v59  ;;  %v1731_v38 = vadd.f32 %v2989_v18, %v1599_v6  ;;  %v1725_v4 = vpop.f32.mrb[35].mxu0  ;;  %v1127_v25 = vadd.f32 1.0, %v3432_v13  ;;  %v4605_v61 = vmul.f32 0.5, %v1066_v53  ;;  %v1607_v59 = vpop.permute.xlu0 %1606 }
 0x260   :  { %v1190_v39 = vmul.f32 0.70710677, %v4599_v26  ;;  %3449 = verf.f32 %v1100_v5  ;;  %v3434_v11 = vpop.eup %3433  ;;  %v1144_v40 = vmul.f32 %v1128_v42, %v4570_v12  ;;  %v4608_v51 = vmul.f32 0.5, %v1061_v44  ;;  %v1603_v22 = vpop.permute.xlu1 %1602 }
 0x261   :  { %3451 = verf.f32 %v1099_v52  ;;  %v1811_v43 = vmul.f32 0.70710677, %v1721_v63  ;;  %v4610_v46 = vpop.eup %3435  ;;  %v1143_v24 = vmul.f32 %v1127_v25, %v4577_v3  ;;  %v4613_v60 = vmul.f32 0.5, %v1721_v63 }
 0x262   :  { %3453 = verf.f32 %v1187_v47  ;;  %v1810_v32 = vmul.f32 0.70710677, %v1716_v34  ;;  %v2992_v54 = vpop.f32.mrb[36].mxu0  ;;  %v3438_v27 = vpop.eup %3437  ;;  %v1189_v7 = vmul.f32 0.70710677, %v4602_v36  ;;  %v4617_v12 = vadd.f32 %v1144_v40, %v4535_v2 }
 0x263   :  { %3455 = verf.f32 %v1190_v39  ;;  %v1813_v58 = vmul.f32 0.70710677, %v1731_v38  ;;  %v1735_v49 = vpop.f32.mrb[37].mxu0  ;;  %v4619_v37 = vpop.eup %3439  ;;  %v4622_v53 = vadd.f32 %v1143_v24, %v4538_v23  ;;  %v1130_v3 = vadd.f32 1.0, %v3438_v27 }
 0x264   :  { %3457 = verf.f32 %v1811_v43  ;;  %v1726_v15 = vadd.f32 %v1725_v4, %v1595_v8  ;;  %v4624_v28 = vpop.eup %3441  ;;  %v1192_v33 = vmul.f32 0.70710677, %v4617_v12  ;;  %v1741_v44 = vadd.f32 %v2992_v54, %v1607_v59  ;;  %v1615_v52 = vpop.permute.xlu0 %1614 }
 0x265   :  { %3459 = verf.f32 %v1810_v32  ;;  %v1736_v45 = vadd.f32 %v1735_v49, %v1603_v22  ;;  %v3444_v1 = vpop.eup %3443  ;;  %v1146_v2 = vmul.f32 %v1130_v3, %v1082_v62  ;;  %v4627_v9 = vmul.f32 0.5, %v1716_v34  ;;  %v1611_v34 = vpop.permute.xlu1 %1610 }
 0x266   :  { %v4629_v6 = vmul.f32 0.5, %v1731_v38  ;;  %3461 = verf.f32 %v1813_v58  ;;  %v2995_v16 = vpop.f32.mrb[38].mxu0  ;;  %v4631_v23 = vpop.eup %3445  ;;  %v1191_v50 = vmul.f32 0.70710677, %v4622_v53  ;;  %v1129_v5 = vadd.f32 1.0, %v3444_v1 }
 0x267   :  { %3463 = verf.f32 %v1189_v7  ;;  %v1812_v8 = vmul.f32 0.70710677, %v1726_v15  ;;  %v1745_v35 = vpop.f32.mrb[39].mxu0  ;;  %v4635_v20 = vadd.f32 %v1146_v2, %v4540_v21  ;;  %v4637_v62 = vmul.f32 0.5, %v1726_v15 }
 0x268   :  { %3465 = verf.f32 %v1192_v33  ;;  %v1815_v47 = vmul.f32 0.70710677, %v1741_v44  ;;  %v4639_v63 = vpop.eup %3447  ;;  %v1145_v18 = vmul.f32 %v1129_v5, %v4595_v14  ;;  %v1814_v13 = vmul.f32 0.70710677, %v1736_v45  ;;  %v1623_v49 = vpop.permute.xlu0 %1622 }
 0x269   :  { %3467 = verf.f32 %v1812_v8  ;;  %v1165_v42 = vmul.f32 0.5, %v4556_v17  ;;  %v1194_v4 = vmul.f32 0.70710677, %v4635_v20  ;;  %v1166_v39 = vmul.f32 0.5, %v4553_v10  ;;  %v1619_v2 = vpop.permute.xlu1 %1618 }
 0x26a   :  { %v3450_v38 = vpop.eup %3449  ;;  %3469 = verf.f32 %v1815_v47  ;;  %v1213_v21 = vadd.f32 1.0, %v3434_v11  ;;  %v2998_v25 = vpop.f32.mrb[40].mxu0  ;;  %v4646_v43 = vadd.f32 %v1145_v18, %v4543_v30  ;;  %v1214_v14 = vadd.f32 1.0, %v4593_v57 }
 0x26b   :  { %v3452_v40 = vpop.eup %3451  ;;  %v1132_v59 = vadd.f32 1.0, %v3450_v38  ;;  %3471 = verf.f32 %v1814_v13  ;;  %v1755_v24 = vpop.f32.mrb[41].mxu0  ;;  %v4651_v54 = vmul.f32 0.5, %v1741_v44  ;;  %v1751_v22 = vadd.f32 %v2995_v16, %v1615_v52 }
 0x26c   :  { %v4649_v32 = vpop.eup %3453  ;;  %v1131_v17 = vadd.f32 1.0, %v3452_v40  ;;  %v1229_v27 = vmul.f32 %v1213_v21, %v1165_v42  ;;  %3473 = verf.f32 %v1191_v50  ;;  %v1230_v11 = vmul.f32 %v1214_v14, %v1166_v39 }
 0x26d   :  { %v4653_v7 = vpop.eup %3455  ;;  %v1148_v10 = vmul.f32 %v1132_v59, %v4605_v61  ;;  %v1746_v30 = vadd.f32 %v1745_v35, %v1611_v34  ;;  %v1193_v3 = vmul.f32 0.70710677, %v4646_v43  ;;  %v4658_v15 = vmul.f32 0.5, %v1736_v45 }
 0x26e   :  { %v3458_v58 = vpop.eup %3457  ;;  %v1147_v57 = vmul.f32 %v1131_v17, %v4608_v51  ;;  %v1817_v33 = vmul.f32 0.70710677, %v1751_v22  ;;  %v4660_v44 = vpop.f32.mrb[42].mxu0  ;;  %3475 = verf.f32 %v1194_v4  ;;  %v3216_v50 = vpack.c.bf16 %v1230_v11, %v1229_v27 }
 0x26f   :  { %v3460_v1 = vpop.eup %3459  ;;  %v4663_v16 = vadd.f32 %v1148_v10, %v4545_v56  ;;  %v1843_v61 = vadd.f32 1.0, %v3458_v58  ;;  %v1765_v5 = vpop.f32.mrb[43].mxu0  ;;  %v4668_v52 = vmul.f32 0.5, %v1751_v22  ;;  %v1167_v51 = vmul.f32 0.5, %v4566_v41 }
 0x270   :  { %v3462_v8 = vpop.eup %3461  ;;  %v4666_v35 = vadd.f32 %v1147_v57, %v4547_v55  ;;  %3477 = verf.f32 %v1817_v33  ;;  %v1842_v34 = vadd.f32 1.0, %v3460_v1  ;;  %3217 = vmatprep.subr.bf16.mxu1 %v3216_v50  ;;  %v1816_v56 = vmul.f32 0.70710677, %v1746_v30  ;;  %v1631_v27 = vpop.permute.xlu0 %1630 }
 0x271   :  { %v4671_v45 = vpop.eup %3463  ;;  %v1196_v47 = vmul.f32 0.70710677, %v4663_v16  ;;  %v1845_v18 = vadd.f32 1.0, %v3462_v8  ;;  %3479 = verf.f32 %v1193_v3  ;;  %3219 = vmatpush3.bf16.msra.mxu1 %v3216_v50  ;;  %v4677_v55 = vmul.f32 0.5, %v1746_v30  ;;  %v1627_v58 = vpop.permute.xlu1 %1626 }
 0x272   :  { %v4674_v13 = vpop.eup %3465  ;;  %v1195_v42 = vmul.f32 0.70710677, %v4666_v35  ;;  %v1215_v38 = vadd.f32 1.0, %v4619_v37  ;;  %v3004_v4 = vpop.f32.mrb[44].mxu0  ;;  %v4681_v39 = vmul.f32 %v1843_v61, %v4613_v60  ;;  %v1168_v21 = vmul.f32 0.5, %v4563_v31 }
 0x273   :  { %v3468_v41 = vpop.eup %3467  ;;  %v1216_v40 = vadd.f32 1.0, %v4610_v46  ;;  %v1761_v59 = vadd.f32 %v2998_v25, %v1623_v49  ;;  %v1775_v14 = vpop.f32.mrb[45].mxu0  ;;  %3481 = verf.f32 %v1196_v47  ;;  %v1756_v11 = vadd.f32 %v1755_v24, %v1619_v2 }
 0x274   :  { %v3470_v17 = vpop.eup %3469  ;;  %v1844_v22 = vadd.f32 1.0, %v3468_v41  ;;  %v1231_v10 = vmul.f32 %v1215_v38, %v1167_v51  ;;  %v4686_v37 = vmul.f32 %v1842_v34, %v4627_v9  ;;  %v4689_v60 = vmul.f32 %v1845_v18, %v4629_v6  ;;  %v1639_v18 = vpop.permute.xlu0 %1638 }
 0x275   :  { %v3472_v30 = vpop.eup %3471  ;;  %3483 = verf.f32 %v1816_v56  ;;  %v1232_v31 = vmul.f32 %v1216_v40, %v1168_v21  ;;  %v1847_v46 = vadd.f32 1.0, %v3470_v17  ;;  %v4691_v25 = vmul.f32 0.5, %v1761_v59  ;;  %v1635_v38 = vpop.permute.xlu1 %1634 }
 0x276   :  { %3485 = verf.f32 %v1195_v42  ;;  %v1819_v49 = vmul.f32 0.70710677, %v1761_v59  ;;  %v3007_v3 = vpop.f32.mrb[46].mxu0  ;;  %v4693_v57 = vpop.eup %3473  ;;  %v4696_v24 = vmul.f32 %v1844_v22, %v4637_v62  ;;  %v1846_v33 = vadd.f32 1.0, %v3472_v30 }
 0x277   :  { %v3220_v1 = vpack.c.bf16 %v1232_v31, %v1231_v10  ;;  %v1818_v9 = vmul.f32 0.70710677, %v1756_v11  ;;  %v1785_v2 = vpop.f32.mrb[47].mxu0  ;;  %v1169_v6 = vmul.f32 0.5, %v4580_v19  ;;  %v1170_v61 = vmul.f32 0.5, %v4575_v0 }
 0x278   :  { %3487 = verf.f32 %v1819_v49  ;;  %v1217_v50 = vadd.f32 1.0, %v4631_v23  ;;  %v4701_v8 = vpop.eup %3475  ;;  %v1218_v51 = vadd.f32 1.0, %v4624_v28  ;;  %v1771_v62 = vadd.f32 %v4660_v44, %v1631_v27 }
 0x279   :  { %3221 = vmatprep.subr.bf16.mxu1 %v3220_v1  ;;  %3489 = verf.f32 %v1818_v9  ;;  %v1766_v47 = vadd.f32 %v1765_v5, %v1627_v58  ;;  %v1802_v56 = vmul.f32 0.5, %v1756_v11  ;;  %v1171_v19 = vmul.f32 0.5, %v4590_v48  ;;  %v1643_v9 = vpop.permute.xlu1 %1642 }
 0x27a   :  { %v3478_v34 = vpop.eup %3477  ;;  %3223 = vmatpush3.bf16.msra.mxu1 %v3220_v1  ;;  %v1233_v42 = vmul.f32 %v1217_v50, %v1169_v6  ;;  %v1219_v0 = vadd.f32 1.0, %v4649_v32  ;;  %v4708_v23 = vmul.f32 %v1847_v46, %v4651_v54  ;;  %v4711_v41 = vmul.f32 %v1846_v33, %v4658_v15  ;;  %v1647_v46 = vpop.permute.xlu0 %1646 }
 0x27b   :  { %v1234_v28 = vmul.f32 %v1218_v51, %v1170_v61  ;;  %v1821_v21 = vmul.f32 0.70710677, %v1771_v62  ;;  %v3480_v44 = vpop.eup %3479  ;;  %v1820_v5 = vmul.f32 0.70710677, %v1766_v47  ;;  %v1172_v40 = vmul.f32 0.5, %v4586_v29 }
 0x27c   :  { %v1220_v59 = vadd.f32 1.0, %v4639_v63  ;;  %v1235_v17 = vmul.f32 %v1219_v0, %v1171_v19  ;;  %v1849_v27 = vadd.f32 1.0, %v3478_v34  ;;  %v1781_v32 = vadd.f32 %v3004_v4, %v1639_v18 }
 0x27d   :  { %v3224_v48 = vpack.c.bf16 %v1234_v28, %v1233_v42  ;;  %3491 = verf.f32 %v1821_v21  ;;  %v4715_v22 = vpop.eup %3481  ;;  %v1805_v54 = vmul.f32 0.5, %v1771_v62  ;;  %v4717_v15 = vadd.f32 %v1775_v14, %v1635_v38 }
 0x27e   :  { %3493 = verf.f32 %v1820_v5  ;;  %v1236_v10 = vmul.f32 %v1220_v59, %v1172_v40  ;;  %v1804_v30 = vmul.f32 0.5, %v1766_v47  ;;  %v1823_v58 = vmul.f32 0.70710677, %v1781_v32 }
 0x27f   :  { %v3484_v11 = vpop.eup %3483  ;;  %3225 = vmatprep.subr.bf16.mxu1 %v3224_v48  ;;  %v1173_v29 = vmul.f32 0.5, %v4602_v36  ;;  %v1221_v63 = vadd.f32 1.0, %v4671_v45  ;;  %v1822_v33 = vmul.f32 0.70710677, %v4717_v15  ;;  %v1174_v1 = vmul.f32 0.5, %v4599_v26 }
 0x280   :  { %v3486_v31 = vpop.eup %3485  ;;  %v1848_v49 = vadd.f32 1.0, %v3484_v11  ;;  %3227 = vmatpush3.bf16.msra.mxu1 %v3224_v48  ;;  %v3228_v4 = vpack.c.bf16 %v1236_v10, %v1235_v17  ;;  %3495 = verf.f32 %v1823_v58  ;;  %v1222_v14 = vadd.f32 1.0, %v4653_v7 }
 0x281   :  { %v1237_v6 = vmul.f32 %v1221_v63, %v1173_v29  ;;  %v4724_v61 = vadd.f32 %v3007_v3, %v1647_v46  ;;  %v1865_v36 = vmul.f32 %v1849_v27, %v4668_v52  ;;  %v1807_v45 = vmul.f32 0.5, %v1781_v32 }
 0x282   :  { %v3488_v50 = vpop.eup %3487  ;;  %3229 = vmatprep.subr.bf16.mxu1 %v3228_v4  ;;  %3497 = verf.f32 %v1822_v33  ;;  %v1786_v51 = vadd.f32 %v1785_v2, %v1643_v9  ;;  %v1864_v47 = vmul.f32 %v1848_v49, %v4677_v55  ;;  %v1238_v18 = vmul.f32 %v1222_v14, %v1174_v1 }
 0x283   :  { %v3490_v62 = vpop.eup %3489  ;;  %v1851_v34 = vadd.f32 1.0, %v3488_v50  ;;  %v1825_v26 = vmul.f32 0.70710677, %v4724_v61  ;;  %v1175_v3 = vmul.f32 0.5, %v4622_v53  ;;  %v1176_v19 = vmul.f32 0.5, %v4617_v12  ;;  %v2473_v50 = vld [vmem:[%s5066_s3 + $0x88] sm:$0xff] }
 0x284   :  { %v1850_v42 = vadd.f32 1.0, %v3490_v62  ;;  %3231 = vmatpush3.bf16.msra.mxu1 %v3228_v4  ;;  %v1824_v7 = vmul.f32 0.70710677, %v1786_v51  ;;  %v3232_v0 = vpack.c.bf16 %v1238_v18, %v1237_v6  ;;  %v1223_v2 = vadd.f32 1.0, %v4693_v57  ;;  %v2477_v62 = vld [vmem:[%s5066_s3 + $0xa8] sm:$0xff]  ;;  %v2480_v18 = vld [vmem:[%s5066_s3 + $0xc0] sm:$0xff] }
 0x285   :  { %v1867_v52 = vmul.f32 %v1851_v34, %v4691_v25  ;;  %3499 = verf.f32 %v1825_v26  ;;  %v1224_v55 = vadd.f32 1.0, %v4674_v13  ;;  %v1177_v28 = vmul.f32 0.5, %v4646_v43  ;;  %v2479_v34 = vld [vmem:[%s5066_s3 + $0xb8] sm:$0xff]  ;;  %v2481_v26 = vld [vmem:[%s5066_s3 + $0xc8] sm:$0xff] }
 0x286   :  { %v1866_v38 = vmul.f32 %v1850_v42, %v1802_v56  ;;  %3501 = verf.f32 %v1824_v7  ;;  %3233 = vmatprep.subr.bf16.mxu1 %v3232_v0  ;;  %v1239_v5 = vmul.f32 %v1223_v2, %v1175_v3  ;;  %v1178_v40 = vmul.f32 0.5, %v4635_v20  ;;  %v2482_v42 = vld [vmem:[%s5066_s3 + $0xd0] sm:$0xff]  ;;  %v2483_v7 = vld [vmem:[%s5066_s3 + $0xd8] sm:$0xff]  ;;  %v2484_v3 = vld [vmem:[%s5066_s3 + $0xe0] sm:$0xff] }
 0x287   :  { %v3492_v21 = vpop.eup %3491  ;;  %v1225_v53 = vadd.f32 1.0, %v3480_v44  ;;  %v1226_v12 = vadd.f32 1.0, %v4701_v8  ;;  %v1240_v17 = vmul.f32 %v1224_v55, %v1176_v19  ;;  %v1179_v57 = vmul.f32 0.5, %v4666_v35  ;;  %v2485_v19 = vld [vmem:[%s5066_s3 + $0xe8] sm:$0xff]  ;;  %v1569_v2 = vld [vmem:[#allocation7 + $0x80] sm:$0xff]  ;;  %v1571_v55 = vld [vmem:[#allocation7 + $0x90] sm:$0xff] }
 0x288   :  { %v3494_v59 = vpop.eup %3493  ;;  %v1853_v25 = vadd.f32 1.0, %v3492_v21  ;;  %3235 = vmatpush3.bf16.msra.mxu1 %v3232_v0  ;;  %v1180_v56 = vmul.f32 0.5, %v4663_v16  ;;  %v1227_v43 = vadd.f32 1.0, %v3486_v31  ;;  %v1228_v11 = vadd.f32 1.0, %v4715_v22  ;;  %v2487_v0 = vld [vmem:[%s5066_s3 + $0xf8] sm:$0xff]  ;;  %v1573_v21 = vld [vmem:[#allocation7 + $0xa0] sm:$0xff] }
 0x289   :  { %v1852_v27 = vadd.f32 1.0, %v3494_v59  ;;  %v1241_v13 = vmul.f32 %v1225_v53, %v1177_v28  ;;  %v1242_v48 = vmul.f32 %v1226_v12, %v1178_v40  ;;  %v3236_v10 = vpack.c.bf16 %v1240_v17, %v1239_v5  ;;  %v1572_v28 = vld [vmem:[#allocation7 + $0x98] sm:$0xff]  ;;  %v1574_v5 = vld [vmem:[#allocation7 + $0xa8] sm:$0xff]  ;;  %v1575_v40 = vld [vmem:[#allocation7 + $0xb0] sm:$0xff] }
 0x28a   :  { %v1869_v32 = vmul.f32 %v1853_v25, %v1805_v54  ;;  %v3280_v20 = vpack.c.bf16 %v4681_v39, %v4686_v37  ;;  %v3496_v8 = vpop.eup %3495  ;;  %v1243_v29 = vmul.f32 %v1227_v43, %v1179_v57  ;;  %v3284_v35 = vpack.c.bf16 %v4689_v60, %v4696_v24  ;;  %v1576_v53 = vld [vmem:[#allocation7 + $0xb8] sm:$0xff]  ;;  %v1577_v12 = vld [vmem:[#allocation7 + $0xc0] sm:$0xff]  ;;  %v1578_v59 = vld [vmem:[#allocation7 + $0xc8] sm:$0xff]  ;;  %v4793_v43 = vpop.permute.xlu1 %1875 }
 0x28b   :  { %v1868_v44 = vmul.f32 %v1852_v27, %v1804_v30  ;;  %v3240_v58 = vpack.c.bf16 %v1242_v48, %v1241_v13  ;;  %v1855_v16 = vadd.f32 1.0, %v3496_v8  ;;  %3237 = vmatprep.subr.bf16.mxu1 %v3236_v10  ;;  %v1244_v46 = vmul.f32 %v1228_v11, %v1180_v56  ;;  %v1579_v25 = vld [vmem:[#allocation7 + $0xd0] sm:$0xff]  ;;  %v1580_v17 = vld [vmem:[#allocation7 + $0xd8] sm:$0xff]  ;;  %v1581_v57 = vld [vmem:[#allocation7 + $0xe0] sm:$0xff]  ;;  %v1880_v48 = vpop.permute.xlu0 %1879 }
 0x28c   :  { %v3498_v63 = vpop.eup %3497  ;;  %v3288_v54 = vpack.c.bf16 %v4708_v23, %v4711_v41  ;;  %v3292_v31 = vpack.c.bf16 %v1865_v36, %v1864_v47  ;;  %v1806_v22 = vmul.f32 0.5, %v4717_v15  ;;  %3239 = vmatpush3.bf16.msra.mxu1 %v3236_v10  ;;  %v3296_v39 = vpack.c.bf16 %v1867_v52, %v1866_v38  ;;  %v2478_v47 = vld [vmem:[%s5066_s3 + $0xb0] sm:$0xff]  ;;  %v1570_v38 = vld [vmem:[#allocation7 + $0x88] sm:$0xff]  ;;  %v1584_v13 = vld [vmem:[#allocation7 + $0xf8] sm:$0xff] }
 0x28d   :  { %v1854_v49 = vadd.f32 1.0, %v3498_v63  ;;  %v3300_v37 = vpack.c.bf16 %v1869_v32, %v1868_v44  ;;  %v1871_v30 = vmul.f32 %v1855_v16, %v1807_v45  ;;  %3241 = vmatprep.subr.bf16.mxu1 %v3240_v58  ;;  %v3244_v4 = vpack.c.bf16 %v1244_v46, %v1243_v29  ;;  %v2474_v45 = vld [vmem:[%s5066_s3 + $0x90] sm:$0xff]  ;;  %v1582_v56 = vld [vmem:[#allocation7 + $0xe8] sm:$0xff] }
 0x28e   :  { %v1809_v24 = vmul.f32 0.5, %v4724_v61  ;;  %v1808_v14 = vmul.f32 0.5, %v1786_v51  ;;  %v2475_v61 = vld [vmem:[%s5066_s3 + $0x98] sm:$0xff]  ;;  %v2476_v51 = vld [vmem:[%s5066_s3 + $0xa0] sm:$0xff]  ;;  %v2486_v52 = vld [vmem:[%s5066_s3 + $0xf0] sm:$0xff]  ;;  %v4797_v10 = vpop.permute.xlu1 %1883 }
 0x28f   :  { %v3500_v33 = vpop.eup %3499  ;;  %v1870_v1 = vmul.f32 %v1854_v49, %v1806_v22  ;;  %v1583_v27 = vld [vmem:[#allocation7 + $0xf0] sm:$0xff]  ;;  %v4795_v32 = vpop.permute.xlu0 %1887 }
 0x290   :  { %v3502_v60 = vpop.eup %3501  ;;  %v1857_v9 = vadd.f32 1.0, %v3500_v33  ;;  %3243 = vmatpush3.bf16.msra.mxu1 %v3240_v58 }
 0x291   :  { %v1856_v6 = vadd.f32 1.0, %v3502_v60  ;;  %v3304_v23 = vpack.c.bf16 %v1871_v30, %v1870_v1  ;;  %3245 = vmatprep.subr.bf16.mxu1 %v3244_v4  ;;  %v2488_v30 = vld [vmem:[%s5066_s3 + $0x100] sm:$0xff] }
 0x292   :  { %v1873_v41 = vmul.f32 %v1857_v9, %v1809_v24  ;;  %3096 = vmatprep.mubr.f32.mxu0 %v2488_v30 }
 0x293   :  { %v1872_v15 = vmul.f32 %v1856_v6, %v1808_v14  ;;  %v4799_v11 = vpop.permute.xlu0 %1895 }
 0x294   :  { %3247 = vmatpush3.bf16.msra.mxu1 %v3244_v4  ;;  %v2496_v4 = vld [vmem:[%s5066_s3 + $0x140] sm:$0xff] }
 0x295   :  { %v3308_v36 = vpack.c.bf16 %v1873_v41, %v1872_v15  ;;  %3281 = vmatprep.subr.bf16.mxu1 %v3280_v20  ;;  %v3567_v15 = vld [vmem:[%s5067_s4] sm:$0xff]  ;;  %s2462_s4 = sshll.u32 %s3670_s6, 4  ;;  %s2463_s4 = int_to_ptr.vmem [resolvable:$true] %s2462_s4 }
 0x296   :  { %s3634_s23 = scalar_lea.vmem %s2463_s4, 128  ;;  %p3639_p11 = scmp.lt.s32.totalorder %s2463_s4, %s2463_s4 }
 0x297   :  { %2929 = vmatmul.mubr.f32.vlgmr.msra.gmra.mrb[16].mxu1 %v2473_v50  ;;  %v4803_v8 = vpop.permute.xlu0 %1903  ;;  %p3635_p10 = scmp.ne.s32.totalorder %s2463_s4, %s3634_s23  ;;  %p3640_p12 = scmp.lt.s32.totalorder %s3634_s23, %s3634_s23 }
 0x298   :  { %3283 = vmatpush3.bf16.msra.mxu1 %v3280_v20  ;;  %2931 = vmatprep.mubr.f32.mxu1 %v2474_v45  ;;  %v4801_v20 = vpop.permute.xlu1 %1891 }
 0x299   :  { %3285 = vmatprep.subr.bf16.mxu1 %v3284_v35  ;;  %p3641_p13 = por %p3640_p12, %p3639_p11 }
 0x29b   :  { %2932 = vmatmul.mubr.f32.gmra.mrb[18].mxu1 %v2475_v61  ;;  %v1268_v58 = vpop.permute.xlu0 %1267  ;;  %p3642_p0 = pnand %p3641_p13, %p3635_p10 }
 0x29c   :  { %3287 = vmatpush3.bf16.msra.mxu1 %v3284_v35  ;;  %2934 = vmatprep.mubr.f32.mxu1 %v2476_v51  ;;  %v4805_v44 = vpop.permute.xlu1 %1899 }
 0x29d   :  { %3289 = vmatprep.subr.bf16.mxu1 %v3288_v54 }
 0x29f   :  { %2935 = vmatmul.mubr.f32.gmra.mrb[20].mxu1 %v2477_v62  ;;  %v4807_v35 = vpop.permute.xlu0 %1911 }
 0x2a0   :  { %3291 = vmatpush3.bf16.msra.mxu1 %v3288_v54  ;;  %2937 = vmatprep.mubr.f32.mxu1 %v2478_v47  ;;  %v1264_v29 = vpop.permute.xlu1 %1263 }
 0x2a1   :  { %3293 = vmatprep.subr.bf16.mxu1 %v3292_v31 }
 0x2a3   :  { %2938 = vmatmul.mubr.f32.gmra.mrb[22].mxu1 %v2479_v34  ;;  %v4811_v16 = vpop.permute.xlu0 %1476 }
 0x2a4   :  { %3295 = vmatpush3.bf16.msra.mxu1 %v3292_v31  ;;  %2940 = vmatprep.mubr.f32.mxu1 %v2480_v18  ;;  %v4809_v63 = vpop.permute.xlu1 %1907 }
 0x2a5   :  { %3297 = vmatprep.subr.bf16.mxu1 %v3296_v39 }
 0x2a7   :  { %2941 = vmatmul.mubr.f32.gmra.mrb[24].mxu1 %v2481_v26  ;;  %v4815_v54 = vpop.permute.xlu0 %1275 }
 0x2a8   :  { %3299 = vmatpush3.bf16.msra.mxu1 %v3296_v39  ;;  %2943 = vmatprep.mubr.f32.mxu1 %v2482_v42  ;;  %v4813_v46 = vpop.permute.xlu1 %1472 }
 0x2a9   :  { %3301 = vmatprep.subr.bf16.mxu1 %v3300_v37 }
 0x2ab   :  { %2944 = vmatmul.mubr.f32.gmra.mrb[26].mxu1 %v2483_v7  ;;  %v4819_v22 = vpop.permute.xlu0 %1919 }
 0x2ac   :  { %3303 = vmatpush3.bf16.msra.mxu1 %v3300_v37  ;;  %2946 = vmatprep.mubr.f32.mxu1 %v2484_v3  ;;  %v4817_v31 = vpop.permute.xlu1 %1271 }
 0x2ad   :  { %3305 = vmatprep.subr.bf16.mxu1 %v3304_v23 }
 0x2af   :  { %2947 = vmatmul.mubr.f32.gmra.mrb[28].mxu1 %v2485_v19  ;;  %v4823_v39 = vpop.permute.xlu0 %1484 }
 0x2b0   :  { %3307 = vmatpush3.bf16.msra.mxu1 %v3304_v23  ;;  %2949 = vmatprep.mubr.f32.mxu1 %v2486_v52  ;;  %v4821_v49 = vpop.permute.xlu1 %1915  ;;  %v3669_v23 = vmov 2  }
 0x2b1   :  { %3309 = vmatprep.subr.bf16.mxu1 %v3308_v36  ;;  %3373 = vset.pattern.permute.xlu1 %v3669_v23 }
 0x2b2   :  { %3374 = vset.pattern.permute.xlu0 %v3669_v23  ;;  %2277 = vperm.xlu1 %3373, %v3567_v15  }
 0x2b3   :  { %2950 = vmatmul.mubr.f32.gmra.mrb[30].mxu1 %v2487_v0  ;;  %v1284_v33 = vpop.permute.xlu0 %1283 }
 0x2b4   :  { %3311 = vmatpush3.bf16.msra.mxu1 %v3308_v36  ;;  %3040 = vmatprep.mubr.f32.mxu1 %v1569_v2  ;;  %v4825_v37 = vpop.permute.xlu1 %1480 }
 0x2b7   :  { %3041 = vmatmul.mubr.f32.vlgmr.msra.gmra.mrb[32].mxu1 %v1570_v38  ;;  %v4833_v60 = vpop.permute.xlu0 %1927 }
 0x2b8   :  { %3043 = vmatprep.mubr.f32.mxu1 %v1571_v55  ;;  %v1280_v1 = vpop.permute.xlu1 %1279 }
 0x2bb   :  { %3044 = vmatmul.mubr.f32.gmra.mrb[34].mxu1 %v1572_v28  ;;  %v4837_v9 = vpop.permute.xlu0 %1492 }
 0x2bc   :  { %3046 = vmatprep.mubr.f32.mxu1 %v1573_v21  ;;  %v4835_v24 = vpop.permute.xlu1 %1923 }
 0x2bf   :  { %3047 = vmatmul.mubr.f32.gmra.mrb[36].mxu1 %v1574_v5  ;;  %v1292_v36 = vpop.permute.xlu0 %1291 }
 0x2c0   :  { %3049 = vmatprep.mubr.f32.mxu1 %v1575_v40  ;;  %v4839_v14 = vpop.permute.xlu1 %1488 }
 0x2c3   :  { %3050 = vmatmul.mubr.f32.gmra.mrb[38].mxu1 %v1576_v53  ;;  %v4844_v47 = vpop.permute.xlu0 %1935 }
 0x2c4   :  { %3052 = vmatprep.mubr.f32.mxu1 %v1577_v12  ;;  %v1288_v61 = vpop.permute.xlu1 %1287 }
 0x2c7   :  { %3053 = vmatmul.mubr.f32.gmra.mrb[40].mxu1 %v1578_v59  ;;  %v1501_v7 = vpop.permute.xlu0 %1500 }
 0x2c8   :  { %3055 = vmatprep.mubr.f32.mxu1 %v1579_v25  ;;  %v4846_v34 = vpop.permute.xlu1 %1931 }
 0x2cb   :  { %3056 = vmatmul.mubr.f32.gmra.mrb[42].mxu1 %v1580_v17  ;;  %v1300_v2 = vpop.permute.xlu0 %1299 }
 0x2cc   :  { %3058 = vmatprep.mubr.f32.mxu1 %v1581_v57  ;;  %v1497_v19 = vpop.permute.xlu1 %1496 }
 0x2cf   :  { %3059 = vmatmul.mubr.f32.gmra.mrb[44].mxu1 %v1582_v56  ;;  %v1509_v5 = vpop.permute.xlu0 %1508 }
 0x2d0   :  { %3061 = vmatprep.mubr.f32.mxu1 %v1583_v27  ;;  %v1296_v38 = vpop.permute.xlu1 %1295 }
 0x2d3   :  { %3062 = vmatmul.mubr.f32.gmra.mrb[46].mxu1 %v1584_v13  ;;  %v1308_v57 = vpop.permute.xlu0 %1307 }
 0x2d4   :  { %3108 = vmatprep.mubr.f32.mxu1 %v2496_v4  ;;  %v1505_v53 = vpop.permute.xlu1 %1504 }
 0x2d8   :  { %v1304_v13 = vpop.permute.xlu1 %1303 }
 0x36a   :  { %v2930_v6 = vpop.f32.mrb[16].mxu1 }
 0x36b   :  { %v1392_v41 = vpop.f32.mrb[17].mxu1  ;;  %v1398_v56 = vadd.f32 %v2930_v6, %v1268_v58 }
 0x36c   :  { %v1393_v30 = vadd.f32 %v1392_v41, %v1264_v29 }
 0x36e   :  { %v2933_v50 = vpop.f32.mrb[18].mxu1  ;;  %v4868_v58 = vadd.f32 %v4813_v46, %v1393_v30 }
 0x36f   :  { %v1402_v45 = vpop.f32.mrb[19].mxu1  ;;  %v1408_v29 = vadd.f32 %v2933_v50, %v4815_v54 }
 0x370   :  { %v1403_v6 = vadd.f32 %v1402_v45, %v4817_v31 }
 0x372   :  { %v2936_v51 = vpop.f32.mrb[20].mxu1 }
 0x373   :  { %v1412_v62 = vpop.f32.mrb[21].mxu1 }
 0x376   :  { %v2939_v18 = vpop.f32.mrb[22].mxu1 }
 0x377   :  { %v1422_v26 = vpop.f32.mrb[23].mxu1 }
 0x37a   :  { %v2942_v42 = vpop.f32.mrb[24].mxu1 }
 0x37b   :  { %v1432_v3 = vpop.f32.mrb[25].mxu1  ;;  %v1438_v54 = vadd.f32 %v2942_v42, %v1300_v2 }
 0x37c   :  { %v1433_v31 = vadd.f32 %v1432_v3, %v1296_v38 }
 0x37e   :  { %v2945_v52 = vpop.f32.mrb[26].mxu1 }
 0x37f   :  { %v1442_v0 = vpop.f32.mrb[27].mxu1  ;;  %v1448_v50 = vadd.f32 %v2945_v52, %v1308_v57  ;;  %v4905_v52 = vadd.f32 %v1505_v53, %v1433_v31 }
 0x382   :  { %v4848_v55 = vpop.f32.mrb[28].mxu1 }
 0x383   :  { %v4850_v28 = vpop.f32.mrb[29].mxu1 }
 0x386   :  { %v4852_v21 = vpop.f32.mrb[30].mxu1 }
 0x387   :  { %5123 = vst [vmem:[#allocation14_spill] sm:$0xff] %v4852_v21  ;;  %v4854_v40 = vpop.f32.mrb[31].mxu1 }
 0x388   :  { %5124 = vst [vmem:[#allocation15_spill] sm:$0xff] %v4854_v40 }
 0x38a   :  { %v3042_v12 = vpop.f32.mrb[32].mxu1 }
 0x38b   :  { %v2010_v59 = vadd.f32 %v3042_v12, %v1880_v48  ;;  %v2004_v25 = vpop.f32.mrb[33].mxu1  ;;  %v4864_v48 = vadd.f32 %v4811_v16, %v1398_v56  ;;  %v1517_v12 = vpop.permute.xlu0 %1516  ;;  %v1428_v56 = vadd.f32 %v2939_v18, %v1292_v36 }
 0x38c   :  { %v2005_v17 = vadd.f32 %v2004_v25, %v4793_v43  ;;  %v1418_v25 = vadd.f32 %v2936_v51, %v1284_v33  ;;  %v4881_v33 = vadd.f32 %v4823_v39, %v1408_v29 }
 0x38d   :  { %v2100_v27 = vmul.f32 0.70710677, %v2010_v59  ;;  %v4896_v39 = vadd.f32 %v1501_v7, %v1428_v56 }
 0x38e   :  { %v2099_v4 = vmul.f32 0.70710677, %v2005_v17  ;;  %v3045_v23 = vpop.f32.mrb[34].mxu1 }
 0x38f   :  { %3503 = verf.f32 %v2100_v27  ;;  %v4858_v15 = vadd.f32 %v3045_v23, %v4795_v32  ;;  %v2014_v21 = vpop.f32.mrb[35].mxu1  ;;  %v1413_v27 = vadd.f32 %v1412_v62, %v1280_v1  ;;  %v4884_v1 = vadd.f32 %v4825_v37, %v1403_v6  ;;  %v1316_v3 = vpop.permute.xlu0 %1315 }
 0x390   :  { %3505 = verf.f32 %v2099_v4  ;;  %v4861_v40 = vadd.f32 %v2014_v21, %v4797_v10  ;;  %v1513_v21 = vpop.permute.xlu1 %1512  ;;  %v1423_v4 = vadd.f32 %v1422_v26, %v1288_v61  ;;  %v4888_v61 = vadd.f32 %v4837_v9, %v1418_v25 }
 0x391   :  { %v2102_v43 = vmul.f32 0.70710677, %v4858_v15  ;;  %v4903_v9 = vadd.f32 %v1509_v5, %v1438_v54  ;;  %v1458_v23 = vadd.f32 %v4848_v55, %v1316_v3 }
 0x392   :  { %v2101_v32 = vmul.f32 0.70710677, %v4861_v40  ;;  %v3048_v41 = vpop.f32.mrb[36].mxu1  ;;  %v4898_v26 = vadd.f32 %v1497_v19, %v1423_v4  ;;  %v2084_v19 = vmul.f32 0.5, %v2010_v59 }
 0x393   :  { %3507 = verf.f32 %v2102_v43  ;;  %v4874_v10 = vadd.f32 %v3048_v41, %v4799_v11  ;;  %v2024_v16 = vpop.f32.mrb[37].mxu1  ;;  %v1443_v11 = vadd.f32 %v1442_v0, %v1304_v13  ;;  %v2083_v13 = vmul.f32 0.5, %v2005_v17 }
 0x394   :  { %3509 = verf.f32 %v2101_v32  ;;  %v4877_v46 = vadd.f32 %v2024_v16, %v4801_v20  ;;  %v4891_v20 = vadd.f32 %v4839_v14, %v1413_v27  ;;  %v4907_v14 = vadd.f32 %v1517_v12, %v1448_v50  ;;  %v1312_v2 = vpop.permute.xlu1 %1311 }
 0x395   :  { %v2104_v45 = vmul.f32 0.70710677, %v4874_v10  ;;  %v4910_v7 = vadd.f32 %v1513_v21, %v1443_v11  ;;  %v1453_v59 = vadd.f32 %v4850_v28, %v1312_v2  ;;  %v2086_v41 = vmul.f32 0.5, %v4858_v15  ;;  %v1525_v21 = vpop.permute.xlu0 %1524 }
 0x396   :  { %v2103_v51 = vmul.f32 0.70710677, %v4877_v46  ;;  %v3051_v36 = vpop.f32.mrb[38].mxu1  ;;  %v2085_v27 = vmul.f32 0.5, %v4861_v40  ;;  %v4932_v54 = vadd.f32 %v1525_v21, %v1458_v23 }
 0x397   :  { %3511 = verf.f32 %v2104_v45  ;;  %v4894_v62 = vadd.f32 %v3051_v36, %v4803_v8  ;;  %v2034_v18 = vpop.f32.mrb[39].mxu1 }
 0x398   :  { %3513 = verf.f32 %v2103_v51  ;;  %v4901_v37 = vadd.f32 %v2034_v18, %v4805_v44  ;;  %v1521_v4 = vpop.permute.xlu1 %1520  ;;  %v2087_v18 = vmul.f32 0.5, %v4877_v46 }
 0x399   :  { %v3504_v42 = vpop.eup %3503  ;;  %v2106_v8 = vmul.f32 0.70710677, %v4894_v62  ;;  %v4934_v50 = vadd.f32 %v1521_v4, %v1453_v59 }
 0x39a   :  { %v3506_v0 = vpop.eup %3505  ;;  %v2132_v38 = vadd.f32 1.0, %v3504_v42  ;;  %v2105_v57 = vmul.f32 0.70710677, %v4901_v37  ;;  %v3054_v44 = vpop.f32.mrb[40].mxu1  ;;  %v2089_v46 = vmul.f32 0.5, %v4901_v37 }
 0x39b   :  { %v2131_v30 = vadd.f32 1.0, %v3506_v0  ;;  %3515 = verf.f32 %v2106_v8  ;;  %v4914_v5 = vadd.f32 %v3054_v44, %v4807_v35  ;;  %v2044_v53 = vpop.f32.mrb[41].mxu1 }
 0x39c   :  { %v2148_v43 = vmul.f32 %v2132_v38, %v2084_v19  ;;  %3517 = verf.f32 %v2105_v57  ;;  %v4918_v29 = vadd.f32 %v2044_v53, %v4809_v63 }
 0x39d   :  { %v3508_v6 = vpop.eup %3507  ;;  %v2147_v32 = vmul.f32 %v2131_v30, %v2083_v13  ;;  %v2108_v17 = vmul.f32 0.70710677, %v4914_v5 }
 0x39e   :  { %v3510_v12 = vpop.eup %3509  ;;  %v2164_v35 = vadd.f32 %v2148_v43, %v4864_v48  ;;  %v2134_v25 = vadd.f32 1.0, %v3508_v6  ;;  %v2107_v55 = vmul.f32 0.70710677, %v4918_v29  ;;  %v3057_v16 = vpop.f32.mrb[42].mxu1 }
 0x39f   :  { %v4927_v63 = vadd.f32 %v2147_v32, %v4868_v58  ;;  %v2133_v56 = vadd.f32 1.0, %v3510_v12  ;;  %3519 = verf.f32 %v2108_v17  ;;  %v4930_v28 = vadd.f32 %v3057_v16, %v4819_v22  ;;  %v2054_v15 = vpop.f32.mrb[43].mxu1 }
 0x3a0   :  { %v2196_v48 = vmul.f32 0.70710677, %v2164_v35  ;;  %v2150_v31 = vmul.f32 %v2134_v25, %v2086_v41  ;;  %3521 = verf.f32 %v2107_v55  ;;  %v2088_v58 = vmul.f32 0.5, %v4874_v10 }
 0x3a1   :  { %v3512_v40 = vpop.eup %3511  ;;  %v2195_v45 = vmul.f32 0.70710677, %v4927_v63  ;;  %v2149_v11 = vmul.f32 %v2133_v56, %v2085_v27  ;;  %v2110_v42 = vmul.f32 0.70710677, %v4930_v28  ;;  %v2055_v2 = vadd.f32 %v2054_v15, %v4821_v49 }
 0x3a2   :  { %v3514_v51 = vpop.eup %3513  ;;  %v2166_v36 = vadd.f32 %v2150_v31, %v4881_v33  ;;  %v2136_v22 = vadd.f32 1.0, %v3512_v40  ;;  %v3060_v3 = vpop.f32.mrb[44].mxu1  ;;  %3523 = verf.f32 %v2196_v48  ;;  %v2090_v10 = vmul.f32 0.5, %v4894_v62 }
 0x3a3   :  { %v2165_v8 = vadd.f32 %v2149_v11, %v4884_v1  ;;  %v2135_v0 = vadd.f32 1.0, %v3514_v51  ;;  %v2064_v19 = vpop.f32.mrb[45].mxu1  ;;  %3525 = verf.f32 %v2110_v42  ;;  %v2109_v23 = vmul.f32 0.70710677, %v2055_v2 }
 0x3a4   :  { %v2198_v38 = vmul.f32 0.70710677, %v2166_v36  ;;  %v2152_v57 = vmul.f32 %v2136_v22, %v2088_v58  ;;  %3527 = verf.f32 %v2195_v45  ;;  %v4948_v62 = vadd.f32 %v3060_v3, %v4833_v60 }
 0x3a5   :  { %v3516_v44 = vpop.eup %3515  ;;  %v2197_v33 = vmul.f32 0.70710677, %v2165_v8  ;;  %v2151_v13 = vmul.f32 %v2135_v0, %v2087_v18  ;;  %v2092_v17 = vmul.f32 0.5, %v4914_v5  ;;  %v2180_v12 = vmul.f32 0.5, %v2164_v35 }
 0x3a6   :  { %v3518_v30 = vpop.eup %3517  ;;  %3529 = verf.f32 %v2198_v38  ;;  %v2168_v53 = vadd.f32 %v2152_v57, %v4888_v61  ;;  %v2138_v1 = vadd.f32 1.0, %v3516_v44  ;;  %v3063_v43 = vpop.f32.mrb[46].mxu1  ;;  %v2091_v27 = vmul.f32 0.5, %v4918_v29 }
 0x3a7   :  { %3531 = verf.f32 %v2197_v33  ;;  %v2167_v49 = vadd.f32 %v2151_v13, %v4891_v20  ;;  %v2137_v6 = vadd.f32 1.0, %v3518_v30  ;;  %v2074_v59 = vpop.f32.mrb[47].mxu1  ;;  %v2112_v60 = vmul.f32 0.70710677, %v4948_v62 }
 0x3a8   :  { %v2200_v32 = vmul.f32 0.70710677, %v2168_v53  ;;  %v2154_v41 = vmul.f32 %v2138_v1, %v2090_v10  ;;  %3533 = verf.f32 %v2109_v23  ;;  %v4960_v56 = vadd.f32 %v2064_v19, %v4835_v24 }
 0x3a9   :  { %v3520_v37 = vpop.eup %3519  ;;  %v2199_v25 = vmul.f32 0.70710677, %v2167_v49  ;;  %v2153_v61 = vmul.f32 %v2137_v6, %v2089_v46  ;;  %v2179_v35 = vmul.f32 0.5, %v4927_v63  ;;  %v2094_v40 = vmul.f32 0.5, %v4930_v28 }
 0x3aa   :  { %v3522_v55 = vpop.eup %3521  ;;  %3535 = verf.f32 %v2200_v32  ;;  %v4953_v20 = vadd.f32 %v2154_v41, %v4896_v39  ;;  %v2140_v16 = vadd.f32 1.0, %v3520_v37  ;;  %v2182_v39 = vmul.f32 0.5, %v2166_v36  ;;  %v1324_v32 = vpop.permute.xlu0 %1323 }
 0x3ab   :  { %3537 = verf.f32 %v2199_v25  ;;  %v4957_v21 = vadd.f32 %v2153_v61, %v4898_v26  ;;  %v2139_v5 = vadd.f32 1.0, %v3522_v55  ;;  %v2111_v24 = vmul.f32 0.70710677, %v4960_v56  ;;  %v5125_v61 = vld [vmem:[#allocation14_spill] sm:$0xff] }
 0x3ac   :  { %v2202_v29 = vmul.f32 0.70710677, %v4953_v20  ;;  %v2156_v15 = vmul.f32 %v2140_v16, %v2092_v17  ;;  %3539 = verf.f32 %v2112_v60  ;;  %v3524_v4 = vpop.eup %3523  ;;  %v4971_v63 = vadd.f32 %v3063_v43, %v4844_v47 }
 0x3ad   :  { %v2201_v48 = vmul.f32 0.70710677, %v4957_v21  ;;  %v2155_v31 = vmul.f32 %v2139_v5, %v2091_v27  ;;  %v3526_v45 = vpop.eup %3525  ;;  %v4977_v36 = vadd.f32 %v2074_v59, %v4846_v34  ;;  %v2181_v22 = vmul.f32 0.5, %v2165_v8 }
 0x3ae   :  { %3541 = verf.f32 %v2202_v29  ;;  %v4967_v26 = vadd.f32 %v2156_v15, %v4903_v9  ;;  %v3528_v11 = vpop.eup %3527  ;;  %v2142_v51 = vadd.f32 1.0, %v3526_v45  ;;  %v2093_v9 = vmul.f32 0.5, %v2055_v2 }
 0x3af   :  { %3543 = verf.f32 %v2201_v48  ;;  %v4974_v58 = vadd.f32 %v2155_v31, %v4905_v52  ;;  %v2184_v3 = vmul.f32 0.5, %v2168_v53  ;;  %v2114_v19 = vmul.f32 0.70710677, %v4971_v63  ;;  %v1320_v31 = vpop.permute.xlu1 %1319 }
 0x3b0   :  { %v3530_v28 = vpop.eup %3529  ;;  %v2204_v18 = vmul.f32 0.70710677, %v4967_v26  ;;  %3545 = verf.f32 %v2111_v24  ;;  %v2158_v0 = vmul.f32 %v2142_v51, %v2094_v40  ;;  %v2183_v52 = vmul.f32 0.5, %v2167_v49 }
 0x3b1   :  { %v3532_v42 = vpop.eup %3531  ;;  %v2203_v47 = vmul.f32 0.70710677, %v4974_v58  ;;  %v2113_v57 = vmul.f32 0.70710677, %v4977_v36  ;;  %v2227_v34 = vadd.f32 1.0, %v3528_v11  ;;  %v2228_v2 = vadd.f32 1.0, %v3524_v4 }
 0x3b2   :  { %v3534_v38 = vpop.eup %3533  ;;  %3547 = verf.f32 %v2204_v18  ;;  %v4984_v8 = vadd.f32 %v2158_v0, %v4907_v14  ;;  %v2229_v13 = vadd.f32 1.0, %v3532_v42  ;;  %v2230_v46 = vadd.f32 1.0, %v3530_v28  ;;  %v5126_v11 = vld [vmem:[#allocation15_spill] sm:$0xff] }
 0x3b3   :  { %3549 = verf.f32 %v2203_v47  ;;  %v2141_v10 = vadd.f32 1.0, %v3534_v38  ;;  %v2243_v33 = vmul.f32 %v2227_v34, %v2179_v35  ;;  %v2096_v23 = vmul.f32 0.5, %v4948_v62 }
 0x3b4   :  { %v3536_v44 = vpop.eup %3535  ;;  %3551 = verf.f32 %v2114_v19  ;;  %v2206_v53 = vmul.f32 0.70710677, %v4984_v8  ;;  %v2244_v49 = vmul.f32 %v2228_v2, %v2180_v12  ;;  %v2245_v6 = vmul.f32 %v2229_v13, %v2181_v22 }
 0x3b5   :  { %v3538_v30 = vpop.eup %3537  ;;  %v2157_v1 = vmul.f32 %v2141_v10, %v2093_v9  ;;  %3553 = verf.f32 %v2113_v57  ;;  %v2246_v59 = vmul.f32 %v2230_v46, %v2182_v39  ;;  %v2232_v37 = vadd.f32 1.0, %v3536_v44 }
 0x3b6   :  { %v3540_v43 = vpop.eup %3539  ;;  %v2231_v14 = vadd.f32 1.0, %v3538_v30  ;;  %3555 = verf.f32 %v2206_v53  ;;  %v1468_v27 = vadd.f32 %v5125_v61, %v1324_v32  ;;  %v3312_v55 = vpack.c.bf16 %v2244_v49, %v2243_v33  ;;  %v1529_v33 = vpop.permute.xlu1 %1528 }
 0x3b7   :  { %v4989_v41 = vadd.f32 %v2157_v1, %v4910_v7  ;;  %v2144_v17 = vadd.f32 1.0, %v3540_v43  ;;  %v3316_v16 = vpack.c.bf16 %v2246_v59, %v2245_v6  ;;  %v2186_v5 = vmul.f32 0.5, %v4953_v20 }
 0x3b8   :  { %v3542_v25 = vpop.eup %3541  ;;  %v2247_v60 = vmul.f32 %v2231_v14, %v2183_v52  ;;  %v2248_v29 = vmul.f32 %v2232_v37, %v2184_v3  ;;  %v2185_v4 = vmul.f32 0.5, %v4957_v21  ;;  %v2095_v7 = vmul.f32 0.5, %v4960_v56  ;;  %3313 = vmatprep.subr.bf16.mxu0 %v3312_v55  ;;  %3344 = vmatprep.subr.bf16.mxu1 %v3312_v55 }
 0x3b9   :  { %v3544_v62 = vpop.eup %3543  ;;  %v2205_v12 = vmul.f32 0.70710677, %v4989_v41  ;;  %v2160_v35 = vmul.f32 %v2144_v17, %v2096_v23  ;;  %v2234_v48 = vadd.f32 1.0, %v3542_v25  ;;  %3315 = vmatpush3.bf16.msra.mxu0 %v3312_v55  ;;  %3352 = vmatpush3.bf16.msra.mxu1 %v3312_v55  ;;  %v1463_v51 = vadd.f32 %v5126_v11, %v1320_v31  ;;  %v2491_v11 = vld [vmem:[%s5066_s3 + $0x118] sm:$0xff] }
 0x3ba   :  { %v3546_v15 = vpop.eup %3545  ;;  %v2233_v39 = vadd.f32 1.0, %v3544_v62  ;;  %v3320_v20 = vpack.c.bf16 %v2248_v29, %v2247_v60  ;;  %3317 = vmatprep.subr.bf16.mxu0 %v3316_v16  ;;  %3345 = vmatprep.subr.bf16.mxu1 %v3316_v16  ;;  %v2188_v22 = vmul.f32 0.5, %v4967_v26  ;;  %v2187_v3 = vmul.f32 0.5, %v4974_v58  ;;  %v1533_v26 = vpop.permute.xlu0 %1532 }
 0x3bb   :  { %3557 = verf.f32 %v2205_v12  ;;  %v4997_v40 = vadd.f32 %v2160_v35, %v4932_v54  ;;  %v2143_v45 = vadd.f32 1.0, %v3546_v15  ;;  %v2250_v56 = vmul.f32 %v2234_v48, %v2186_v5 }
 0x3bc   :  { %v3548_v24 = vpop.eup %3547  ;;  %v2249_v21 = vmul.f32 %v2233_v39, %v2185_v4  ;;  %v2098_v47 = vmul.f32 0.5, %v4971_v63  ;;  %v2097_v10 = vmul.f32 0.5, %v4977_v36  ;;  %v1550_v63 = vadd.f32 %v1533_v26, %v1468_v27 }
 0x3bd   :  { %v3550_v28 = vpop.eup %3549  ;;  %v2208_v18 = vmul.f32 0.70710677, %v4997_v40  ;;  %v2159_v9 = vmul.f32 %v2143_v45, %v2095_v7  ;;  %v2236_v42 = vadd.f32 1.0, %v3548_v24  ;;  %3319 = vmatpush3.bf16.msra.mxu0 %v3316_v16  ;;  %3353 = vmatpush3.bf16.msra.mxu1 %v3316_v16  ;;  %v1549_v30 = vadd.f32 %v1529_v33, %v1463_v51  ;;  %v2497_v45 = vld [vmem:[%s5066_s3 + $0x148] sm:$0xff]  ;;  %v2498_v24 = vld [vmem:[%s5066_s3 + $0x150] sm:$0xff]  ;;  %v2499_v51 = vld [vmem:[%s5066_s3 + $0x158] sm:$0xff] }
 0x3be   :  { %v3552_v54 = vpop.eup %3551  ;;  %v3324_v0 = vpack.c.bf16 %v2250_v56, %v2249_v21  ;;  %v2235_v19 = vadd.f32 1.0, %v3550_v28  ;;  %3321 = vmatprep.subr.bf16.mxu0 %v3320_v20  ;;  %3346 = vmatprep.subr.bf16.mxu1 %v3320_v20  ;;  %v2190_v43 = vmul.f32 0.5, %v4984_v8  ;;  %v2189_v59 = vmul.f32 0.5, %v4989_v41  ;;  %v2492_v21 = vld [vmem:[%s5066_s3 + $0x120] sm:$0xff]  ;;  %v2493_v28 = vld [vmem:[%s5066_s3 + $0x128] sm:$0xff] }
 0x3bf   :  { %v3554_v38 = vpop.eup %3553  ;;  %3559 = verf.f32 %v2208_v18  ;;  %v2175_v52 = vadd.f32 %v2159_v9, %v4934_v50  ;;  %v2146_v57 = vadd.f32 1.0, %v3552_v54  ;;  %v2252_v34 = vmul.f32 %v2236_v42, %v2188_v22  ;;  %v2500_v56 = vld [vmem:[%s5066_s3 + $0x160] sm:$0xff]  ;;  %v2501_v22 = vld [vmem:[%s5066_s3 + $0x168] sm:$0xff]  ;;  %v2494_v18 = vld [vmem:[%s5066_s3 + $0x130] sm:$0xff] }
 0x3c0   :  { %v2145_v2 = vadd.f32 1.0, %v3554_v38  ;;  %v2251_v44 = vmul.f32 %v2235_v19, %v2187_v3  ;;  %v3556_v58 = vpop.eup %3555  ;;  %v2192_v27 = vmul.f32 0.5, %v4997_v40  ;;  %v2489_v40 = vld [vmem:[%s5066_s3 + $0x108] sm:$0xff]  ;;  %v2502_v9 = vld [vmem:[%s5066_s3 + $0x170] sm:$0xff]  ;;  %v2495_v42 = vld [vmem:[%s5066_s3 + $0x138] sm:$0xff]  ;;  %v2278_v3 = vpop.permute.xlu1 %2277 }
 0x3c1   :  { %v2207_v13 = vmul.f32 0.70710677, %v2175_v52  ;;  %v2162_v46 = vmul.f32 %v2146_v57, %v2098_v47  ;;  %v2238_v50 = vadd.f32 1.0, %v3556_v58  ;;  %3323 = vmatpush3.bf16.msra.mxu0 %v3320_v20  ;;  %3354 = vmatpush3.bf16.msra.mxu1 %v3320_v20  ;;  %v2191_v55 = vmul.f32 0.5, %v2175_v52  ;;  %v2490_v20 = vld [vmem:[%s5066_s3 + $0x110] sm:$0xff]  ;;  %v2503_v54 = vld [vmem:[%s5066_s3 + $0x178] sm:$0xff] }
 0x3c2   :  { %v2161_v53 = vmul.f32 %v2145_v2, %v2097_v10  ;;  %v3328_v1 = vpack.c.bf16 %v2252_v34, %v2251_v44  ;;  %3325 = vmatprep.subr.bf16.mxu0 %v3324_v0  ;;  %3347 = vmatprep.subr.bf16.mxu1 %v3324_v0 }
 0x3c3   :  { %3561 = verf.f32 %v2207_v13  ;;  %v2178_v23 = vadd.f32 %v2162_v46, %v1550_v63  ;;  %v2254_v17 = vmul.f32 %v2238_v50, %v2190_v43 }
 0x3c4   :  { %v2177_v36 = vadd.f32 %v2161_v53, %v1549_v30 }
 0x3c5   :  { %v3558_v49 = vpop.eup %3557  ;;  %v2210_v6 = vmul.f32 0.70710677, %v2178_v23  ;;  %3327 = vmatpush3.bf16.msra.mxu0 %v3324_v0  ;;  %3355 = vmatpush3.bf16.msra.mxu1 %v3324_v0  ;;  %v2194_v35 = vmul.f32 0.5, %v2178_v23 }
 0x3c6   :  { %v2209_v14 = vmul.f32 0.70710677, %v2177_v36  ;;  %v2237_v32 = vadd.f32 1.0, %v3558_v49  ;;  %3329 = vmatprep.subr.bf16.mxu0 %v3328_v1  ;;  %3348 = vmatprep.subr.bf16.mxu1 %v3328_v1  ;;  %v2193_v4 = vmul.f32 0.5, %v2177_v36 }
 0x3c7   :  { %3563 = verf.f32 %v2210_v6 }
 0x3c8   :  { %3565 = verf.f32 %v2209_v14  ;;  %v2253_v37 = vmul.f32 %v2237_v32, %v2189_v59 }
 0x3c9   :  { %v3560_v25 = vpop.eup %3559  ;;  %3331 = vmatpush3.bf16.msra.mxu0 %v3328_v1  ;;  %3356 = vmatpush3.bf16.msra.mxu1 %v3328_v1 }
 0x3ca   :  { %v3332_v61 = vpack.c.bf16 %v2254_v17, %v2253_v37  ;;  %v2240_v8 = vadd.f32 1.0, %v3560_v25 }
 0x3cc   :  { %3333 = vmatprep.subr.bf16.mxu0 %v3332_v61  ;;  %3349 = vmatprep.subr.bf16.mxu1 %v3332_v61  ;;  %v2256_v60 = vmul.f32 %v2240_v8, %v2192_v27 }
 0x3cd   :  { %v3562_v41 = vpop.eup %3561  ;;  %3335 = vmatpush3.bf16.msra.mxu0 %v3332_v61  ;;  %3357 = vmatpush3.bf16.msra.mxu1 %v3332_v61 }
 0x3ce   :  { %v2239_v16 = vadd.f32 1.0, %v3562_v41 }
 0x3d0   :  { %v2255_v62 = vmul.f32 %v2239_v16, %v2191_v55 }
 0x3d1   :  { %v3564_v5 = vpop.eup %3563 }
 0x3d2   :  { %v3566_v12 = vpop.eup %3565  ;;  %v3336_v29 = vpack.c.bf16 %v2256_v60, %v2255_v62  ;;  %v2242_v15 = vadd.f32 1.0, %v3564_v5 }
 0x3d3   :  { %v2241_v7 = vadd.f32 1.0, %v3566_v12 }
 0x3d4   :  { %3337 = vmatprep.subr.bf16.mxu0 %v3336_v29  ;;  %3350 = vmatprep.subr.bf16.mxu1 %v3336_v29  ;;  %v2258_v39 = vmul.f32 %v2242_v15, %v2194_v35 }
 0x3d5   :  { %3339 = vmatpush3.bf16.msra.mxu0 %v3336_v29  ;;  %3358 = vmatpush3.bf16.msra.mxu1 %v3336_v29  ;;  %v2257_v48 = vmul.f32 %v2241_v7, %v2193_v4 }
 0x3d7   :  { %v3340_v31 = vpack.c.bf16 %v2258_v39, %v2257_v48 }
 0x3d9   :  { %3341 = vmatprep.subr.bf16.mxu0 %v3340_v31  ;;  %3351 = vmatprep.subr.bf16.mxu1 %v3340_v31 }
 0x3da   :  { %3343 = vmatpush3.bf16.msra.mxu0 %v3340_v31  ;;  %3359 = vmatpush3.bf16.msra.mxu1 %v3340_v31 }
 0x3dd   :  { %3097 = vmatmul.mubr.f32.vlgmr.msra.gmra.mrb[48].mxu0 %v2489_v40  ;;  %3109 = vmatmul.mubr.f32.vlgmr.msra.gmra.mrb[48].mxu1 %v2497_v45 }
 0x3de   :  { %3099 = vmatprep.mubr.f32.mxu0 %v2490_v20  ;;  %3111 = vmatprep.mubr.f32.mxu1 %v2498_v24 }
 0x3e1   :  { %3100 = vmatmul.mubr.f32.gmra.mrb[50].mxu0 %v2491_v11  ;;  %3112 = vmatmul.mubr.f32.gmra.mrb[50].mxu1 %v2499_v51 }
 0x3e2   :  { %3102 = vmatprep.mubr.f32.mxu0 %v2492_v21  ;;  %3114 = vmatprep.mubr.f32.mxu1 %v2500_v56 }
 0x3e5   :  { %3103 = vmatmul.mubr.f32.gmra.mrb[52].mxu0 %v2493_v28  ;;  %3115 = vmatmul.mubr.f32.gmra.mrb[52].mxu1 %v2501_v22 }
 0x3e6   :  { %3105 = vmatprep.mubr.f32.mxu0 %v2494_v18  ;;  %3117 = vmatprep.mubr.f32.mxu1 %v2502_v9 }
 0x3e9   :  { %3106 = vmatmul.mubr.f32.gmra.mrb[54].mxu0 %v2495_v42  ;;  %3118 = vmatmul.mubr.f32.gmra.mrb[54].mxu1 %v2503_v54 }
 0x4b0   :  { %v3098_v47 = vpop.f32.mrb[48].mxu0  ;;  %v3110_v0 = vpop.f32.mrb[48].mxu1 }
 0x4b1   :  { %v2391_v19 = vpop.f32.mrb[49].mxu0  ;;  %v2424_v38 = vpop.f32.mrb[49].mxu1 }
 0x4b2   :  { %v2392_v52 = vadd.f32 %v2391_v19, %v2278_v3 }
 0x4b4   :  { %2455 = vst [vmem:[#allocation8] sm:$0xff] %v2392_v52  ;;  %v3101_v57 = vpop.f32.mrb[50].mxu0  ;;  %v3113_v34 = vpop.f32.mrb[50].mxu1 }
 0x4b5   :  { %v2400_v26 = vpop.f32.mrb[51].mxu0  ;;  %v2432_v10 = vpop.f32.mrb[51].mxu1 }
 0x4b6   :  { %3645 = shalt.err (!%p3642_p0)
}
 0x4b7   :  { %s3646_s25 = scalar_lea.hbm %s5072_s9, 128 }
 0x4b8   :  { %p3647_p1 = scmp.ne.s32.totalorder %s5072_s9, %s3646_s25  ;;  %p3650_p2 = scmp.lt.u32.totalorder %s3646_s25, %s5072_s9 }
 0x4ba   :  { %p3652_p3 = pnand %p3650_p2, %p3647_p1 }
 0x4bc   :  { %3655 = shalt.err (!%p3652_p3)
}
 0x4bd   :  { %2465 = dma.vmem_to_hbm [thread:$0]  %s2463_s4, 128, %s5072_s9, [#allocation4]   ;;  %v3104_v2 = vpop.f32.mrb[52].mxu0  ;;  %v3116_v44 = vpop.f32.mrb[52].mxu1 }
 0x4be   :  { %v2408_v58 = vpop.f32.mrb[53].mxu0  ;;  %v2440_v33 = vpop.f32.mrb[53].mxu1 }
 0x4bf   :  { %v3107_v63 = vpop.f32.mrb[54].mxu0  ;;  %v3119_v13 = vpop.f32.mrb[54].mxu1 }
 0x4c0   :  { %v2416_v46 = vpop.f32.mrb[55].mxu0  ;;  %v2448_v30 = vpop.f32.mrb[55].mxu1 }
 0x4c1   :  { %3660 = dma.done.wait [#allocation4], 128  }
 0x4c2   :  { %3661 = vsyncadd [#allocation4], 4294967168 }
 0x4c3   :  { %2469 = vsyncpa [#allocation3], 1 }
 0x4c4   :  { %2470 = vsyncpa [#allocation6], 1 }
 0x4c5   :  { %2471 = vsyncpa [#allocation4], 1 }

</bundles_post_ra>
